<compile_context>
chip_gen: v5e
topology: v5e:2x2
jax: 0.10.0
libtpu: 0.0.40
codegen_flags: <defaults>
</compile_context>

<pallas_src>
import jax
import jax.numpy as jnp
from jax.experimental import pallas as pl
from jax.experimental.pallas import tpu as pltpu


def decoder_kernel(
    sos_ref,               # SMEM (1,) int32
    enc_out_ref,           # VMEM (B, S, H) bf16
    enc_hid_ref,           # VMEM (B, H)    f32
    emb_ref,               # VMEM (V, H)    bf16
    wa_w_ref, wa_b_ref,    # VMEM (H, H) bf16, (1, H) f32
    ua_w_ref, ua_b_ref,    # VMEM (H, H) bf16, (1, H) f32
    va_w_ref, va_b_ref,    # VMEM (1, H) f32, (1, 1) f32
    w_ie_ref,              # VMEM (H, 3H) bf16  GRU W_ih (embedded half), gates [r|z|n] on lanes
    w_ic_ref,              # VMEM (H, 3H) bf16  GRU W_ih (context half)
    w_hh_ref,              # VMEM (H, 3H) bf16  GRU W_hh
    b_ih_ref, b_hh_ref,    # VMEM (1, 3H) f32 each
    out_w_ref, out_b_ref,  # VMEM (H, V) bf16, (1, V) f32
    logp_ref,              # out VMEM (T, B, V) f32  (written back to HBM once)
    attn_ref,              # out VMEM (T, B, S) f32
    hid_out_ref,           # out VMEM (B, H)    f32
):
    T, B, V = logp_ref.shape
    S = attn_ref.shape[2]
    H = hid_out_ref.shape[1]

    lane_v = jax.lax.broadcasted_iota(jnp.int32, (B, V), 1)

    # ---- loop-invariant values, hoisted once for all T decode steps -------------
    keys = enc_out_ref[...]                                   # (B, S, H) bf16
    # Ua(keys) + bias, computed once (time-invariant). Kept in bf16 to halve its
    # live footprint; the add inside the loop promotes back to f32.
    uak = (jnp.einsum('bsh,ho->bso', keys, ua_w_ref[...],
                      preferred_element_type=jnp.float32)
           + ua_b_ref[...]).astype(jnp.bfloat16)              # (B, S, H)

    emb_tab = emb_ref[...]                                    # (V, H)  bf16
    wa_w = wa_w_ref[...]; wa_b = wa_b_ref[...]
    va_w = va_w_ref[...]; va_b = va_b_ref[...]
    w_ie = w_ie_ref[...]; w_ic = w_ic_ref[...]; w_hh = w_hh_ref[...]
    b_ih = b_ih_ref[...]; b_hh = b_hh_ref[...]
    out_w = out_w_ref[...]; out_b = out_b_ref[...]

    def step(t, hidden, onehot):
        """One greedy decode step. hidden: (B,H) f32, onehot: (B,V) bf16."""
        hidden_lp = hidden.astype(jnp.bfloat16)

        # Embedding lookup (one-hot matmul; eval-mode dropout = identity).
        embedded = jnp.dot(onehot, emb_tab,
                           preferred_element_type=jnp.float32)          # (B, H) f32

        # --- Bahdanau attention: Va(tanh(Wa(query) + Ua(keys))) -----------------
        wa_q = (jnp.dot(hidden_lp, wa_w, preferred_element_type=jnp.float32)
                + wa_b)                                                  # (B, H)
        pre = jnp.tanh(wa_q[:, None, :] + uak)                           # (B, S, H) f32
        # Va as VPU multiply + lane reduction (no per-batch N=1 MXU matmuls).
        scores = jnp.sum(pre * va_w, axis=-1) + va_b                     # (B, S)

        # softmax over source positions; divide on the EUP.
        m = jnp.max(scores, axis=-1, keepdims=True)
        e = jnp.exp(scores - m)
        weights = e * pl.reciprocal(jnp.sum(e, axis=-1, keepdims=True),
                                    approx=True)                         # (B, S)

        # context = weights @ keys on the VPU (mul + sublane reduce); small S*H.
        context = jnp.sum(weights[:, :, None] * keys, axis=1)            # (B, H) f32

        # --- single GRU step on [embedded ; context]: 3 fused (H,3H) dots -------
        emb_lp = embedded.astype(jnp.bfloat16)
        ctx_lp = context.astype(jnp.bfloat16)
        gi = (jnp.dot(emb_lp, w_ie, preferred_element_type=jnp.float32)
              + jnp.dot(ctx_lp, w_ic, preferred_element_type=jnp.float32)
              + b_ih)                                                     # (B, 3H)
        gh = (jnp.dot(hidden_lp, w_hh, preferred_element_type=jnp.float32)
              + b_hh)                                                     # (B, 3H)
        gz = gi + gh
        r = jax.nn.sigmoid(gz[:, 0:H])
        z = jax.nn.sigmoid(gz[:, H:2 * H])
        n = jnp.tanh(gi[:, 2 * H:3 * H] + r * gh[:, 2 * H:3 * H])
        h_new = (1.0 - z) * n + z * hidden                                # (B, H) f32

        # --- output projection + log_softmax ------------------------------------
        logits = (jnp.dot(h_new.astype(jnp.bfloat16), out_w,
                          preferred_element_type=jnp.float32) + out_b)    # (B, V)
        lmax = jnp.max(logits, axis=-1, keepdims=True)
        lse = jnp.log(jnp.sum(jnp.exp(logits - lmax), axis=-1,
                              keepdims=True)) + lmax
        logp_ref[t] = logits - lse          # store into VMEM-resident (T,B,V) slab
        attn_ref[t] = weights               # store into VMEM-resident (T,B,S) slab

        # greedy next token (first-max tie-break, like torch.topk)
        is_max = logits == lmax
        first_idx = jnp.min(jnp.where(is_max, lane_v, V), axis=-1,
                            keepdims=True)                                # (B, 1)
        onehot_new = (lane_v == first_idx).astype(jnp.bfloat16)
        return h_new, onehot_new

    hidden0 = enc_hid_ref[...]                                  # (B, H) f32
    onehot0 = (lane_v == sos_ref[0]).astype(jnp.bfloat16)       # (B, V)

    if T <= 16:
        # Small T: fully unroll at trace time (cross-step scheduler visibility;
        # the non-recurrent tail of step t overlaps the head of step t+1).
        hidden, onehot = hidden0, onehot0
        for t in range(T):
            hidden, onehot = step(t, hidden, onehot)
    else:
        hidden, onehot = jax.lax.fori_loop(
            0, T, lambda t, c: step(t, *c), (hidden0, onehot0))

    hid_out_ref[...] = hidden


def attentive_decoder_forward(encoder_outputs, encoder_hidden, sos_token, params,
                              max_length=10):
    """encoder_outputs: (B, S, H) f32; encoder_hidden: (1, B, H) f32."""
    B, S, H = encoder_outputs.shape
    V = params['emb'].shape[0]
    T = max_length

    sos = jnp.asarray([sos_token], dtype=jnp.int32)
    enc_hid = encoder_hidden.reshape(B, H).astype(jnp.float32)
    enc_out = encoder_outputs.astype(jnp.bfloat16)

    vmem = pl.BlockSpec(memory_space=pltpu.MemorySpace.VMEM)
    smem = pl.BlockSpec(memory_space=pltpu.MemorySpace.SMEM)

    in_specs = [smem] + [vmem] * 16
    out_specs = [vmem, vmem, vmem]
    out_shape = [
        jax.ShapeDtypeStruct((T, B, V), jnp.float32),
        jax.ShapeDtypeStruct((T, B, S), jnp.float32),
        jax.ShapeDtypeStruct((B, H), jnp.float32),
    ]

    logp_tbv, attn_tbs, hid = pl.pallas_call(
        decoder_kernel,
        out_shape=out_shape,
        in_specs=in_specs,
        out_specs=out_specs,
        compiler_params=pltpu.CompilerParams(
            vmem_limit_bytes=32 * 1024 * 1024,
        ),
    )(
        sos, enc_out, enc_hid,
        params['emb'],
        params['wa_w'], params['wa_b'],
        params['ua_w'], params['ua_b'],
        params['va_w'], params['va_b'],
        params['w_ih_emb'], params['w_ih_ctx'], params['w_hh'],
        params['b_ih'], params['b_hh'],
        params['out_w'], params['out_b'],
    )
    logp = jnp.transpose(logp_tbv, (1, 0, 2))   # (B, T, V)
    attn = jnp.transpose(attn_tbs, (1, 0, 2))   # (B, T, S)
    return logp, hid.reshape(1, B, H), attn


def init_params(key, hidden_size, output_size):
    H, V = hidden_size, output_size
    ks = jax.random.split(key, 13)
    s = 0.1
    f32, bf16 = jnp.float32, jnp.bfloat16
    return dict(
        emb=(jax.random.normal(ks[0], (V, H), f32) * s).astype(bf16),
        wa_w=(jax.random.normal(ks[1], (H, H), f32) * s).astype(bf16),   # stored (in, out)
        wa_b=jax.random.normal(ks[2], (1, H), f32) * s,
        ua_w=(jax.random.normal(ks[3], (H, H), f32) * s).astype(bf16),
        ua_b=jax.random.normal(ks[4], (1, H), f32) * s,
        va_w=jax.random.normal(ks[5], (1, H), f32) * s,                  # row vector (VPU path)
        va_b=jax.random.normal(ks[6], (1, 1), f32) * s,
        # PyTorch GRU weight_ih is (3H, 2H), gate blocks [r, z, n] along dim 0 and
        # the [embedded | context] halves along dim 1. Here: split halves,
        # transpose to (in, out), and stack the gates along the output/lane axis
        # -> (H, 3H) per input path so the per-step GRU is 3 wide matmuls.
        w_ih_emb=(jax.random.normal(ks[7], (H, 3 * H), f32) * s).astype(bf16),
        w_ih_ctx=(jax.random.normal(ks[8], (H, 3 * H), f32) * s).astype(bf16),
        w_hh=(jax.random.normal(ks[9], (H, 3 * H), f32) * s).astype(bf16),
        b_ih=jax.random.normal(ks[10], (1, 3 * H), f32) * s,
        b_hh=jax.random.normal(ks[11], (1, 3 * H), f32) * s,
        out_w=(jax.random.normal(ks[12], (H, V), f32) * s).astype(bf16),
        out_b=jnp.zeros((1, V), f32),
    )


if __name__ == "__main__":
    B, S, H, V, T = 2, 8, 32, 32, 10
    SOS = 1

    key = jax.random.PRNGKey(0)
    k_enc, k_hid, k_par = jax.random.split(key, 3)
    encoder_outputs = jax.random.normal(k_enc, (B, S, H), jnp.float32)
    encoder_hidden = jax.random.normal(k_hid, (1, B, H), jnp.float32)
    params = init_params(k_par, H, V)

    logp, final_hidden, attn = attentive_decoder_forward(
        encoder_outputs, encoder_hidden, SOS, params, max_length=T)

    jax.block_until_ready((logp, final_hidden, attn))
    assert logp.shape == (B, T, V)
    assert final_hidden.shape == (1, B, H)
    assert attn.shape == (B, T, S)
    print("KERNEL_OK")
</pallas_src>

<mosaic_0001>
module attributes {stable_mosaic.version = 11 : i64} {
  func.func @decoder_kernel(%arg0: memref<1xi32, #tpu.memory_space<smem>>, %arg1: memref<2x8x32xbf16, #tpu.memory_space<vmem>>, %arg2: memref<2x32xf32, #tpu.memory_space<vmem>>, %arg3: memref<32x32xbf16, #tpu.memory_space<vmem>>, %arg4: memref<32x32xbf16, #tpu.memory_space<vmem>>, %arg5: memref<1x32xf32, #tpu.memory_space<vmem>>, %arg6: memref<32x32xbf16, #tpu.memory_space<vmem>>, %arg7: memref<1x32xf32, #tpu.memory_space<vmem>>, %arg8: memref<1x32xf32, #tpu.memory_space<vmem>>, %arg9: memref<1x1xf32, #tpu.memory_space<vmem>>, %arg10: memref<32x96xbf16, #tpu.memory_space<vmem>>, %arg11: memref<32x96xbf16, #tpu.memory_space<vmem>>, %arg12: memref<32x96xbf16, #tpu.memory_space<vmem>>, %arg13: memref<1x96xf32, #tpu.memory_space<vmem>>, %arg14: memref<1x96xf32, #tpu.memory_space<vmem>>, %arg15: memref<32x32xbf16, #tpu.memory_space<vmem>>, %arg16: memref<1x32xf32, #tpu.memory_space<vmem>>, %arg17: memref<10x2x32xf32, #tpu.memory_space<vmem>>, %arg18: memref<10x2x8xf32, #tpu.memory_space<vmem>>, %arg19: memref<2x32xf32, #tpu.memory_space<vmem>>) attributes {dimension_semantics = [], scalar_prefetch = 0 : i64, scratch_operands = 0 : i64, tpu.core_type = #tpu.core_type<tc>} {
    %0 = tpu.iota {dimensions = array<i32: 1>} : vector<2x32xi32>
    %c0 = arith.constant 0 : index
    %c0_0 = arith.constant 0 : index
    %c0_1 = arith.constant 0 : index
    %1 = vector.load %arg1[%c0, %c0_0, %c0_1] : memref<2x8x32xbf16, #tpu.memory_space<vmem>>, vector<2x8x32xbf16>
    %c0_2 = arith.constant 0 : index
    %c0_3 = arith.constant 0 : index
    %2 = vector.load %arg6[%c0_2, %c0_3] : memref<32x32xbf16, #tpu.memory_space<vmem>>, vector<32x32xbf16>
    "tpu.trace_start"() <{level = 10 : i32, message = "bsh,ho->bso"}> : () -> ()
    %cst = arith.constant dense<0.000000e+00> : vector<2x8x32xf32>
    %3 = tpu.matmul %1, %2, %cst {dimension_numbers = #tpu.dot_dimension_numbers<[2], [0], [0, 1], [1], [0, 0, 0, 1, 1, 1], [], []>} : vector<2x8x32xbf16>, vector<32x32xbf16>, vector<2x8x32xf32> -> vector<2x8x32xf32>
    "tpu.trace_stop"() : () -> ()
    %c0_4 = arith.constant 0 : index
    %c0_5 = arith.constant 0 : index
    %4 = vector.load %arg7[%c0_4, %c0_5] : memref<1x32xf32, #tpu.memory_space<vmem>>, vector<1x32xf32>
    %5 = vector.shape_cast %4 : vector<1x32xf32> to vector<1x1x32xf32>
    %6 = vector.broadcast %5 : vector<1x1x32xf32> to vector<2x8x32xf32>
    %7 = arith.addf %3, %6 : vector<2x8x32xf32>
    %8 = arith.truncf %7 : vector<2x8x32xf32> to vector<2x8x32xbf16>
    %c0_6 = arith.constant 0 : index
    %c0_7 = arith.constant 0 : index
    %9 = vector.load %arg3[%c0_6, %c0_7] : memref<32x32xbf16, #tpu.memory_space<vmem>>, vector<32x32xbf16>
    %c0_8 = arith.constant 0 : index
    %c0_9 = arith.constant 0 : index
    %10 = vector.load %arg4[%c0_8, %c0_9] : memref<32x32xbf16, #tpu.memory_space<vmem>>, vector<32x32xbf16>
    %c0_10 = arith.constant 0 : index
    %c0_11 = arith.constant 0 : index
    %11 = vector.load %arg5[%c0_10, %c0_11] : memref<1x32xf32, #tpu.memory_space<vmem>>, vector<1x32xf32>
    %c0_12 = arith.constant 0 : index
    %c0_13 = arith.constant 0 : index
    %12 = vector.load %arg8[%c0_12, %c0_13] : memref<1x32xf32, #tpu.memory_space<vmem>>, vector<1x32xf32>
    %c0_14 = arith.constant 0 : index
    %c0_15 = arith.constant 0 : index
    %13 = vector.load %arg9[%c0_14, %c0_15] : memref<1x1xf32, #tpu.memory_space<vmem>>, vector<1x1xf32>
    %c0_16 = arith.constant 0 : index
    %c0_17 = arith.constant 0 : index
    %14 = vector.load %arg10[%c0_16, %c0_17] : memref<32x96xbf16, #tpu.memory_space<vmem>>, vector<32x96xbf16>
    %c0_18 = arith.constant 0 : index
    %c0_19 = arith.constant 0 : index
    %15 = vector.load %arg11[%c0_18, %c0_19] : memref<32x96xbf16, #tpu.memory_space<vmem>>, vector<32x96xbf16>
    %c0_20 = arith.constant 0 : index
    %c0_21 = arith.constant 0 : index
    %16 = vector.load %arg12[%c0_20, %c0_21] : memref<32x96xbf16, #tpu.memory_space<vmem>>, vector<32x96xbf16>
    %c0_22 = arith.constant 0 : index
    %c0_23 = arith.constant 0 : index
    %17 = vector.load %arg13[%c0_22, %c0_23] : memref<1x96xf32, #tpu.memory_space<vmem>>, vector<1x96xf32>
    %c0_24 = arith.constant 0 : index
    %c0_25 = arith.constant 0 : index
    %18 = vector.load %arg14[%c0_24, %c0_25] : memref<1x96xf32, #tpu.memory_space<vmem>>, vector<1x96xf32>
    %c0_26 = arith.constant 0 : index
    %c0_27 = arith.constant 0 : index
    %19 = vector.load %arg15[%c0_26, %c0_27] : memref<32x32xbf16, #tpu.memory_space<vmem>>, vector<32x32xbf16>
    %c0_28 = arith.constant 0 : index
    %c0_29 = arith.constant 0 : index
    %20 = vector.load %arg16[%c0_28, %c0_29] : memref<1x32xf32, #tpu.memory_space<vmem>>, vector<1x32xf32>
    %c0_30 = arith.constant 0 : index
    %c0_31 = arith.constant 0 : index
    %21 = vector.load %arg2[%c0_30, %c0_31] : memref<2x32xf32, #tpu.memory_space<vmem>>, vector<2x32xf32>
    %c0_32 = arith.constant 0 : index
    %22 = memref.load %arg0[%c0_32] : memref<1xi32, #tpu.memory_space<smem>>
    %23 = vector.broadcast %22 : i32 to vector<2x32xi32>
    %24 = arith.cmpi eq, %0, %23 : vector<2x32xi32>
    %25 = arith.extui %24 : vector<2x32xi1> to vector<2x32xi32>
    %26 = arith.sitofp %25 : vector<2x32xi32> to vector<2x32xf32>
    %27 = arith.truncf %26 : vector<2x32xf32> to vector<2x32xbf16>
    %28 = arith.truncf %21 : vector<2x32xf32> to vector<2x32xbf16>
    %cst_33 = arith.constant dense<0.000000e+00> : vector<2x32xf32>
    %29 = tpu.matmul %27, %9, %cst_33 {dimension_numbers = #tpu.dot_dimension_numbers<[1], [0], [0], [1], [0, 0, 1, 1], [], []>} : vector<2x32xbf16>, vector<32x32xbf16>, vector<2x32xf32> -> vector<2x32xf32>
    %cst_34 = arith.constant dense<0.000000e+00> : vector<2x32xf32>
    %30 = tpu.matmul %28, %10, %cst_34 {dimension_numbers = #tpu.dot_dimension_numbers<[1], [0], [0], [1], [0, 0, 1, 1], [], []>} : vector<2x32xbf16>, vector<32x32xbf16>, vector<2x32xf32> -> vector<2x32xf32>
    %31 = vector.broadcast %11 : vector<1x32xf32> to vector<2x32xf32>
    %32 = arith.addf %30, %31 : vector<2x32xf32>
    %33 = vector.shape_cast %32 : vector<2x32xf32> to vector<2x1x32xf32>
    %34 = arith.extf %8 : vector<2x8x32xbf16> to vector<2x8x32xf32>
    %35 = vector.broadcast %33 : vector<2x1x32xf32> to vector<2x8x32xf32>
    %36 = arith.addf %35, %34 : vector<2x8x32xf32>
    %37 = math.tanh %36 : vector<2x8x32xf32>
    %38 = vector.shape_cast %12 : vector<1x32xf32> to vector<1x1x32xf32>
    %39 = vector.broadcast %38 : vector<1x1x32xf32> to vector<2x8x32xf32>
    %40 = arith.mulf %37, %39 : vector<2x8x32xf32>
    %cst_35 = arith.constant dense<0.000000e+00> : vector<2x8xf32>
    %41 = vector.multi_reduction <add>, %40, %cst_35 [2] : vector<2x8x32xf32> to vector<2x8xf32>
    %42 = vector.broadcast %13 : vector<1x1xf32> to vector<2x8xf32>
    %43 = arith.addf %41, %42 : vector<2x8xf32>
    %cst_36 = arith.constant dense<0xFF800000> : vector<2xf32>
    %44 = vector.multi_reduction <maximumf>, %43, %cst_36 [1] : vector<2x8xf32> to vector<2xf32>
    %45 = vector.shape_cast %44 : vector<2xf32> to vector<2x1xf32>
    %46 = vector.broadcast %45 : vector<2x1xf32> to vector<2x8xf32>
    %47 = arith.subf %43, %46 : vector<2x8xf32>
    %48 = math.exp %47 : vector<2x8xf32>
    %cst_37 = arith.constant dense<0.000000e+00> : vector<2xf32>
    %49 = vector.multi_reduction <add>, %48, %cst_37 [1] : vector<2x8xf32> to vector<2xf32>
    %50 = vector.shape_cast %49 : vector<2xf32> to vector<2x1xf32>
    %51 = tpu.reciprocal %50 {approx = true} : vector<2x1xf32> -> vector<2x1xf32>
    %52 = vector.broadcast %51 : vector<2x1xf32> to vector<2x8xf32>
    %53 = arith.mulf %48, %52 : vector<2x8xf32>
    %54 = vector.shape_cast %53 : vector<2x8xf32> to vector<2x8x1xf32>
    %55 = arith.extf %1 : vector<2x8x32xbf16> to vector<2x8x32xf32>
    %56 = vector.broadcast %54 : vector<2x8x1xf32> to vector<2x8x32xf32>
    %57 = arith.mulf %56, %55 : vector<2x8x32xf32>
    %cst_38 = arith.constant dense<0.000000e+00> : vector<2x32xf32>
    %58 = vector.multi_reduction <add>, %57, %cst_38 [1] : vector<2x8x32xf32> to vector<2x32xf32>
    %59 = arith.truncf %29 : vector<2x32xf32> to vector<2x32xbf16>
    %60 = arith.truncf %58 : vector<2x32xf32> to vector<2x32xbf16>
    %cst_39 = arith.constant dense<0.000000e+00> : vector<2x96xf32>
    %61 = tpu.matmul %59, %14, %cst_39 {dimension_numbers = #tpu.dot_dimension_numbers<[1], [0], [0], [1], [0, 0, 1, 1], [], []>} : vector<2x32xbf16>, vector<32x96xbf16>, vector<2x96xf32> -> vector<2x96xf32>
    %cst_40 = arith.constant dense<0.000000e+00> : vector<2x96xf32>
    %62 = tpu.matmul %60, %15, %cst_40 {dimension_numbers = #tpu.dot_dimension_numbers<[1], [0], [0], [1], [0, 0, 1, 1], [], []>} : vector<2x32xbf16>, vector<32x96xbf16>, vector<2x96xf32> -> vector<2x96xf32>
    %63 = arith.addf %61, %62 : vector<2x96xf32>
    %64 = vector.broadcast %17 : vector<1x96xf32> to vector<2x96xf32>
    %65 = arith.addf %63, %64 : vector<2x96xf32>
    %cst_41 = arith.constant dense<0.000000e+00> : vector<2x96xf32>
    %66 = tpu.matmul %28, %16, %cst_41 {dimension_numbers = #tpu.dot_dimension_numbers<[1], [0], [0], [1], [0, 0, 1, 1], [], []>} : vector<2x32xbf16>, vector<32x96xbf16>, vector<2x96xf32> -> vector<2x96xf32>
    %67 = vector.broadcast %18 : vector<1x96xf32> to vector<2x96xf32>
    %68 = arith.addf %66, %67 : vector<2x96xf32>
    %69 = arith.addf %65, %68 : vector<2x96xf32>
    %70 = vector.extract_strided_slice %69 {offsets = [0, 0], sizes = [2, 32], strides = [1, 1]} : vector<2x96xf32> to vector<2x32xf32>
    %71 = arith.negf %70 : vector<2x32xf32>
    %72 = math.exp %71 : vector<2x32xf32>
    %cst_42 = arith.constant 1.000000e+00 : f32
    %73 = vector.broadcast %cst_42 : f32 to vector<2x32xf32>
    %74 = arith.addf %73, %72 : vector<2x32xf32>
    %75 = arith.divf %73, %74 : vector<2x32xf32>
    %76 = vector.extract_strided_slice %69 {offsets = [0, 32], sizes = [2, 32], strides = [1, 1]} : vector<2x96xf32> to vector<2x32xf32>
    %77 = arith.negf %76 : vector<2x32xf32>
    %78 = math.exp %77 : vector<2x32xf32>
    %cst_43 = arith.constant 1.000000e+00 : f32
    %79 = vector.broadcast %cst_43 : f32 to vector<2x32xf32>
    %80 = arith.addf %79, %78 : vector<2x32xf32>
    %81 = arith.divf %79, %80 : vector<2x32xf32>
    %82 = vector.extract_strided_slice %65 {offsets = [0, 64], sizes = [2, 32], strides = [1, 1]} : vector<2x96xf32> to vector<2x32xf32>
    %83 = vector.extract_strided_slice %68 {offsets = [0, 64], sizes = [2, 32], strides = [1, 1]} : vector<2x96xf32> to vector<2x32xf32>
    %84 = arith.mulf %75, %83 : vector<2x32xf32>
    %85 = arith.addf %82, %84 : vector<2x32xf32>
    %86 = math.tanh %85 : vector<2x32xf32>
    %cst_44 = arith.constant 1.000000e+00 : f32
    %87 = vector.broadcast %cst_44 : f32 to vector<2x32xf32>
    %88 = arith.subf %87, %81 : vector<2x32xf32>
    %89 = arith.mulf %88, %86 : vector<2x32xf32>
    %90 = arith.mulf %81, %21 : vector<2x32xf32>
    %91 = arith.addf %89, %90 : vector<2x32xf32>
    %92 = arith.truncf %91 : vector<2x32xf32> to vector<2x32xbf16>
    %cst_45 = arith.constant dense<0.000000e+00> : vector<2x32xf32>
    %93 = tpu.matmul %92, %19, %cst_45 {dimension_numbers = #tpu.dot_dimension_numbers<[1], [0], [0], [1], [0, 0, 1, 1], [], []>} : vector<2x32xbf16>, vector<32x32xbf16>, vector<2x32xf32> -> vector<2x32xf32>
    %94 = vector.broadcast %20 : vector<1x32xf32> to vector<2x32xf32>
    %95 = arith.addf %93, %94 : vector<2x32xf32>
    %cst_46 = arith.constant dense<0xFF800000> : vector<2xf32>
    %96 = vector.multi_reduction <maximumf>, %95, %cst_46 [1] : vector<2x32xf32> to vector<2xf32>
    %97 = vector.shape_cast %96 : vector<2xf32> to vector<2x1xf32>
    %98 = vector.broadcast %97 : vector<2x1xf32> to vector<2x32xf32>
    %99 = arith.subf %95, %98 : vector<2x32xf32>
    %100 = math.exp %99 : vector<2x32xf32>
    %cst_47 = arith.constant dense<0.000000e+00> : vector<2xf32>
    %101 = vector.multi_reduction <add>, %100, %cst_47 [1] : vector<2x32xf32> to vector<2xf32>
    %102 = vector.shape_cast %101 : vector<2xf32> to vector<2x1xf32>
    %103 = math.log %102 : vector<2x1xf32>
    %104 = arith.addf %103, %97 : vector<2x1xf32>
    %105 = vector.broadcast %104 : vector<2x1xf32> to vector<2x32xf32>
    %106 = arith.subf %95, %105 : vector<2x32xf32>
    %c0_48 = arith.constant 0 : index
    %c0_49 = arith.constant 0 : index
    %c0_50 = arith.constant 0 : index
    %107 = vector.load %arg17[%c0_48, %c0_49, %c0_50] : memref<10x2x32xf32, #tpu.memory_space<vmem>>, vector<1x2x32xf32>
    %108 = vector.shape_cast %107 : vector<1x2x32xf32> to vector<2x32xf32>
    %109 = vector.shape_cast %106 : vector<2x32xf32> to vector<1x2x32xf32>
    tpu.vector_store %arg17[%c0_48, %c0_49, %c0_50], %109 {strides = array<i32>} : memref<10x2x32xf32, #tpu.memory_space<vmem>>, vector<1x2x32xf32>,
    %c0_51 = arith.constant 0 : index
    %c0_52 = arith.constant 0 : index
    %c0_53 = arith.constant 0 : index
    %110 = vector.load %arg18[%c0_51, %c0_52, %c0_53] : memref<10x2x8xf32, #tpu.memory_space<vmem>>, vector<1x2x8xf32>
    %111 = vector.shape_cast %110 : vector<1x2x8xf32> to vector<2x8xf32>
    %112 = vector.shape_cast %53 : vector<2x8xf32> to vector<1x2x8xf32>
    tpu.vector_store %arg18[%c0_51, %c0_52, %c0_53], %112 {strides = array<i32>} : memref<10x2x8xf32, #tpu.memory_space<vmem>>, vector<1x2x8xf32>,
    %113 = vector.broadcast %97 : vector<2x1xf32> to vector<2x32xf32>
    %114 = arith.cmpf oeq, %95, %113 : vector<2x32xf32>
    %c32_i32 = arith.constant 32 : i32
    %115 = vector.broadcast %c32_i32 : i32 to vector<2x32xi32>
    %116 = arith.select %114, %0, %115 : vector<2x32xi1>, vector<2x32xi32>
    %cst_54 = arith.constant dense<2147483647> : vector<2xi32>
    %117 = vector.multi_reduction <minsi>, %116, %cst_54 [1] : vector<2x32xi32> to vector<2xi32>
    %118 = vector.shape_cast %117 : vector<2xi32> to vector<2x1xi32>
    %119 = vector.broadcast %118 : vector<2x1xi32> to vector<2x32xi32>
    %120 = arith.cmpi eq, %0, %119 : vector<2x32xi32>
    %121 = arith.extui %120 : vector<2x32xi1> to vector<2x32xi32>
    %122 = arith.sitofp %121 : vector<2x32xi32> to vector<2x32xf32>
    %123 = arith.truncf %122 : vector<2x32xf32> to vector<2x32xbf16>
    %124 = arith.truncf %91 : vector<2x32xf32> to vector<2x32xbf16>
    %cst_55 = arith.constant dense<0.000000e+00> : vector<2x32xf32>
    %125 = tpu.matmul %123, %9, %cst_55 {dimension_numbers = #tpu.dot_dimension_numbers<[1], [0], [0], [1], [0, 0, 1, 1], [], []>} : vector<2x32xbf16>, vector<32x32xbf16>, vector<2x32xf32> -> vector<2x32xf32>
    %cst_56 = arith.constant dense<0.000000e+00> : vector<2x32xf32>
    %126 = tpu.matmul %124, %10, %cst_56 {dimension_numbers = #tpu.dot_dimension_numbers<[1], [0], [0], [1], [0, 0, 1, 1], [], []>} : vector<2x32xbf16>, vector<32x32xbf16>, vector<2x32xf32> -> vector<2x32xf32>
    %127 = vector.broadcast %11 : vector<1x32xf32> to vector<2x32xf32>
    %128 = arith.addf %126, %127 : vector<2x32xf32>
    %129 = vector.shape_cast %128 : vector<2x32xf32> to vector<2x1x32xf32>
    %130 = arith.extf %8 : vector<2x8x32xbf16> to vector<2x8x32xf32>
    %131 = vector.broadcast %129 : vector<2x1x32xf32> to vector<2x8x32xf32>
    %132 = arith.addf %131, %130 : vector<2x8x32xf32>
    %133 = math.tanh %132 : vector<2x8x32xf32>
    %134 = vector.shape_cast %12 : vector<1x32xf32> to vector<1x1x32xf32>
    %135 = vector.broadcast %134 : vector<1x1x32xf32> to vector<2x8x32xf32>
    %136 = arith.mulf %133, %135 : vector<2x8x32xf32>
    %cst_57 = arith.constant dense<0.000000e+00> : vector<2x8xf32>
    %137 = vector.multi_reduction <add>, %136, %cst_57 [2] : vector<2x8x32xf32> to vector<2x8xf32>
    %138 = vector.broadcast %13 : vector<1x1xf32> to vector<2x8xf32>
    %139 = arith.addf %137, %138 : vector<2x8xf32>
    %cst_58 = arith.constant dense<0xFF800000> : vector<2xf32>
    %140 = vector.multi_reduction <maximumf>, %139, %cst_58 [1] : vector<2x8xf32> to vector<2xf32>
    %141 = vector.shape_cast %140 : vector<2xf32> to vector<2x1xf32>
    %142 = vector.broadcast %141 : vector<2x1xf32> to vector<2x8xf32>
    %143 = arith.subf %139, %142 : vector<2x8xf32>
    %144 = math.exp %143 : vector<2x8xf32>
    %cst_59 = arith.constant dense<0.000000e+00> : vector<2xf32>
    %145 = vector.multi_reduction <add>, %144, %cst_59 [1] : vector<2x8xf32> to vector<2xf32>
    %146 = vector.shape_cast %145 : vector<2xf32> to vector<2x1xf32>
    %147 = tpu.reciprocal %146 {approx = true} : vector<2x1xf32> -> vector<2x1xf32>
    %148 = vector.broadcast %147 : vector<2x1xf32> to vector<2x8xf32>
    %149 = arith.mulf %144, %148 : vector<2x8xf32>
    %150 = vector.shape_cast %149 : vector<2x8xf32> to vector<2x8x1xf32>
    %151 = arith.extf %1 : vector<2x8x32xbf16> to vector<2x8x32xf32>
    %152 = vector.broadcast %150 : vector<2x8x1xf32> to vector<2x8x32xf32>
    %153 = arith.mulf %152, %151 : vector<2x8x32xf32>
    %cst_60 = arith.constant dense<0.000000e+00> : vector<2x32xf32>
    %154 = vector.multi_reduction <add>, %153, %cst_60 [1] : vector<2x8x32xf32> to vector<2x32xf32>
    %155 = arith.truncf %125 : vector<2x32xf32> to vector<2x32xbf16>
    %156 = arith.truncf %154 : vector<2x32xf32> to vector<2x32xbf16>
    %cst_61 = arith.constant dense<0.000000e+00> : vector<2x96xf32>
    %157 = tpu.matmul %155, %14, %cst_61 {dimension_numbers = #tpu.dot_dimension_numbers<[1], [0], [0], [1], [0, 0, 1, 1], [], []>} : vector<2x32xbf16>, vector<32x96xbf16>, vector<2x96xf32> -> vector<2x96xf32>
    %cst_62 = arith.constant dense<0.000000e+00> : vector<2x96xf32>
    %158 = tpu.matmul %156, %15, %cst_62 {dimension_numbers = #tpu.dot_dimension_numbers<[1], [0], [0], [1], [0, 0, 1, 1], [], []>} : vector<2x32xbf16>, vector<32x96xbf16>, vector<2x96xf32> -> vector<2x96xf32>
    %159 = arith.addf %157, %158 : vector<2x96xf32>
    %160 = vector.broadcast %17 : vector<1x96xf32> to vector<2x96xf32>
    %161 = arith.addf %159, %160 : vector<2x96xf32>
    %cst_63 = arith.constant dense<0.000000e+00> : vector<2x96xf32>
    %162 = tpu.matmul %124, %16, %cst_63 {dimension_numbers = #tpu.dot_dimension_numbers<[1], [0], [0], [1], [0, 0, 1, 1], [], []>} : vector<2x32xbf16>, vector<32x96xbf16>, vector<2x96xf32> -> vector<2x96xf32>
    %163 = vector.broadcast %18 : vector<1x96xf32> to vector<2x96xf32>
    %164 = arith.addf %162, %163 : vector<2x96xf32>
    %165 = arith.addf %161, %164 : vector<2x96xf32>
    %166 = vector.extract_strided_slice %165 {offsets = [0, 0], sizes = [2, 32], strides = [1, 1]} : vector<2x96xf32> to vector<2x32xf32>
    %167 = arith.negf %166 : vector<2x32xf32>
    %168 = math.exp %167 : vector<2x32xf32>
    %cst_64 = arith.constant 1.000000e+00 : f32
    %169 = vector.broadcast %cst_64 : f32 to vector<2x32xf32>
    %170 = arith.addf %169, %168 : vector<2x32xf32>
    %171 = arith.divf %169, %170 : vector<2x32xf32>
    %172 = vector.extract_strided_slice %165 {offsets = [0, 32], sizes = [2, 32], strides = [1, 1]} : vector<2x96xf32> to vector<2x32xf32>
    %173 = arith.negf %172 : vector<2x32xf32>
    %174 = math.exp %173 : vector<2x32xf32>
    %cst_65 = arith.constant 1.000000e+00 : f32
    %175 = vector.broadcast %cst_65 : f32 to vector<2x32xf32>
    %176 = arith.addf %175, %174 : vector<2x32xf32>
    %177 = arith.divf %175, %176 : vector<2x32xf32>
    %178 = vector.extract_strided_slice %161 {offsets = [0, 64], sizes = [2, 32], strides = [1, 1]} : vector<2x96xf32> to vector<2x32xf32>
    %179 = vector.extract_strided_slice %164 {offsets = [0, 64], sizes = [2, 32], strides = [1, 1]} : vector<2x96xf32> to vector<2x32xf32>
    %180 = arith.mulf %171, %179 : vector<2x32xf32>
    %181 = arith.addf %178, %180 : vector<2x32xf32>
    %182 = math.tanh %181 : vector<2x32xf32>
    %cst_66 = arith.constant 1.000000e+00 : f32
    %183 = vector.broadcast %cst_66 : f32 to vector<2x32xf32>
    %184 = arith.subf %183, %177 : vector<2x32xf32>
    %185 = arith.mulf %184, %182 : vector<2x32xf32>
    %186 = arith.mulf %177, %91 : vector<2x32xf32>
    %187 = arith.addf %185, %186 : vector<2x32xf32>
    %188 = arith.truncf %187 : vector<2x32xf32> to vector<2x32xbf16>
    %cst_67 = arith.constant dense<0.000000e+00> : vector<2x32xf32>
    %189 = tpu.matmul %188, %19, %cst_67 {dimension_numbers = #tpu.dot_dimension_numbers<[1], [0], [0], [1], [0, 0, 1, 1], [], []>} : vector<2x32xbf16>, vector<32x32xbf16>, vector<2x32xf32> -> vector<2x32xf32>
    %190 = vector.broadcast %20 : vector<1x32xf32> to vector<2x32xf32>
    %191 = arith.addf %189, %190 : vector<2x32xf32>
    %cst_68 = arith.constant dense<0xFF800000> : vector<2xf32>
    %192 = vector.multi_reduction <maximumf>, %191, %cst_68 [1] : vector<2x32xf32> to vector<2xf32>
    %193 = vector.shape_cast %192 : vector<2xf32> to vector<2x1xf32>
    %194 = vector.broadcast %193 : vector<2x1xf32> to vector<2x32xf32>
    %195 = arith.subf %191, %194 : vector<2x32xf32>
    %196 = math.exp %195 : vector<2x32xf32>
    %cst_69 = arith.constant dense<0.000000e+00> : vector<2xf32>
    %197 = vector.multi_reduction <add>, %196, %cst_69 [1] : vector<2x32xf32> to vector<2xf32>
    %198 = vector.shape_cast %197 : vector<2xf32> to vector<2x1xf32>
    %199 = math.log %198 : vector<2x1xf32>
    %200 = arith.addf %199, %193 : vector<2x1xf32>
    %201 = vector.broadcast %200 : vector<2x1xf32> to vector<2x32xf32>
    %202 = arith.subf %191, %201 : vector<2x32xf32>
    %c1 = arith.constant 1 : index
    %c0_70 = arith.constant 0 : index
    %c0_71 = arith.constant 0 : index
    %203 = vector.load %arg17[%c1, %c0_70, %c0_71] : memref<10x2x32xf32, #tpu.memory_space<vmem>>, vector<1x2x32xf32>
    %204 = vector.shape_cast %203 : vector<1x2x32xf32> to vector<2x32xf32>
    %205 = vector.shape_cast %202 : vector<2x32xf32> to vector<1x2x32xf32>
    tpu.vector_store %arg17[%c1, %c0_70, %c0_71], %205 {strides = array<i32>} : memref<10x2x32xf32, #tpu.memory_space<vmem>>, vector<1x2x32xf32>,
    %c1_72 = arith.constant 1 : index
    %c0_73 = arith.constant 0 : index
    %c0_74 = arith.constant 0 : index
    %206 = vector.load %arg18[%c1_72, %c0_73, %c0_74] : memref<10x2x8xf32, #tpu.memory_space<vmem>>, vector<1x2x8xf32>
    %207 = vector.shape_cast %206 : vector<1x2x8xf32> to vector<2x8xf32>
    %208 = vector.shape_cast %149 : vector<2x8xf32> to vector<1x2x8xf32>
    tpu.vector_store %arg18[%c1_72, %c0_73, %c0_74], %208 {strides = array<i32>} : memref<10x2x8xf32, #tpu.memory_space<vmem>>, vector<1x2x8xf32>,
    %209 = vector.broadcast %193 : vector<2x1xf32> to vector<2x32xf32>
    %210 = arith.cmpf oeq, %191, %209 : vector<2x32xf32>
    %c32_i32_75 = arith.constant 32 : i32
    %211 = vector.broadcast %c32_i32_75 : i32 to vector<2x32xi32>
    %212 = arith.select %210, %0, %211 : vector<2x32xi1>, vector<2x32xi32>
    %cst_76 = arith.constant dense<2147483647> : vector<2xi32>
    %213 = vector.multi_reduction <minsi>, %212, %cst_76 [1] : vector<2x32xi32> to vector<2xi32>
    %214 = vector.shape_cast %213 : vector<2xi32> to vector<2x1xi32>
    %215 = vector.broadcast %214 : vector<2x1xi32> to vector<2x32xi32>
    %216 = arith.cmpi eq, %0, %215 : vector<2x32xi32>
    %217 = arith.extui %216 : vector<2x32xi1> to vector<2x32xi32>
    %218 = arith.sitofp %217 : vector<2x32xi32> to vector<2x32xf32>
    %219 = arith.truncf %218 : vector<2x32xf32> to vector<2x32xbf16>
    %220 = arith.truncf %187 : vector<2x32xf32> to vector<2x32xbf16>
    %cst_77 = arith.constant dense<0.000000e+00> : vector<2x32xf32>
    %221 = tpu.matmul %219, %9, %cst_77 {dimension_numbers = #tpu.dot_dimension_numbers<[1], [0], [0], [1], [0, 0, 1, 1], [], []>} : vector<2x32xbf16>, vector<32x32xbf16>, vector<2x32xf32> -> vector<2x32xf32>
    %cst_78 = arith.constant dense<0.000000e+00> : vector<2x32xf32>
    %222 = tpu.matmul %220, %10, %cst_78 {dimension_numbers = #tpu.dot_dimension_numbers<[1], [0], [0], [1], [0, 0, 1, 1], [], []>} : vector<2x32xbf16>, vector<32x32xbf16>, vector<2x32xf32> -> vector<2x32xf32>
    %223 = vector.broadcast %11 : vector<1x32xf32> to vector<2x32xf32>
    %224 = arith.addf %222, %223 : vector<2x32xf32>
    %225 = vector.shape_cast %224 : vector<2x32xf32> to vector<2x1x32xf32>
    %226 = arith.extf %8 : vector<2x8x32xbf16> to vector<2x8x32xf32>
    %227 = vector.broadcast %225 : vector<2x1x32xf32> to vector<2x8x32xf32>
    %228 = arith.addf %227, %226 : vector<2x8x32xf32>
    %229 = math.tanh %228 : vector<2x8x32xf32>
    %230 = vector.shape_cast %12 : vector<1x32xf32> to vector<1x1x32xf32>
    %231 = vector.broadcast %230 : vector<1x1x32xf32> to vector<2x8x32xf32>
    %232 = arith.mulf %229, %231 : vector<2x8x32xf32>
    %cst_79 = arith.constant dense<0.000000e+00> : vector<2x8xf32>
    %233 = vector.multi_reduction <add>, %232, %cst_79 [2] : vector<2x8x32xf32> to vector<2x8xf32>
    %234 = vector.broadcast %13 : vector<1x1xf32> to vector<2x8xf32>
    %235 = arith.addf %233, %234 : vector<2x8xf32>
    %cst_80 = arith.constant dense<0xFF800000> : vector<2xf32>
    %236 = vector.multi_reduction <maximumf>, %235, %cst_80 [1] : vector<2x8xf32> to vector<2xf32>
    %237 = vector.shape_cast %236 : vector<2xf32> to vector<2x1xf32>
    %238 = vector.broadcast %237 : vector<2x1xf32> to vector<2x8xf32>
    %239 = arith.subf %235, %238 : vector<2x8xf32>
    %240 = math.exp %239 : vector<2x8xf32>
    %cst_81 = arith.constant dense<0.000000e+00> : vector<2xf32>
    %241 = vector.multi_reduction <add>, %240, %cst_81 [1] : vector<2x8xf32> to vector<2xf32>
    %242 = vector.shape_cast %241 : vector<2xf32> to vector<2x1xf32>
    %243 = tpu.reciprocal %242 {approx = true} : vector<2x1xf32> -> vector<2x1xf32>
    %244 = vector.broadcast %243 : vector<2x1xf32> to vector<2x8xf32>
    %245 = arith.mulf %240, %244 : vector<2x8xf32>
    %246 = vector.shape_cast %245 : vector<2x8xf32> to vector<2x8x1xf32>
    %247 = arith.extf %1 : vector<2x8x32xbf16> to vector<2x8x32xf32>
    %248 = vector.broadcast %246 : vector<2x8x1xf32> to vector<2x8x32xf32>
    %249 = arith.mulf %248, %247 : vector<2x8x32xf32>
    %cst_82 = arith.constant dense<0.000000e+00> : vector<2x32xf32>
    %250 = vector.multi_reduction <add>, %249, %cst_82 [1] : vector<2x8x32xf32> to vector<2x32xf32>
    %251 = arith.truncf %221 : vector<2x32xf32> to vector<2x32xbf16>
    %252 = arith.truncf %250 : vector<2x32xf32> to vector<2x32xbf16>
    %cst_83 = arith.constant dense<0.000000e+00> : vector<2x96xf32>
    %253 = tpu.matmul %251, %14, %cst_83 {dimension_numbers = #tpu.dot_dimension_numbers<[1], [0], [0], [1], [0, 0, 1, 1], [], []>} : vector<2x32xbf16>, vector<32x96xbf16>, vector<2x96xf32> -> vector<2x96xf32>
    %cst_84 = arith.constant dense<0.000000e+00> : vector<2x96xf32>
    %254 = tpu.matmul %252, %15, %cst_84 {dimension_numbers = #tpu.dot_dimension_numbers<[1], [0], [0], [1], [0, 0, 1, 1], [], []>} : vector<2x32xbf16>, vector<32x96xbf16>, vector<2x96xf32> -> vector<2x96xf32>
    %255 = arith.addf %253, %254 : vector<2x96xf32>
    %256 = vector.broadcast %17 : vector<1x96xf32> to vector<2x96xf32>
    %257 = arith.addf %255, %256 : vector<2x96xf32>
    %cst_85 = arith.constant dense<0.000000e+00> : vector<2x96xf32>
    %258 = tpu.matmul %220, %16, %cst_85 {dimension_numbers = #tpu.dot_dimension_numbers<[1], [0], [0], [1], [0, 0, 1, 1], [], []>} : vector<2x32xbf16>, vector<32x96xbf16>, vector<2x96xf32> -> vector<2x96xf32>
    %259 = vector.broadcast %18 : vector<1x96xf32> to vector<2x96xf32>
    %260 = arith.addf %258, %259 : vector<2x96xf32>
    %261 = arith.addf %257, %260 : vector<2x96xf32>
    %262 = vector.extract_strided_slice %261 {offsets = [0, 0], sizes = [2, 32], strides = [1, 1]} : vector<2x96xf32> to vector<2x32xf32>
    %263 = arith.negf %262 : vector<2x32xf32>
    %264 = math.exp %263 : vector<2x32xf32>
    %cst_86 = arith.constant 1.000000e+00 : f32
    %265 = vector.broadcast %cst_86 : f32 to vector<2x32xf32>
    %266 = arith.addf %265, %264 : vector<2x32xf32>
    %267 = arith.divf %265, %266 : vector<2x32xf32>
    %268 = vector.extract_strided_slice %261 {offsets = [0, 32], sizes = [2, 32], strides = [1, 1]} : vector<2x96xf32> to vector<2x32xf32>
    %269 = arith.negf %268 : vector<2x32xf32>
    %270 = math.exp %269 : vector<2x32xf32>
    %cst_87 = arith.constant 1.000000e+00 : f32
    %271 = vector.broadcast %cst_87 : f32 to vector<2x32xf32>
    %272 = arith.addf %271, %270 : vector<2x32xf32>
    %273 = arith.divf %271, %272 : vector<2x32xf32>
    %274 = vector.extract_strided_slice %257 {offsets = [0, 64], sizes = [2, 32], strides = [1, 1]} : vector<2x96xf32> to vector<2x32xf32>
    %275 = vector.extract_strided_slice %260 {offsets = [0, 64], sizes = [2, 32], strides = [1, 1]} : vector<2x96xf32> to vector<2x32xf32>
    %276 = arith.mulf %267, %275 : vector<2x32xf32>
    %277 = arith.addf %274, %276 : vector<2x32xf32>
    %278 = math.tanh %277 : vector<2x32xf32>
    %cst_88 = arith.constant 1.000000e+00 : f32
    %279 = vector.broadcast %cst_88 : f32 to vector<2x32xf32>
    %280 = arith.subf %279, %273 : vector<2x32xf32>
    %281 = arith.mulf %280, %278 : vector<2x32xf32>
    %282 = arith.mulf %273, %187 : vector<2x32xf32>
    %283 = arith.addf %281, %282 : vector<2x32xf32>
    %284 = arith.truncf %283 : vector<2x32xf32> to vector<2x32xbf16>
    %cst_89 = arith.constant dense<0.000000e+00> : vector<2x32xf32>
    %285 = tpu.matmul %284, %19, %cst_89 {dimension_numbers = #tpu.dot_dimension_numbers<[1], [0], [0], [1], [0, 0, 1, 1], [], []>} : vector<2x32xbf16>, vector<32x32xbf16>, vector<2x32xf32> -> vector<2x32xf32>
    %286 = vector.broadcast %20 : vector<1x32xf32> to vector<2x32xf32>
    %287 = arith.addf %285, %286 : vector<2x32xf32>
    %cst_90 = arith.constant dense<0xFF800000> : vector<2xf32>
    %288 = vector.multi_reduction <maximumf>, %287, %cst_90 [1] : vector<2x32xf32> to vector<2xf32>
    %289 = vector.shape_cast %288 : vector<2xf32> to vector<2x1xf32>
    %290 = vector.broadcast %289 : vector<2x1xf32> to vector<2x32xf32>
    %291 = arith.subf %287, %290 : vector<2x32xf32>
    %292 = math.exp %291 : vector<2x32xf32>
    %cst_91 = arith.constant dense<0.000000e+00> : vector<2xf32>
    %293 = vector.multi_reduction <add>, %292, %cst_91 [1] : vector<2x32xf32> to vector<2xf32>
    %294 = vector.shape_cast %293 : vector<2xf32> to vector<2x1xf32>
    %295 = math.log %294 : vector<2x1xf32>
    %296 = arith.addf %295, %289 : vector<2x1xf32>
    %297 = vector.broadcast %296 : vector<2x1xf32> to vector<2x32xf32>
    %298 = arith.subf %287, %297 : vector<2x32xf32>
    %c2 = arith.constant 2 : index
    %c0_92 = arith.constant 0 : index
    %c0_93 = arith.constant 0 : index
    %299 = vector.load %arg17[%c2, %c0_92, %c0_93] : memref<10x2x32xf32, #tpu.memory_space<vmem>>, vector<1x2x32xf32>
    %300 = vector.shape_cast %299 : vector<1x2x32xf32> to vector<2x32xf32>
    %301 = vector.shape_cast %298 : vector<2x32xf32> to vector<1x2x32xf32>
    tpu.vector_store %arg17[%c2, %c0_92, %c0_93], %301 {strides = array<i32>} : memref<10x2x32xf32, #tpu.memory_space<vmem>>, vector<1x2x32xf32>,
    %c2_94 = arith.constant 2 : index
    %c0_95 = arith.constant 0 : index
    %c0_96 = arith.constant 0 : index
    %302 = vector.load %arg18[%c2_94, %c0_95, %c0_96] : memref<10x2x8xf32, #tpu.memory_space<vmem>>, vector<1x2x8xf32>
    %303 = vector.shape_cast %302 : vector<1x2x8xf32> to vector<2x8xf32>
    %304 = vector.shape_cast %245 : vector<2x8xf32> to vector<1x2x8xf32>
    tpu.vector_store %arg18[%c2_94, %c0_95, %c0_96], %304 {strides = array<i32>} : memref<10x2x8xf32, #tpu.memory_space<vmem>>, vector<1x2x8xf32>,
    %305 = vector.broadcast %289 : vector<2x1xf32> to vector<2x32xf32>
    %306 = arith.cmpf oeq, %287, %305 : vector<2x32xf32>
    %c32_i32_97 = arith.constant 32 : i32
    %307 = vector.broadcast %c32_i32_97 : i32 to vector<2x32xi32>
    %308 = arith.select %306, %0, %307 : vector<2x32xi1>, vector<2x32xi32>
    %cst_98 = arith.constant dense<2147483647> : vector<2xi32>
    %309 = vector.multi_reduction <minsi>, %308, %cst_98 [1] : vector<2x32xi32> to vector<2xi32>
    %310 = vector.shape_cast %309 : vector<2xi32> to vector<2x1xi32>
    %311 = vector.broadcast %310 : vector<2x1xi32> to vector<2x32xi32>
    %312 = arith.cmpi eq, %0, %311 : vector<2x32xi32>
    %313 = arith.extui %312 : vector<2x32xi1> to vector<2x32xi32>
    %314 = arith.sitofp %313 : vector<2x32xi32> to vector<2x32xf32>
    %315 = arith.truncf %314 : vector<2x32xf32> to vector<2x32xbf16>
    %316 = arith.truncf %283 : vector<2x32xf32> to vector<2x32xbf16>
    %cst_99 = arith.constant dense<0.000000e+00> : vector<2x32xf32>
    %317 = tpu.matmul %315, %9, %cst_99 {dimension_numbers = #tpu.dot_dimension_numbers<[1], [0], [0], [1], [0, 0, 1, 1], [], []>} : vector<2x32xbf16>, vector<32x32xbf16>, vector<2x32xf32> -> vector<2x32xf32>
    %cst_100 = arith.constant dense<0.000000e+00> : vector<2x32xf32>
    %318 = tpu.matmul %316, %10, %cst_100 {dimension_numbers = #tpu.dot_dimension_numbers<[1], [0], [0], [1], [0, 0, 1, 1], [], []>} : vector<2x32xbf16>, vector<32x32xbf16>, vector<2x32xf32> -> vector<2x32xf32>
    %319 = vector.broadcast %11 : vector<1x32xf32> to vector<2x32xf32>
    %320 = arith.addf %318, %319 : vector<2x32xf32>
    %321 = vector.shape_cast %320 : vector<2x32xf32> to vector<2x1x32xf32>
    %322 = arith.extf %8 : vector<2x8x32xbf16> to vector<2x8x32xf32>
    %323 = vector.broadcast %321 : vector<2x1x32xf32> to vector<2x8x32xf32>
    %324 = arith.addf %323, %322 : vector<2x8x32xf32>
    %325 = math.tanh %324 : vector<2x8x32xf32>
    %326 = vector.shape_cast %12 : vector<1x32xf32> to vector<1x1x32xf32>
    %327 = vector.broadcast %326 : vector<1x1x32xf32> to vector<2x8x32xf32>
    %328 = arith.mulf %325, %327 : vector<2x8x32xf32>
    %cst_101 = arith.constant dense<0.000000e+00> : vector<2x8xf32>
    %329 = vector.multi_reduction <add>, %328, %cst_101 [2] : vector<2x8x32xf32> to vector<2x8xf32>
    %330 = vector.broadcast %13 : vector<1x1xf32> to vector<2x8xf32>
    %331 = arith.addf %329, %330 : vector<2x8xf32>
    %cst_102 = arith.constant dense<0xFF800000> : vector<2xf32>
    %332 = vector.multi_reduction <maximumf>, %331, %cst_102 [1] : vector<2x8xf32> to vector<2xf32>
    %333 = vector.shape_cast %332 : vector<2xf32> to vector<2x1xf32>
    %334 = vector.broadcast %333 : vector<2x1xf32> to vector<2x8xf32>
    %335 = arith.subf %331, %334 : vector<2x8xf32>
    %336 = math.exp %335 : vector<2x8xf32>
    %cst_103 = arith.constant dense<0.000000e+00> : vector<2xf32>
    %337 = vector.multi_reduction <add>, %336, %cst_103 [1] : vector<2x8xf32> to vector<2xf32>
    %338 = vector.shape_cast %337 : vector<2xf32> to vector<2x1xf32>
    %339 = tpu.reciprocal %338 {approx = true} : vector<2x1xf32> -> vector<2x1xf32>
    %340 = vector.broadcast %339 : vector<2x1xf32> to vector<2x8xf32>
    %341 = arith.mulf %336, %340 : vector<2x8xf32>
    %342 = vector.shape_cast %341 : vector<2x8xf32> to vector<2x8x1xf32>
    %343 = arith.extf %1 : vector<2x8x32xbf16> to vector<2x8x32xf32>
    %344 = vector.broadcast %342 : vector<2x8x1xf32> to vector<2x8x32xf32>
    %345 = arith.mulf %344, %343 : vector<2x8x32xf32>
    %cst_104 = arith.constant dense<0.000000e+00> : vector<2x32xf32>
    %346 = vector.multi_reduction <add>, %345, %cst_104 [1] : vector<2x8x32xf32> to vector<2x32xf32>
    %347 = arith.truncf %317 : vector<2x32xf32> to vector<2x32xbf16>
    %348 = arith.truncf %346 : vector<2x32xf32> to vector<2x32xbf16>
    %cst_105 = arith.constant dense<0.000000e+00> : vector<2x96xf32>
    %349 = tpu.matmul %347, %14, %cst_105 {dimension_numbers = #tpu.dot_dimension_numbers<[1], [0], [0], [1], [0, 0, 1, 1], [], []>} : vector<2x32xbf16>, vector<32x96xbf16>, vector<2x96xf32> -> vector<2x96xf32>
    %cst_106 = arith.constant dense<0.000000e+00> : vector<2x96xf32>
    %350 = tpu.matmul %348, %15, %cst_106 {dimension_numbers = #tpu.dot_dimension_numbers<[1], [0], [0], [1], [0, 0, 1, 1], [], []>} : vector<2x32xbf16>, vector<32x96xbf16>, vector<2x96xf32> -> vector<2x96xf32>
    %351 = arith.addf %349, %350 : vector<2x96xf32>
    %352 = vector.broadcast %17 : vector<1x96xf32> to vector<2x96xf32>
    %353 = arith.addf %351, %352 : vector<2x96xf32>
    %cst_107 = arith.constant dense<0.000000e+00> : vector<2x96xf32>
    %354 = tpu.matmul %316, %16, %cst_107 {dimension_numbers = #tpu.dot_dimension_numbers<[1], [0], [0], [1], [0, 0, 1, 1], [], []>} : vector<2x32xbf16>, vector<32x96xbf16>, vector<2x96xf32> -> vector<2x96xf32>
    %355 = vector.broadcast %18 : vector<1x96xf32> to vector<2x96xf32>
    %356 = arith.addf %354, %355 : vector<2x96xf32>
    %357 = arith.addf %353, %356 : vector<2x96xf32>
    %358 = vector.extract_strided_slice %357 {offsets = [0, 0], sizes = [2, 32], strides = [1, 1]} : vector<2x96xf32> to vector<2x32xf32>
    %359 = arith.negf %358 : vector<2x32xf32>
    %360 = math.exp %359 : vector<2x32xf32>
    %cst_108 = arith.constant 1.000000e+00 : f32
    %361 = vector.broadcast %cst_108 : f32 to vector<2x32xf32>
    %362 = arith.addf %361, %360 : vector<2x32xf32>
    %363 = arith.divf %361, %362 : vector<2x32xf32>
    %364 = vector.extract_strided_slice %357 {offsets = [0, 32], sizes = [2, 32], strides = [1, 1]} : vector<2x96xf32> to vector<2x32xf32>
    %365 = arith.negf %364 : vector<2x32xf32>
    %366 = math.exp %365 : vector<2x32xf32>
    %cst_109 = arith.constant 1.000000e+00 : f32
    %367 = vector.broadcast %cst_109 : f32 to vector<2x32xf32>
    %368 = arith.addf %367, %366 : vector<2x32xf32>
    %369 = arith.divf %367, %368 : vector<2x32xf32>
    %370 = vector.extract_strided_slice %353 {offsets = [0, 64], sizes = [2, 32], strides = [1, 1]} : vector<2x96xf32> to vector<2x32xf32>
    %371 = vector.extract_strided_slice %356 {offsets = [0, 64], sizes = [2, 32], strides = [1, 1]} : vector<2x96xf32> to vector<2x32xf32>
    %372 = arith.mulf %363, %371 : vector<2x32xf32>
    %373 = arith.addf %370, %372 : vector<2x32xf32>
    %374 = math.tanh %373 : vector<2x32xf32>
    %cst_110 = arith.constant 1.000000e+00 : f32
    %375 = vector.broadcast %cst_110 : f32 to vector<2x32xf32>
    %376 = arith.subf %375, %369 : vector<2x32xf32>
    %377 = arith.mulf %376, %374 : vector<2x32xf32>
    %378 = arith.mulf %369, %283 : vector<2x32xf32>
    %379 = arith.addf %377, %378 : vector<2x32xf32>
    %380 = arith.truncf %379 : vector<2x32xf32> to vector<2x32xbf16>
    %cst_111 = arith.constant dense<0.000000e+00> : vector<2x32xf32>
    %381 = tpu.matmul %380, %19, %cst_111 {dimension_numbers = #tpu.dot_dimension_numbers<[1], [0], [0], [1], [0, 0, 1, 1], [], []>} : vector<2x32xbf16>, vector<32x32xbf16>, vector<2x32xf32> -> vector<2x32xf32>
    %382 = vector.broadcast %20 : vector<1x32xf32> to vector<2x32xf32>
    %383 = arith.addf %381, %382 : vector<2x32xf32>
    %cst_112 = arith.constant dense<0xFF800000> : vector<2xf32>
    %384 = vector.multi_reduction <maximumf>, %383, %cst_112 [1] : vector<2x32xf32> to vector<2xf32>
    %385 = vector.shape_cast %384 : vector<2xf32> to vector<2x1xf32>
    %386 = vector.broadcast %385 : vector<2x1xf32> to vector<2x32xf32>
    %387 = arith.subf %383, %386 : vector<2x32xf32>
    %388 = math.exp %387 : vector<2x32xf32>
    %cst_113 = arith.constant dense<0.000000e+00> : vector<2xf32>
    %389 = vector.multi_reduction <add>, %388, %cst_113 [1] : vector<2x32xf32> to vector<2xf32>
    %390 = vector.shape_cast %389 : vector<2xf32> to vector<2x1xf32>
    %391 = math.log %390 : vector<2x1xf32>
    %392 = arith.addf %391, %385 : vector<2x1xf32>
    %393 = vector.broadcast %392 : vector<2x1xf32> to vector<2x32xf32>
    %394 = arith.subf %383, %393 : vector<2x32xf32>
    %c3 = arith.constant 3 : index
    %c0_114 = arith.constant 0 : index
    %c0_115 = arith.constant 0 : index
    %395 = vector.load %arg17[%c3, %c0_114, %c0_115] : memref<10x2x32xf32, #tpu.memory_space<vmem>>, vector<1x2x32xf32>
    %396 = vector.shape_cast %395 : vector<1x2x32xf32> to vector<2x32xf32>
    %397 = vector.shape_cast %394 : vector<2x32xf32> to vector<1x2x32xf32>
    tpu.vector_store %arg17[%c3, %c0_114, %c0_115], %397 {strides = array<i32>} : memref<10x2x32xf32, #tpu.memory_space<vmem>>, vector<1x2x32xf32>,
    %c3_116 = arith.constant 3 : index
    %c0_117 = arith.constant 0 : index
    %c0_118 = arith.constant 0 : index
    %398 = vector.load %arg18[%c3_116, %c0_117, %c0_118] : memref<10x2x8xf32, #tpu.memory_space<vmem>>, vector<1x2x8xf32>
    %399 = vector.shape_cast %398 : vector<1x2x8xf32> to vector<2x8xf32>
    %400 = vector.shape_cast %341 : vector<2x8xf32> to vector<1x2x8xf32>
    tpu.vector_store %arg18[%c3_116, %c0_117, %c0_118], %400 {strides = array<i32>} : memref<10x2x8xf32, #tpu.memory_space<vmem>>, vector<1x2x8xf32>,
    %401 = vector.broadcast %385 : vector<2x1xf32> to vector<2x32xf32>
    %402 = arith.cmpf oeq, %383, %401 : vector<2x32xf32>
    %c32_i32_119 = arith.constant 32 : i32
    %403 = vector.broadcast %c32_i32_119 : i32 to vector<2x32xi32>
    %404 = arith.select %402, %0, %403 : vector<2x32xi1>, vector<2x32xi32>
    %cst_120 = arith.constant dense<2147483647> : vector<2xi32>
    %405 = vector.multi_reduction <minsi>, %404, %cst_120 [1] : vector<2x32xi32> to vector<2xi32>
    %406 = vector.shape_cast %405 : vector<2xi32> to vector<2x1xi32>
    %407 = vector.broadcast %406 : vector<2x1xi32> to vector<2x32xi32>
    %408 = arith.cmpi eq, %0, %407 : vector<2x32xi32>
    %409 = arith.extui %408 : vector<2x32xi1> to vector<2x32xi32>
    %410 = arith.sitofp %409 : vector<2x32xi32> to vector<2x32xf32>
    %411 = arith.truncf %410 : vector<2x32xf32> to vector<2x32xbf16>
    %412 = arith.truncf %379 : vector<2x32xf32> to vector<2x32xbf16>
    %cst_121 = arith.constant dense<0.000000e+00> : vector<2x32xf32>
    %413 = tpu.matmul %411, %9, %cst_121 {dimension_numbers = #tpu.dot_dimension_numbers<[1], [0], [0], [1], [0, 0, 1, 1], [], []>} : vector<2x32xbf16>, vector<32x32xbf16>, vector<2x32xf32> -> vector<2x32xf32>
    %cst_122 = arith.constant dense<0.000000e+00> : vector<2x32xf32>
    %414 = tpu.matmul %412, %10, %cst_122 {dimension_numbers = #tpu.dot_dimension_numbers<[1], [0], [0], [1], [0, 0, 1, 1], [], []>} : vector<2x32xbf16>, vector<32x32xbf16>, vector<2x32xf32> -> vector<2x32xf32>
    %415 = vector.broadcast %11 : vector<1x32xf32> to vector<2x32xf32>
    %416 = arith.addf %414, %415 : vector<2x32xf32>
    %417 = vector.shape_cast %416 : vector<2x32xf32> to vector<2x1x32xf32>
    %418 = arith.extf %8 : vector<2x8x32xbf16> to vector<2x8x32xf32>
    %419 = vector.broadcast %417 : vector<2x1x32xf32> to vector<2x8x32xf32>
    %420 = arith.addf %419, %418 : vector<2x8x32xf32>
    %421 = math.tanh %420 : vector<2x8x32xf32>
    %422 = vector.shape_cast %12 : vector<1x32xf32> to vector<1x1x32xf32>
    %423 = vector.broadcast %422 : vector<1x1x32xf32> to vector<2x8x32xf32>
    %424 = arith.mulf %421, %423 : vector<2x8x32xf32>
    %cst_123 = arith.constant dense<0.000000e+00> : vector<2x8xf32>
    %425 = vector.multi_reduction <add>, %424, %cst_123 [2] : vector<2x8x32xf32> to vector<2x8xf32>
    %426 = vector.broadcast %13 : vector<1x1xf32> to vector<2x8xf32>
    %427 = arith.addf %425, %426 : vector<2x8xf32>
    %cst_124 = arith.constant dense<0xFF800000> : vector<2xf32>
    %428 = vector.multi_reduction <maximumf>, %427, %cst_124 [1] : vector<2x8xf32> to vector<2xf32>
    %429 = vector.shape_cast %428 : vector<2xf32> to vector<2x1xf32>
    %430 = vector.broadcast %429 : vector<2x1xf32> to vector<2x8xf32>
    %431 = arith.subf %427, %430 : vector<2x8xf32>
    %432 = math.exp %431 : vector<2x8xf32>
    %cst_125 = arith.constant dense<0.000000e+00> : vector<2xf32>
    %433 = vector.multi_reduction <add>, %432, %cst_125 [1] : vector<2x8xf32> to vector<2xf32>
    %434 = vector.shape_cast %433 : vector<2xf32> to vector<2x1xf32>
    %435 = tpu.reciprocal %434 {approx = true} : vector<2x1xf32> -> vector<2x1xf32>
    %436 = vector.broadcast %435 : vector<2x1xf32> to vector<2x8xf32>
    %437 = arith.mulf %432, %436 : vector<2x8xf32>
    %438 = vector.shape_cast %437 : vector<2x8xf32> to vector<2x8x1xf32>
    %439 = arith.extf %1 : vector<2x8x32xbf16> to vector<2x8x32xf32>
    %440 = vector.broadcast %438 : vector<2x8x1xf32> to vector<2x8x32xf32>
    %441 = arith.mulf %440, %439 : vector<2x8x32xf32>
    %cst_126 = arith.constant dense<0.000000e+00> : vector<2x32xf32>
    %442 = vector.multi_reduction <add>, %441, %cst_126 [1] : vector<2x8x32xf32> to vector<2x32xf32>
    %443 = arith.truncf %413 : vector<2x32xf32> to vector<2x32xbf16>
    %444 = arith.truncf %442 : vector<2x32xf32> to vector<2x32xbf16>
    %cst_127 = arith.constant dense<0.000000e+00> : vector<2x96xf32>
    %445 = tpu.matmul %443, %14, %cst_127 {dimension_numbers = #tpu.dot_dimension_numbers<[1], [0], [0], [1], [0, 0, 1, 1], [], []>} : vector<2x32xbf16>, vector<32x96xbf16>, vector<2x96xf32> -> vector<2x96xf32>
    %cst_128 = arith.constant dense<0.000000e+00> : vector<2x96xf32>
    %446 = tpu.matmul %444, %15, %cst_128 {dimension_numbers = #tpu.dot_dimension_numbers<[1], [0], [0], [1], [0, 0, 1, 1], [], []>} : vector<2x32xbf16>, vector<32x96xbf16>, vector<2x96xf32> -> vector<2x96xf32>
    %447 = arith.addf %445, %446 : vector<2x96xf32>
    %448 = vector.broadcast %17 : vector<1x96xf32> to vector<2x96xf32>
    %449 = arith.addf %447, %448 : vector<2x96xf32>
    %cst_129 = arith.constant dense<0.000000e+00> : vector<2x96xf32>
    %450 = tpu.matmul %412, %16, %cst_129 {dimension_numbers = #tpu.dot_dimension_numbers<[1], [0], [0], [1], [0, 0, 1, 1], [], []>} : vector<2x32xbf16>, vector<32x96xbf16>, vector<2x96xf32> -> vector<2x96xf32>
    %451 = vector.broadcast %18 : vector<1x96xf32> to vector<2x96xf32>
    %452 = arith.addf %450, %451 : vector<2x96xf32>
    %453 = arith.addf %449, %452 : vector<2x96xf32>
    %454 = vector.extract_strided_slice %453 {offsets = [0, 0], sizes = [2, 32], strides = [1, 1]} : vector<2x96xf32> to vector<2x32xf32>
    %455 = arith.negf %454 : vector<2x32xf32>
    %456 = math.exp %455 : vector<2x32xf32>
    %cst_130 = arith.constant 1.000000e+00 : f32
    %457 = vector.broadcast %cst_130 : f32 to vector<2x32xf32>
    %458 = arith.addf %457, %456 : vector<2x32xf32>
    %459 = arith.divf %457, %458 : vector<2x32xf32>
    %460 = vector.extract_strided_slice %453 {offsets = [0, 32], sizes = [2, 32], strides = [1, 1]} : vector<2x96xf32> to vector<2x32xf32>
    %461 = arith.negf %460 : vector<2x32xf32>
    %462 = math.exp %461 : vector<2x32xf32>
    %cst_131 = arith.constant 1.000000e+00 : f32
    %463 = vector.broadcast %cst_131 : f32 to vector<2x32xf32>
    %464 = arith.addf %463, %462 : vector<2x32xf32>
    %465 = arith.divf %463, %464 : vector<2x32xf32>
    %466 = vector.extract_strided_slice %449 {offsets = [0, 64], sizes = [2, 32], strides = [1, 1]} : vector<2x96xf32> to vector<2x32xf32>
    %467 = vector.extract_strided_slice %452 {offsets = [0, 64], sizes = [2, 32], strides = [1, 1]} : vector<2x96xf32> to vector<2x32xf32>
    %468 = arith.mulf %459, %467 : vector<2x32xf32>
    %469 = arith.addf %466, %468 : vector<2x32xf32>
    %470 = math.tanh %469 : vector<2x32xf32>
    %cst_132 = arith.constant 1.000000e+00 : f32
    %471 = vector.broadcast %cst_132 : f32 to vector<2x32xf32>
    %472 = arith.subf %471, %465 : vector<2x32xf32>
    %473 = arith.mulf %472, %470 : vector<2x32xf32>
    %474 = arith.mulf %465, %379 : vector<2x32xf32>
    %475 = arith.addf %473, %474 : vector<2x32xf32>
    %476 = arith.truncf %475 : vector<2x32xf32> to vector<2x32xbf16>
    %cst_133 = arith.constant dense<0.000000e+00> : vector<2x32xf32>
    %477 = tpu.matmul %476, %19, %cst_133 {dimension_numbers = #tpu.dot_dimension_numbers<[1], [0], [0], [1], [0, 0, 1, 1], [], []>} : vector<2x32xbf16>, vector<32x32xbf16>, vector<2x32xf32> -> vector<2x32xf32>
    %478 = vector.broadcast %20 : vector<1x32xf32> to vector<2x32xf32>
    %479 = arith.addf %477, %478 : vector<2x32xf32>
    %cst_134 = arith.constant dense<0xFF800000> : vector<2xf32>
    %480 = vector.multi_reduction <maximumf>, %479, %cst_134 [1] : vector<2x32xf32> to vector<2xf32>
    %481 = vector.shape_cast %480 : vector<2xf32> to vector<2x1xf32>
    %482 = vector.broadcast %481 : vector<2x1xf32> to vector<2x32xf32>
    %483 = arith.subf %479, %482 : vector<2x32xf32>
    %484 = math.exp %483 : vector<2x32xf32>
    %cst_135 = arith.constant dense<0.000000e+00> : vector<2xf32>
    %485 = vector.multi_reduction <add>, %484, %cst_135 [1] : vector<2x32xf32> to vector<2xf32>
    %486 = vector.shape_cast %485 : vector<2xf32> to vector<2x1xf32>
    %487 = math.log %486 : vector<2x1xf32>
    %488 = arith.addf %487, %481 : vector<2x1xf32>
    %489 = vector.broadcast %488 : vector<2x1xf32> to vector<2x32xf32>
    %490 = arith.subf %479, %489 : vector<2x32xf32>
    %c4 = arith.constant 4 : index
    %c0_136 = arith.constant 0 : index
    %c0_137 = arith.constant 0 : index
    %491 = vector.load %arg17[%c4, %c0_136, %c0_137] : memref<10x2x32xf32, #tpu.memory_space<vmem>>, vector<1x2x32xf32>
    %492 = vector.shape_cast %491 : vector<1x2x32xf32> to vector<2x32xf32>
    %493 = vector.shape_cast %490 : vector<2x32xf32> to vector<1x2x32xf32>
    tpu.vector_store %arg17[%c4, %c0_136, %c0_137], %493 {strides = array<i32>} : memref<10x2x32xf32, #tpu.memory_space<vmem>>, vector<1x2x32xf32>,
    %c4_138 = arith.constant 4 : index
    %c0_139 = arith.constant 0 : index
    %c0_140 = arith.constant 0 : index
    %494 = vector.load %arg18[%c4_138, %c0_139, %c0_140] : memref<10x2x8xf32, #tpu.memory_space<vmem>>, vector<1x2x8xf32>
    %495 = vector.shape_cast %494 : vector<1x2x8xf32> to vector<2x8xf32>
    %496 = vector.shape_cast %437 : vector<2x8xf32> to vector<1x2x8xf32>
    tpu.vector_store %arg18[%c4_138, %c0_139, %c0_140], %496 {strides = array<i32>} : memref<10x2x8xf32, #tpu.memory_space<vmem>>, vector<1x2x8xf32>,
    %497 = vector.broadcast %481 : vector<2x1xf32> to vector<2x32xf32>
    %498 = arith.cmpf oeq, %479, %497 : vector<2x32xf32>
    %c32_i32_141 = arith.constant 32 : i32
    %499 = vector.broadcast %c32_i32_141 : i32 to vector<2x32xi32>
    %500 = arith.select %498, %0, %499 : vector<2x32xi1>, vector<2x32xi32>
    %cst_142 = arith.constant dense<2147483647> : vector<2xi32>
    %501 = vector.multi_reduction <minsi>, %500, %cst_142 [1] : vector<2x32xi32> to vector<2xi32>
    %502 = vector.shape_cast %501 : vector<2xi32> to vector<2x1xi32>
    %503 = vector.broadcast %502 : vector<2x1xi32> to vector<2x32xi32>
    %504 = arith.cmpi eq, %0, %503 : vector<2x32xi32>
    %505 = arith.extui %504 : vector<2x32xi1> to vector<2x32xi32>
    %506 = arith.sitofp %505 : vector<2x32xi32> to vector<2x32xf32>
    %507 = arith.truncf %506 : vector<2x32xf32> to vector<2x32xbf16>
    %508 = arith.truncf %475 : vector<2x32xf32> to vector<2x32xbf16>
    %cst_143 = arith.constant dense<0.000000e+00> : vector<2x32xf32>
    %509 = tpu.matmul %507, %9, %cst_143 {dimension_numbers = #tpu.dot_dimension_numbers<[1], [0], [0], [1], [0, 0, 1, 1], [], []>} : vector<2x32xbf16>, vector<32x32xbf16>, vector<2x32xf32> -> vector<2x32xf32>
    %cst_144 = arith.constant dense<0.000000e+00> : vector<2x32xf32>
    %510 = tpu.matmul %508, %10, %cst_144 {dimension_numbers = #tpu.dot_dimension_numbers<[1], [0], [0], [1], [0, 0, 1, 1], [], []>} : vector<2x32xbf16>, vector<32x32xbf16>, vector<2x32xf32> -> vector<2x32xf32>
    %511 = vector.broadcast %11 : vector<1x32xf32> to vector<2x32xf32>
    %512 = arith.addf %510, %511 : vector<2x32xf32>
    %513 = vector.shape_cast %512 : vector<2x32xf32> to vector<2x1x32xf32>
    %514 = arith.extf %8 : vector<2x8x32xbf16> to vector<2x8x32xf32>
    %515 = vector.broadcast %513 : vector<2x1x32xf32> to vector<2x8x32xf32>
    %516 = arith.addf %515, %514 : vector<2x8x32xf32>
    %517 = math.tanh %516 : vector<2x8x32xf32>
    %518 = vector.shape_cast %12 : vector<1x32xf32> to vector<1x1x32xf32>
    %519 = vector.broadcast %518 : vector<1x1x32xf32> to vector<2x8x32xf32>
    %520 = arith.mulf %517, %519 : vector<2x8x32xf32>
    %cst_145 = arith.constant dense<0.000000e+00> : vector<2x8xf32>
    %521 = vector.multi_reduction <add>, %520, %cst_145 [2] : vector<2x8x32xf32> to vector<2x8xf32>
    %522 = vector.broadcast %13 : vector<1x1xf32> to vector<2x8xf32>
    %523 = arith.addf %521, %522 : vector<2x8xf32>
    %cst_146 = arith.constant dense<0xFF800000> : vector<2xf32>
    %524 = vector.multi_reduction <maximumf>, %523, %cst_146 [1] : vector<2x8xf32> to vector<2xf32>
    %525 = vector.shape_cast %524 : vector<2xf32> to vector<2x1xf32>
    %526 = vector.broadcast %525 : vector<2x1xf32> to vector<2x8xf32>
    %527 = arith.subf %523, %526 : vector<2x8xf32>
    %528 = math.exp %527 : vector<2x8xf32>
    %cst_147 = arith.constant dense<0.000000e+00> : vector<2xf32>
    %529 = vector.multi_reduction <add>, %528, %cst_147 [1] : vector<2x8xf32> to vector<2xf32>
    %530 = vector.shape_cast %529 : vector<2xf32> to vector<2x1xf32>
    %531 = tpu.reciprocal %530 {approx = true} : vector<2x1xf32> -> vector<2x1xf32>
    %532 = vector.broadcast %531 : vector<2x1xf32> to vector<2x8xf32>
    %533 = arith.mulf %528, %532 : vector<2x8xf32>
    %534 = vector.shape_cast %533 : vector<2x8xf32> to vector<2x8x1xf32>
    %535 = arith.extf %1 : vector<2x8x32xbf16> to vector<2x8x32xf32>
    %536 = vector.broadcast %534 : vector<2x8x1xf32> to vector<2x8x32xf32>
    %537 = arith.mulf %536, %535 : vector<2x8x32xf32>
    %cst_148 = arith.constant dense<0.000000e+00> : vector<2x32xf32>
    %538 = vector.multi_reduction <add>, %537, %cst_148 [1] : vector<2x8x32xf32> to vector<2x32xf32>
    %539 = arith.truncf %509 : vector<2x32xf32> to vector<2x32xbf16>
    %540 = arith.truncf %538 : vector<2x32xf32> to vector<2x32xbf16>
    %cst_149 = arith.constant dense<0.000000e+00> : vector<2x96xf32>
    %541 = tpu.matmul %539, %14, %cst_149 {dimension_numbers = #tpu.dot_dimension_numbers<[1], [0], [0], [1], [0, 0, 1, 1], [], []>} : vector<2x32xbf16>, vector<32x96xbf16>, vector<2x96xf32> -> vector<2x96xf32>
    %cst_150 = arith.constant dense<0.000000e+00> : vector<2x96xf32>
    %542 = tpu.matmul %540, %15, %cst_150 {dimension_numbers = #tpu.dot_dimension_numbers<[1], [0], [0], [1], [0, 0, 1, 1], [], []>} : vector<2x32xbf16>, vector<32x96xbf16>, vector<2x96xf32> -> vector<2x96xf32>
    %543 = arith.addf %541, %542 : vector<2x96xf32>
    %544 = vector.broadcast %17 : vector<1x96xf32> to vector<2x96xf32>
    %545 = arith.addf %543, %544 : vector<2x96xf32>
    %cst_151 = arith.constant dense<0.000000e+00> : vector<2x96xf32>
    %546 = tpu.matmul %508, %16, %cst_151 {dimension_numbers = #tpu.dot_dimension_numbers<[1], [0], [0], [1], [0, 0, 1, 1], [], []>} : vector<2x32xbf16>, vector<32x96xbf16>, vector<2x96xf32> -> vector<2x96xf32>
    %547 = vector.broadcast %18 : vector<1x96xf32> to vector<2x96xf32>
    %548 = arith.addf %546, %547 : vector<2x96xf32>
    %549 = arith.addf %545, %548 : vector<2x96xf32>
    %550 = vector.extract_strided_slice %549 {offsets = [0, 0], sizes = [2, 32], strides = [1, 1]} : vector<2x96xf32> to vector<2x32xf32>
    %551 = arith.negf %550 : vector<2x32xf32>
    %552 = math.exp %551 : vector<2x32xf32>
    %cst_152 = arith.constant 1.000000e+00 : f32
    %553 = vector.broadcast %cst_152 : f32 to vector<2x32xf32>
    %554 = arith.addf %553, %552 : vector<2x32xf32>
    %555 = arith.divf %553, %554 : vector<2x32xf32>
    %556 = vector.extract_strided_slice %549 {offsets = [0, 32], sizes = [2, 32], strides = [1, 1]} : vector<2x96xf32> to vector<2x32xf32>
    %557 = arith.negf %556 : vector<2x32xf32>
    %558 = math.exp %557 : vector<2x32xf32>
    %cst_153 = arith.constant 1.000000e+00 : f32
    %559 = vector.broadcast %cst_153 : f32 to vector<2x32xf32>
    %560 = arith.addf %559, %558 : vector<2x32xf32>
    %561 = arith.divf %559, %560 : vector<2x32xf32>
    %562 = vector.extract_strided_slice %545 {offsets = [0, 64], sizes = [2, 32], strides = [1, 1]} : vector<2x96xf32> to vector<2x32xf32>
    %563 = vector.extract_strided_slice %548 {offsets = [0, 64], sizes = [2, 32], strides = [1, 1]} : vector<2x96xf32> to vector<2x32xf32>
    %564 = arith.mulf %555, %563 : vector<2x32xf32>
    %565 = arith.addf %562, %564 : vector<2x32xf32>
    %566 = math.tanh %565 : vector<2x32xf32>
    %cst_154 = arith.constant 1.000000e+00 : f32
    %567 = vector.broadcast %cst_154 : f32 to vector<2x32xf32>
    %568 = arith.subf %567, %561 : vector<2x32xf32>
    %569 = arith.mulf %568, %566 : vector<2x32xf32>
    %570 = arith.mulf %561, %475 : vector<2x32xf32>
    %571 = arith.addf %569, %570 : vector<2x32xf32>
    %572 = arith.truncf %571 : vector<2x32xf32> to vector<2x32xbf16>
    %cst_155 = arith.constant dense<0.000000e+00> : vector<2x32xf32>
    %573 = tpu.matmul %572, %19, %cst_155 {dimension_numbers = #tpu.dot_dimension_numbers<[1], [0], [0], [1], [0, 0, 1, 1], [], []>} : vector<2x32xbf16>, vector<32x32xbf16>, vector<2x32xf32> -> vector<2x32xf32>
    %574 = vector.broadcast %20 : vector<1x32xf32> to vector<2x32xf32>
    %575 = arith.addf %573, %574 : vector<2x32xf32>
    %cst_156 = arith.constant dense<0xFF800000> : vector<2xf32>
    %576 = vector.multi_reduction <maximumf>, %575, %cst_156 [1] : vector<2x32xf32> to vector<2xf32>
    %577 = vector.shape_cast %576 : vector<2xf32> to vector<2x1xf32>
    %578 = vector.broadcast %577 : vector<2x1xf32> to vector<2x32xf32>
    %579 = arith.subf %575, %578 : vector<2x32xf32>
    %580 = math.exp %579 : vector<2x32xf32>
    %cst_157 = arith.constant dense<0.000000e+00> : vector<2xf32>
    %581 = vector.multi_reduction <add>, %580, %cst_157 [1] : vector<2x32xf32> to vector<2xf32>
    %582 = vector.shape_cast %581 : vector<2xf32> to vector<2x1xf32>
    %583 = math.log %582 : vector<2x1xf32>
    %584 = arith.addf %583, %577 : vector<2x1xf32>
    %585 = vector.broadcast %584 : vector<2x1xf32> to vector<2x32xf32>
    %586 = arith.subf %575, %585 : vector<2x32xf32>
    %c5 = arith.constant 5 : index
    %c0_158 = arith.constant 0 : index
    %c0_159 = arith.constant 0 : index
    %587 = vector.load %arg17[%c5, %c0_158, %c0_159] : memref<10x2x32xf32, #tpu.memory_space<vmem>>, vector<1x2x32xf32>
    %588 = vector.shape_cast %587 : vector<1x2x32xf32> to vector<2x32xf32>
    %589 = vector.shape_cast %586 : vector<2x32xf32> to vector<1x2x32xf32>
    tpu.vector_store %arg17[%c5, %c0_158, %c0_159], %589 {strides = array<i32>} : memref<10x2x32xf32, #tpu.memory_space<vmem>>, vector<1x2x32xf32>,
    %c5_160 = arith.constant 5 : index
    %c0_161 = arith.constant 0 : index
    %c0_162 = arith.constant 0 : index
    %590 = vector.load %arg18[%c5_160, %c0_161, %c0_162] : memref<10x2x8xf32, #tpu.memory_space<vmem>>, vector<1x2x8xf32>
    %591 = vector.shape_cast %590 : vector<1x2x8xf32> to vector<2x8xf32>
    %592 = vector.shape_cast %533 : vector<2x8xf32> to vector<1x2x8xf32>
    tpu.vector_store %arg18[%c5_160, %c0_161, %c0_162], %592 {strides = array<i32>} : memref<10x2x8xf32, #tpu.memory_space<vmem>>, vector<1x2x8xf32>,
    %593 = vector.broadcast %577 : vector<2x1xf32> to vector<2x32xf32>
    %594 = arith.cmpf oeq, %575, %593 : vector<2x32xf32>
    %c32_i32_163 = arith.constant 32 : i32
    %595 = vector.broadcast %c32_i32_163 : i32 to vector<2x32xi32>
    %596 = arith.select %594, %0, %595 : vector<2x32xi1>, vector<2x32xi32>
    %cst_164 = arith.constant dense<2147483647> : vector<2xi32>
    %597 = vector.multi_reduction <minsi>, %596, %cst_164 [1] : vector<2x32xi32> to vector<2xi32>
    %598 = vector.shape_cast %597 : vector<2xi32> to vector<2x1xi32>
    %599 = vector.broadcast %598 : vector<2x1xi32> to vector<2x32xi32>
    %600 = arith.cmpi eq, %0, %599 : vector<2x32xi32>
    %601 = arith.extui %600 : vector<2x32xi1> to vector<2x32xi32>
    %602 = arith.sitofp %601 : vector<2x32xi32> to vector<2x32xf32>
    %603 = arith.truncf %602 : vector<2x32xf32> to vector<2x32xbf16>
    %604 = arith.truncf %571 : vector<2x32xf32> to vector<2x32xbf16>
    %cst_165 = arith.constant dense<0.000000e+00> : vector<2x32xf32>
    %605 = tpu.matmul %603, %9, %cst_165 {dimension_numbers = #tpu.dot_dimension_numbers<[1], [0], [0], [1], [0, 0, 1, 1], [], []>} : vector<2x32xbf16>, vector<32x32xbf16>, vector<2x32xf32> -> vector<2x32xf32>
    %cst_166 = arith.constant dense<0.000000e+00> : vector<2x32xf32>
    %606 = tpu.matmul %604, %10, %cst_166 {dimension_numbers = #tpu.dot_dimension_numbers<[1], [0], [0], [1], [0, 0, 1, 1], [], []>} : vector<2x32xbf16>, vector<32x32xbf16>, vector<2x32xf32> -> vector<2x32xf32>
    %607 = vector.broadcast %11 : vector<1x32xf32> to vector<2x32xf32>
    %608 = arith.addf %606, %607 : vector<2x32xf32>
    %609 = vector.shape_cast %608 : vector<2x32xf32> to vector<2x1x32xf32>
    %610 = arith.extf %8 : vector<2x8x32xbf16> to vector<2x8x32xf32>
    %611 = vector.broadcast %609 : vector<2x1x32xf32> to vector<2x8x32xf32>
    %612 = arith.addf %611, %610 : vector<2x8x32xf32>
    %613 = math.tanh %612 : vector<2x8x32xf32>
    %614 = vector.shape_cast %12 : vector<1x32xf32> to vector<1x1x32xf32>
    %615 = vector.broadcast %614 : vector<1x1x32xf32> to vector<2x8x32xf32>
    %616 = arith.mulf %613, %615 : vector<2x8x32xf32>
    %cst_167 = arith.constant dense<0.000000e+00> : vector<2x8xf32>
    %617 = vector.multi_reduction <add>, %616, %cst_167 [2] : vector<2x8x32xf32> to vector<2x8xf32>
    %618 = vector.broadcast %13 : vector<1x1xf32> to vector<2x8xf32>
    %619 = arith.addf %617, %618 : vector<2x8xf32>
    %cst_168 = arith.constant dense<0xFF800000> : vector<2xf32>
    %620 = vector.multi_reduction <maximumf>, %619, %cst_168 [1] : vector<2x8xf32> to vector<2xf32>
    %621 = vector.shape_cast %620 : vector<2xf32> to vector<2x1xf32>
    %622 = vector.broadcast %621 : vector<2x1xf32> to vector<2x8xf32>
    %623 = arith.subf %619, %622 : vector<2x8xf32>
    %624 = math.exp %623 : vector<2x8xf32>
    %cst_169 = arith.constant dense<0.000000e+00> : vector<2xf32>
    %625 = vector.multi_reduction <add>, %624, %cst_169 [1] : vector<2x8xf32> to vector<2xf32>
    %626 = vector.shape_cast %625 : vector<2xf32> to vector<2x1xf32>
    %627 = tpu.reciprocal %626 {approx = true} : vector<2x1xf32> -> vector<2x1xf32>
    %628 = vector.broadcast %627 : vector<2x1xf32> to vector<2x8xf32>
    %629 = arith.mulf %624, %628 : vector<2x8xf32>
    %630 = vector.shape_cast %629 : vector<2x8xf32> to vector<2x8x1xf32>
    %631 = arith.extf %1 : vector<2x8x32xbf16> to vector<2x8x32xf32>
    %632 = vector.broadcast %630 : vector<2x8x1xf32> to vector<2x8x32xf32>
    %633 = arith.mulf %632, %631 : vector<2x8x32xf32>
    %cst_170 = arith.constant dense<0.000000e+00> : vector<2x32xf32>
    %634 = vector.multi_reduction <add>, %633, %cst_170 [1] : vector<2x8x32xf32> to vector<2x32xf32>
    %635 = arith.truncf %605 : vector<2x32xf32> to vector<2x32xbf16>
    %636 = arith.truncf %634 : vector<2x32xf32> to vector<2x32xbf16>
    %cst_171 = arith.constant dense<0.000000e+00> : vector<2x96xf32>
    %637 = tpu.matmul %635, %14, %cst_171 {dimension_numbers = #tpu.dot_dimension_numbers<[1], [0], [0], [1], [0, 0, 1, 1], [], []>} : vector<2x32xbf16>, vector<32x96xbf16>, vector<2x96xf32> -> vector<2x96xf32>
    %cst_172 = arith.constant dense<0.000000e+00> : vector<2x96xf32>
    %638 = tpu.matmul %636, %15, %cst_172 {dimension_numbers = #tpu.dot_dimension_numbers<[1], [0], [0], [1], [0, 0, 1, 1], [], []>} : vector<2x32xbf16>, vector<32x96xbf16>, vector<2x96xf32> -> vector<2x96xf32>
    %639 = arith.addf %637, %638 : vector<2x96xf32>
    %640 = vector.broadcast %17 : vector<1x96xf32> to vector<2x96xf32>
    %641 = arith.addf %639, %640 : vector<2x96xf32>
    %cst_173 = arith.constant dense<0.000000e+00> : vector<2x96xf32>
    %642 = tpu.matmul %604, %16, %cst_173 {dimension_numbers = #tpu.dot_dimension_numbers<[1], [0], [0], [1], [0, 0, 1, 1], [], []>} : vector<2x32xbf16>, vector<32x96xbf16>, vector<2x96xf32> -> vector<2x96xf32>
    %643 = vector.broadcast %18 : vector<1x96xf32> to vector<2x96xf32>
    %644 = arith.addf %642, %643 : vector<2x96xf32>
    %645 = arith.addf %641, %644 : vector<2x96xf32>
    %646 = vector.extract_strided_slice %645 {offsets = [0, 0], sizes = [2, 32], strides = [1, 1]} : vector<2x96xf32> to vector<2x32xf32>
    %647 = arith.negf %646 : vector<2x32xf32>
    %648 = math.exp %647 : vector<2x32xf32>
    %cst_174 = arith.constant 1.000000e+00 : f32
    %649 = vector.broadcast %cst_174 : f32 to vector<2x32xf32>
    %650 = arith.addf %649, %648 : vector<2x32xf32>
    %651 = arith.divf %649, %650 : vector<2x32xf32>
    %652 = vector.extract_strided_slice %645 {offsets = [0, 32], sizes = [2, 32], strides = [1, 1]} : vector<2x96xf32> to vector<2x32xf32>
    %653 = arith.negf %652 : vector<2x32xf32>
    %654 = math.exp %653 : vector<2x32xf32>
    %cst_175 = arith.constant 1.000000e+00 : f32
    %655 = vector.broadcast %cst_175 : f32 to vector<2x32xf32>
    %656 = arith.addf %655, %654 : vector<2x32xf32>
    %657 = arith.divf %655, %656 : vector<2x32xf32>
    %658 = vector.extract_strided_slice %641 {offsets = [0, 64], sizes = [2, 32], strides = [1, 1]} : vector<2x96xf32> to vector<2x32xf32>
    %659 = vector.extract_strided_slice %644 {offsets = [0, 64], sizes = [2, 32], strides = [1, 1]} : vector<2x96xf32> to vector<2x32xf32>
    %660 = arith.mulf %651, %659 : vector<2x32xf32>
    %661 = arith.addf %658, %660 : vector<2x32xf32>
    %662 = math.tanh %661 : vector<2x32xf32>
    %cst_176 = arith.constant 1.000000e+00 : f32
    %663 = vector.broadcast %cst_176 : f32 to vector<2x32xf32>
    %664 = arith.subf %663, %657 : vector<2x32xf32>
    %665 = arith.mulf %664, %662 : vector<2x32xf32>
    %666 = arith.mulf %657, %571 : vector<2x32xf32>
    %667 = arith.addf %665, %666 : vector<2x32xf32>
    %668 = arith.truncf %667 : vector<2x32xf32> to vector<2x32xbf16>
    %cst_177 = arith.constant dense<0.000000e+00> : vector<2x32xf32>
    %669 = tpu.matmul %668, %19, %cst_177 {dimension_numbers = #tpu.dot_dimension_numbers<[1], [0], [0], [1], [0, 0, 1, 1], [], []>} : vector<2x32xbf16>, vector<32x32xbf16>, vector<2x32xf32> -> vector<2x32xf32>
    %670 = vector.broadcast %20 : vector<1x32xf32> to vector<2x32xf32>
    %671 = arith.addf %669, %670 : vector<2x32xf32>
    %cst_178 = arith.constant dense<0xFF800000> : vector<2xf32>
    %672 = vector.multi_reduction <maximumf>, %671, %cst_178 [1] : vector<2x32xf32> to vector<2xf32>
    %673 = vector.shape_cast %672 : vector<2xf32> to vector<2x1xf32>
    %674 = vector.broadcast %673 : vector<2x1xf32> to vector<2x32xf32>
    %675 = arith.subf %671, %674 : vector<2x32xf32>
    %676 = math.exp %675 : vector<2x32xf32>
    %cst_179 = arith.constant dense<0.000000e+00> : vector<2xf32>
    %677 = vector.multi_reduction <add>, %676, %cst_179 [1] : vector<2x32xf32> to vector<2xf32>
    %678 = vector.shape_cast %677 : vector<2xf32> to vector<2x1xf32>
    %679 = math.log %678 : vector<2x1xf32>
    %680 = arith.addf %679, %673 : vector<2x1xf32>
    %681 = vector.broadcast %680 : vector<2x1xf32> to vector<2x32xf32>
    %682 = arith.subf %671, %681 : vector<2x32xf32>
    %c6 = arith.constant 6 : index
    %c0_180 = arith.constant 0 : index
    %c0_181 = arith.constant 0 : index
    %683 = vector.load %arg17[%c6, %c0_180, %c0_181] : memref<10x2x32xf32, #tpu.memory_space<vmem>>, vector<1x2x32xf32>
    %684 = vector.shape_cast %683 : vector<1x2x32xf32> to vector<2x32xf32>
    %685 = vector.shape_cast %682 : vector<2x32xf32> to vector<1x2x32xf32>
    tpu.vector_store %arg17[%c6, %c0_180, %c0_181], %685 {strides = array<i32>} : memref<10x2x32xf32, #tpu.memory_space<vmem>>, vector<1x2x32xf32>,
    %c6_182 = arith.constant 6 : index
    %c0_183 = arith.constant 0 : index
    %c0_184 = arith.constant 0 : index
    %686 = vector.load %arg18[%c6_182, %c0_183, %c0_184] : memref<10x2x8xf32, #tpu.memory_space<vmem>>, vector<1x2x8xf32>
    %687 = vector.shape_cast %686 : vector<1x2x8xf32> to vector<2x8xf32>
    %688 = vector.shape_cast %629 : vector<2x8xf32> to vector<1x2x8xf32>
    tpu.vector_store %arg18[%c6_182, %c0_183, %c0_184], %688 {strides = array<i32>} : memref<10x2x8xf32, #tpu.memory_space<vmem>>, vector<1x2x8xf32>,
    %689 = vector.broadcast %673 : vector<2x1xf32> to vector<2x32xf32>
    %690 = arith.cmpf oeq, %671, %689 : vector<2x32xf32>
    %c32_i32_185 = arith.constant 32 : i32
    %691 = vector.broadcast %c32_i32_185 : i32 to vector<2x32xi32>
    %692 = arith.select %690, %0, %691 : vector<2x32xi1>, vector<2x32xi32>
    %cst_186 = arith.constant dense<2147483647> : vector<2xi32>
    %693 = vector.multi_reduction <minsi>, %692, %cst_186 [1] : vector<2x32xi32> to vector<2xi32>
    %694 = vector.shape_cast %693 : vector<2xi32> to vector<2x1xi32>
    %695 = vector.broadcast %694 : vector<2x1xi32> to vector<2x32xi32>
    %696 = arith.cmpi eq, %0, %695 : vector<2x32xi32>
    %697 = arith.extui %696 : vector<2x32xi1> to vector<2x32xi32>
    %698 = arith.sitofp %697 : vector<2x32xi32> to vector<2x32xf32>
    %699 = arith.truncf %698 : vector<2x32xf32> to vector<2x32xbf16>
    %700 = arith.truncf %667 : vector<2x32xf32> to vector<2x32xbf16>
    %cst_187 = arith.constant dense<0.000000e+00> : vector<2x32xf32>
    %701 = tpu.matmul %699, %9, %cst_187 {dimension_numbers = #tpu.dot_dimension_numbers<[1], [0], [0], [1], [0, 0, 1, 1], [], []>} : vector<2x32xbf16>, vector<32x32xbf16>, vector<2x32xf32> -> vector<2x32xf32>
    %cst_188 = arith.constant dense<0.000000e+00> : vector<2x32xf32>
    %702 = tpu.matmul %700, %10, %cst_188 {dimension_numbers = #tpu.dot_dimension_numbers<[1], [0], [0], [1], [0, 0, 1, 1], [], []>} : vector<2x32xbf16>, vector<32x32xbf16>, vector<2x32xf32> -> vector<2x32xf32>
    %703 = vector.broadcast %11 : vector<1x32xf32> to vector<2x32xf32>
    %704 = arith.addf %702, %703 : vector<2x32xf32>
    %705 = vector.shape_cast %704 : vector<2x32xf32> to vector<2x1x32xf32>
    %706 = arith.extf %8 : vector<2x8x32xbf16> to vector<2x8x32xf32>
    %707 = vector.broadcast %705 : vector<2x1x32xf32> to vector<2x8x32xf32>
    %708 = arith.addf %707, %706 : vector<2x8x32xf32>
    %709 = math.tanh %708 : vector<2x8x32xf32>
    %710 = vector.shape_cast %12 : vector<1x32xf32> to vector<1x1x32xf32>
    %711 = vector.broadcast %710 : vector<1x1x32xf32> to vector<2x8x32xf32>
    %712 = arith.mulf %709, %711 : vector<2x8x32xf32>
    %cst_189 = arith.constant dense<0.000000e+00> : vector<2x8xf32>
    %713 = vector.multi_reduction <add>, %712, %cst_189 [2] : vector<2x8x32xf32> to vector<2x8xf32>
    %714 = vector.broadcast %13 : vector<1x1xf32> to vector<2x8xf32>
    %715 = arith.addf %713, %714 : vector<2x8xf32>
    %cst_190 = arith.constant dense<0xFF800000> : vector<2xf32>
    %716 = vector.multi_reduction <maximumf>, %715, %cst_190 [1] : vector<2x8xf32> to vector<2xf32>
    %717 = vector.shape_cast %716 : vector<2xf32> to vector<2x1xf32>
    %718 = vector.broadcast %717 : vector<2x1xf32> to vector<2x8xf32>
    %719 = arith.subf %715, %718 : vector<2x8xf32>
    %720 = math.exp %719 : vector<2x8xf32>
    %cst_191 = arith.constant dense<0.000000e+00> : vector<2xf32>
    %721 = vector.multi_reduction <add>, %720, %cst_191 [1] : vector<2x8xf32> to vector<2xf32>
    %722 = vector.shape_cast %721 : vector<2xf32> to vector<2x1xf32>
    %723 = tpu.reciprocal %722 {approx = true} : vector<2x1xf32> -> vector<2x1xf32>
    %724 = vector.broadcast %723 : vector<2x1xf32> to vector<2x8xf32>
    %725 = arith.mulf %720, %724 : vector<2x8xf32>
    %726 = vector.shape_cast %725 : vector<2x8xf32> to vector<2x8x1xf32>
    %727 = arith.extf %1 : vector<2x8x32xbf16> to vector<2x8x32xf32>
    %728 = vector.broadcast %726 : vector<2x8x1xf32> to vector<2x8x32xf32>
    %729 = arith.mulf %728, %727 : vector<2x8x32xf32>
    %cst_192 = arith.constant dense<0.000000e+00> : vector<2x32xf32>
    %730 = vector.multi_reduction <add>, %729, %cst_192 [1] : vector<2x8x32xf32> to vector<2x32xf32>
    %731 = arith.truncf %701 : vector<2x32xf32> to vector<2x32xbf16>
    %732 = arith.truncf %730 : vector<2x32xf32> to vector<2x32xbf16>
    %cst_193 = arith.constant dense<0.000000e+00> : vector<2x96xf32>
    %733 = tpu.matmul %731, %14, %cst_193 {dimension_numbers = #tpu.dot_dimension_numbers<[1], [0], [0], [1], [0, 0, 1, 1], [], []>} : vector<2x32xbf16>, vector<32x96xbf16>, vector<2x96xf32> -> vector<2x96xf32>
    %cst_194 = arith.constant dense<0.000000e+00> : vector<2x96xf32>
    %734 = tpu.matmul %732, %15, %cst_194 {dimension_numbers = #tpu.dot_dimension_numbers<[1], [0], [0], [1], [0, 0, 1, 1], [], []>} : vector<2x32xbf16>, vector<32x96xbf16>, vector<2x96xf32> -> vector<2x96xf32>
    %735 = arith.addf %733, %734 : vector<2x96xf32>
    %736 = vector.broadcast %17 : vector<1x96xf32> to vector<2x96xf32>
    %737 = arith.addf %735, %736 : vector<2x96xf32>
    %cst_195 = arith.constant dense<0.000000e+00> : vector<2x96xf32>
    %738 = tpu.matmul %700, %16, %cst_195 {dimension_numbers = #tpu.dot_dimension_numbers<[1], [0], [0], [1], [0, 0, 1, 1], [], []>} : vector<2x32xbf16>, vector<32x96xbf16>, vector<2x96xf32> -> vector<2x96xf32>
    %739 = vector.broadcast %18 : vector<1x96xf32> to vector<2x96xf32>
    %740 = arith.addf %738, %739 : vector<2x96xf32>
    %741 = arith.addf %737, %740 : vector<2x96xf32>
    %742 = vector.extract_strided_slice %741 {offsets = [0, 0], sizes = [2, 32], strides = [1, 1]} : vector<2x96xf32> to vector<2x32xf32>
    %743 = arith.negf %742 : vector<2x32xf32>
    %744 = math.exp %743 : vector<2x32xf32>
    %cst_196 = arith.constant 1.000000e+00 : f32
    %745 = vector.broadcast %cst_196 : f32 to vector<2x32xf32>
    %746 = arith.addf %745, %744 : vector<2x32xf32>
    %747 = arith.divf %745, %746 : vector<2x32xf32>
    %748 = vector.extract_strided_slice %741 {offsets = [0, 32], sizes = [2, 32], strides = [1, 1]} : vector<2x96xf32> to vector<2x32xf32>
    %749 = arith.negf %748 : vector<2x32xf32>
    %750 = math.exp %749 : vector<2x32xf32>
    %cst_197 = arith.constant 1.000000e+00 : f32
    %751 = vector.broadcast %cst_197 : f32 to vector<2x32xf32>
    %752 = arith.addf %751, %750 : vector<2x32xf32>
    %753 = arith.divf %751, %752 : vector<2x32xf32>
    %754 = vector.extract_strided_slice %737 {offsets = [0, 64], sizes = [2, 32], strides = [1, 1]} : vector<2x96xf32> to vector<2x32xf32>
    %755 = vector.extract_strided_slice %740 {offsets = [0, 64], sizes = [2, 32], strides = [1, 1]} : vector<2x96xf32> to vector<2x32xf32>
    %756 = arith.mulf %747, %755 : vector<2x32xf32>
    %757 = arith.addf %754, %756 : vector<2x32xf32>
    %758 = math.tanh %757 : vector<2x32xf32>
    %cst_198 = arith.constant 1.000000e+00 : f32
    %759 = vector.broadcast %cst_198 : f32 to vector<2x32xf32>
    %760 = arith.subf %759, %753 : vector<2x32xf32>
    %761 = arith.mulf %760, %758 : vector<2x32xf32>
    %762 = arith.mulf %753, %667 : vector<2x32xf32>
    %763 = arith.addf %761, %762 : vector<2x32xf32>
    %764 = arith.truncf %763 : vector<2x32xf32> to vector<2x32xbf16>
    %cst_199 = arith.constant dense<0.000000e+00> : vector<2x32xf32>
    %765 = tpu.matmul %764, %19, %cst_199 {dimension_numbers = #tpu.dot_dimension_numbers<[1], [0], [0], [1], [0, 0, 1, 1], [], []>} : vector<2x32xbf16>, vector<32x32xbf16>, vector<2x32xf32> -> vector<2x32xf32>
    %766 = vector.broadcast %20 : vector<1x32xf32> to vector<2x32xf32>
    %767 = arith.addf %765, %766 : vector<2x32xf32>
    %cst_200 = arith.constant dense<0xFF800000> : vector<2xf32>
    %768 = vector.multi_reduction <maximumf>, %767, %cst_200 [1] : vector<2x32xf32> to vector<2xf32>
    %769 = vector.shape_cast %768 : vector<2xf32> to vector<2x1xf32>
    %770 = vector.broadcast %769 : vector<2x1xf32> to vector<2x32xf32>
    %771 = arith.subf %767, %770 : vector<2x32xf32>
    %772 = math.exp %771 : vector<2x32xf32>
    %cst_201 = arith.constant dense<0.000000e+00> : vector<2xf32>
    %773 = vector.multi_reduction <add>, %772, %cst_201 [1] : vector<2x32xf32> to vector<2xf32>
    %774 = vector.shape_cast %773 : vector<2xf32> to vector<2x1xf32>
    %775 = math.log %774 : vector<2x1xf32>
    %776 = arith.addf %775, %769 : vector<2x1xf32>
    %777 = vector.broadcast %776 : vector<2x1xf32> to vector<2x32xf32>
    %778 = arith.subf %767, %777 : vector<2x32xf32>
    %c7 = arith.constant 7 : index
    %c0_202 = arith.constant 0 : index
    %c0_203 = arith.constant 0 : index
    %779 = vector.load %arg17[%c7, %c0_202, %c0_203] : memref<10x2x32xf32, #tpu.memory_space<vmem>>, vector<1x2x32xf32>
    %780 = vector.shape_cast %779 : vector<1x2x32xf32> to vector<2x32xf32>
    %781 = vector.shape_cast %778 : vector<2x32xf32> to vector<1x2x32xf32>
    tpu.vector_store %arg17[%c7, %c0_202, %c0_203], %781 {strides = array<i32>} : memref<10x2x32xf32, #tpu.memory_space<vmem>>, vector<1x2x32xf32>,
    %c7_204 = arith.constant 7 : index
    %c0_205 = arith.constant 0 : index
    %c0_206 = arith.constant 0 : index
    %782 = vector.load %arg18[%c7_204, %c0_205, %c0_206] : memref<10x2x8xf32, #tpu.memory_space<vmem>>, vector<1x2x8xf32>
    %783 = vector.shape_cast %782 : vector<1x2x8xf32> to vector<2x8xf32>
    %784 = vector.shape_cast %725 : vector<2x8xf32> to vector<1x2x8xf32>
    tpu.vector_store %arg18[%c7_204, %c0_205, %c0_206], %784 {strides = array<i32>} : memref<10x2x8xf32, #tpu.memory_space<vmem>>, vector<1x2x8xf32>,
    %785 = vector.broadcast %769 : vector<2x1xf32> to vector<2x32xf32>
    %786 = arith.cmpf oeq, %767, %785 : vector<2x32xf32>
    %c32_i32_207 = arith.constant 32 : i32
    %787 = vector.broadcast %c32_i32_207 : i32 to vector<2x32xi32>
    %788 = arith.select %786, %0, %787 : vector<2x32xi1>, vector<2x32xi32>
    %cst_208 = arith.constant dense<2147483647> : vector<2xi32>
    %789 = vector.multi_reduction <minsi>, %788, %cst_208 [1] : vector<2x32xi32> to vector<2xi32>
    %790 = vector.shape_cast %789 : vector<2xi32> to vector<2x1xi32>
    %791 = vector.broadcast %790 : vector<2x1xi32> to vector<2x32xi32>
    %792 = arith.cmpi eq, %0, %791 : vector<2x32xi32>
    %793 = arith.extui %792 : vector<2x32xi1> to vector<2x32xi32>
    %794 = arith.sitofp %793 : vector<2x32xi32> to vector<2x32xf32>
    %795 = arith.truncf %794 : vector<2x32xf32> to vector<2x32xbf16>
    %796 = arith.truncf %763 : vector<2x32xf32> to vector<2x32xbf16>
    %cst_209 = arith.constant dense<0.000000e+00> : vector<2x32xf32>
    %797 = tpu.matmul %795, %9, %cst_209 {dimension_numbers = #tpu.dot_dimension_numbers<[1], [0], [0], [1], [0, 0, 1, 1], [], []>} : vector<2x32xbf16>, vector<32x32xbf16>, vector<2x32xf32> -> vector<2x32xf32>
    %cst_210 = arith.constant dense<0.000000e+00> : vector<2x32xf32>
    %798 = tpu.matmul %796, %10, %cst_210 {dimension_numbers = #tpu.dot_dimension_numbers<[1], [0], [0], [1], [0, 0, 1, 1], [], []>} : vector<2x32xbf16>, vector<32x32xbf16>, vector<2x32xf32> -> vector<2x32xf32>
    %799 = vector.broadcast %11 : vector<1x32xf32> to vector<2x32xf32>
    %800 = arith.addf %798, %799 : vector<2x32xf32>
    %801 = vector.shape_cast %800 : vector<2x32xf32> to vector<2x1x32xf32>
    %802 = arith.extf %8 : vector<2x8x32xbf16> to vector<2x8x32xf32>
    %803 = vector.broadcast %801 : vector<2x1x32xf32> to vector<2x8x32xf32>
    %804 = arith.addf %803, %802 : vector<2x8x32xf32>
    %805 = math.tanh %804 : vector<2x8x32xf32>
    %806 = vector.shape_cast %12 : vector<1x32xf32> to vector<1x1x32xf32>
    %807 = vector.broadcast %806 : vector<1x1x32xf32> to vector<2x8x32xf32>
    %808 = arith.mulf %805, %807 : vector<2x8x32xf32>
    %cst_211 = arith.constant dense<0.000000e+00> : vector<2x8xf32>
    %809 = vector.multi_reduction <add>, %808, %cst_211 [2] : vector<2x8x32xf32> to vector<2x8xf32>
    %810 = vector.broadcast %13 : vector<1x1xf32> to vector<2x8xf32>
    %811 = arith.addf %809, %810 : vector<2x8xf32>
    %cst_212 = arith.constant dense<0xFF800000> : vector<2xf32>
    %812 = vector.multi_reduction <maximumf>, %811, %cst_212 [1] : vector<2x8xf32> to vector<2xf32>
    %813 = vector.shape_cast %812 : vector<2xf32> to vector<2x1xf32>
    %814 = vector.broadcast %813 : vector<2x1xf32> to vector<2x8xf32>
    %815 = arith.subf %811, %814 : vector<2x8xf32>
    %816 = math.exp %815 : vector<2x8xf32>
    %cst_213 = arith.constant dense<0.000000e+00> : vector<2xf32>
    %817 = vector.multi_reduction <add>, %816, %cst_213 [1] : vector<2x8xf32> to vector<2xf32>
    %818 = vector.shape_cast %817 : vector<2xf32> to vector<2x1xf32>
    %819 = tpu.reciprocal %818 {approx = true} : vector<2x1xf32> -> vector<2x1xf32>
    %820 = vector.broadcast %819 : vector<2x1xf32> to vector<2x8xf32>
    %821 = arith.mulf %816, %820 : vector<2x8xf32>
    %822 = vector.shape_cast %821 : vector<2x8xf32> to vector<2x8x1xf32>
    %823 = arith.extf %1 : vector<2x8x32xbf16> to vector<2x8x32xf32>
    %824 = vector.broadcast %822 : vector<2x8x1xf32> to vector<2x8x32xf32>
    %825 = arith.mulf %824, %823 : vector<2x8x32xf32>
    %cst_214 = arith.constant dense<0.000000e+00> : vector<2x32xf32>
    %826 = vector.multi_reduction <add>, %825, %cst_214 [1] : vector<2x8x32xf32> to vector<2x32xf32>
    %827 = arith.truncf %797 : vector<2x32xf32> to vector<2x32xbf16>
    %828 = arith.truncf %826 : vector<2x32xf32> to vector<2x32xbf16>
    %cst_215 = arith.constant dense<0.000000e+00> : vector<2x96xf32>
    %829 = tpu.matmul %827, %14, %cst_215 {dimension_numbers = #tpu.dot_dimension_numbers<[1], [0], [0], [1], [0, 0, 1, 1], [], []>} : vector<2x32xbf16>, vector<32x96xbf16>, vector<2x96xf32> -> vector<2x96xf32>
    %cst_216 = arith.constant dense<0.000000e+00> : vector<2x96xf32>
    %830 = tpu.matmul %828, %15, %cst_216 {dimension_numbers = #tpu.dot_dimension_numbers<[1], [0], [0], [1], [0, 0, 1, 1], [], []>} : vector<2x32xbf16>, vector<32x96xbf16>, vector<2x96xf32> -> vector<2x96xf32>
    %831 = arith.addf %829, %830 : vector<2x96xf32>
    %832 = vector.broadcast %17 : vector<1x96xf32> to vector<2x96xf32>
    %833 = arith.addf %831, %832 : vector<2x96xf32>
    %cst_217 = arith.constant dense<0.000000e+00> : vector<2x96xf32>
    %834 = tpu.matmul %796, %16, %cst_217 {dimension_numbers = #tpu.dot_dimension_numbers<[1], [0], [0], [1], [0, 0, 1, 1], [], []>} : vector<2x32xbf16>, vector<32x96xbf16>, vector<2x96xf32> -> vector<2x96xf32>
    %835 = vector.broadcast %18 : vector<1x96xf32> to vector<2x96xf32>
    %836 = arith.addf %834, %835 : vector<2x96xf32>
    %837 = arith.addf %833, %836 : vector<2x96xf32>
    %838 = vector.extract_strided_slice %837 {offsets = [0, 0], sizes = [2, 32], strides = [1, 1]} : vector<2x96xf32> to vector<2x32xf32>
    %839 = arith.negf %838 : vector<2x32xf32>
    %840 = math.exp %839 : vector<2x32xf32>
    %cst_218 = arith.constant 1.000000e+00 : f32
    %841 = vector.broadcast %cst_218 : f32 to vector<2x32xf32>
    %842 = arith.addf %841, %840 : vector<2x32xf32>
    %843 = arith.divf %841, %842 : vector<2x32xf32>
    %844 = vector.extract_strided_slice %837 {offsets = [0, 32], sizes = [2, 32], strides = [1, 1]} : vector<2x96xf32> to vector<2x32xf32>
    %845 = arith.negf %844 : vector<2x32xf32>
    %846 = math.exp %845 : vector<2x32xf32>
    %cst_219 = arith.constant 1.000000e+00 : f32
    %847 = vector.broadcast %cst_219 : f32 to vector<2x32xf32>
    %848 = arith.addf %847, %846 : vector<2x32xf32>
    %849 = arith.divf %847, %848 : vector<2x32xf32>
    %850 = vector.extract_strided_slice %833 {offsets = [0, 64], sizes = [2, 32], strides = [1, 1]} : vector<2x96xf32> to vector<2x32xf32>
    %851 = vector.extract_strided_slice %836 {offsets = [0, 64], sizes = [2, 32], strides = [1, 1]} : vector<2x96xf32> to vector<2x32xf32>
    %852 = arith.mulf %843, %851 : vector<2x32xf32>
    %853 = arith.addf %850, %852 : vector<2x32xf32>
    %854 = math.tanh %853 : vector<2x32xf32>
    %cst_220 = arith.constant 1.000000e+00 : f32
    %855 = vector.broadcast %cst_220 : f32 to vector<2x32xf32>
    %856 = arith.subf %855, %849 : vector<2x32xf32>
    %857 = arith.mulf %856, %854 : vector<2x32xf32>
    %858 = arith.mulf %849, %763 : vector<2x32xf32>
    %859 = arith.addf %857, %858 : vector<2x32xf32>
    %860 = arith.truncf %859 : vector<2x32xf32> to vector<2x32xbf16>
    %cst_221 = arith.constant dense<0.000000e+00> : vector<2x32xf32>
    %861 = tpu.matmul %860, %19, %cst_221 {dimension_numbers = #tpu.dot_dimension_numbers<[1], [0], [0], [1], [0, 0, 1, 1], [], []>} : vector<2x32xbf16>, vector<32x32xbf16>, vector<2x32xf32> -> vector<2x32xf32>
    %862 = vector.broadcast %20 : vector<1x32xf32> to vector<2x32xf32>
    %863 = arith.addf %861, %862 : vector<2x32xf32>
    %cst_222 = arith.constant dense<0xFF800000> : vector<2xf32>
    %864 = vector.multi_reduction <maximumf>, %863, %cst_222 [1] : vector<2x32xf32> to vector<2xf32>
    %865 = vector.shape_cast %864 : vector<2xf32> to vector<2x1xf32>
    %866 = vector.broadcast %865 : vector<2x1xf32> to vector<2x32xf32>
    %867 = arith.subf %863, %866 : vector<2x32xf32>
    %868 = math.exp %867 : vector<2x32xf32>
    %cst_223 = arith.constant dense<0.000000e+00> : vector<2xf32>
    %869 = vector.multi_reduction <add>, %868, %cst_223 [1] : vector<2x32xf32> to vector<2xf32>
    %870 = vector.shape_cast %869 : vector<2xf32> to vector<2x1xf32>
    %871 = math.log %870 : vector<2x1xf32>
    %872 = arith.addf %871, %865 : vector<2x1xf32>
    %873 = vector.broadcast %872 : vector<2x1xf32> to vector<2x32xf32>
    %874 = arith.subf %863, %873 : vector<2x32xf32>
    %c8 = arith.constant 8 : index
    %c0_224 = arith.constant 0 : index
    %c0_225 = arith.constant 0 : index
    %875 = vector.load %arg17[%c8, %c0_224, %c0_225] : memref<10x2x32xf32, #tpu.memory_space<vmem>>, vector<1x2x32xf32>
    %876 = vector.shape_cast %875 : vector<1x2x32xf32> to vector<2x32xf32>
    %877 = vector.shape_cast %874 : vector<2x32xf32> to vector<1x2x32xf32>
    tpu.vector_store %arg17[%c8, %c0_224, %c0_225], %877 {strides = array<i32>} : memref<10x2x32xf32, #tpu.memory_space<vmem>>, vector<1x2x32xf32>,
    %c8_226 = arith.constant 8 : index
    %c0_227 = arith.constant 0 : index
    %c0_228 = arith.constant 0 : index
    %878 = vector.load %arg18[%c8_226, %c0_227, %c0_228] : memref<10x2x8xf32, #tpu.memory_space<vmem>>, vector<1x2x8xf32>
    %879 = vector.shape_cast %878 : vector<1x2x8xf32> to vector<2x8xf32>
    %880 = vector.shape_cast %821 : vector<2x8xf32> to vector<1x2x8xf32>
    tpu.vector_store %arg18[%c8_226, %c0_227, %c0_228], %880 {strides = array<i32>} : memref<10x2x8xf32, #tpu.memory_space<vmem>>, vector<1x2x8xf32>,
    %881 = vector.broadcast %865 : vector<2x1xf32> to vector<2x32xf32>
    %882 = arith.cmpf oeq, %863, %881 : vector<2x32xf32>
    %c32_i32_229 = arith.constant 32 : i32
    %883 = vector.broadcast %c32_i32_229 : i32 to vector<2x32xi32>
    %884 = arith.select %882, %0, %883 : vector<2x32xi1>, vector<2x32xi32>
    %cst_230 = arith.constant dense<2147483647> : vector<2xi32>
    %885 = vector.multi_reduction <minsi>, %884, %cst_230 [1] : vector<2x32xi32> to vector<2xi32>
    %886 = vector.shape_cast %885 : vector<2xi32> to vector<2x1xi32>
    %887 = vector.broadcast %886 : vector<2x1xi32> to vector<2x32xi32>
    %888 = arith.cmpi eq, %0, %887 : vector<2x32xi32>
    %889 = arith.extui %888 : vector<2x32xi1> to vector<2x32xi32>
    %890 = arith.sitofp %889 : vector<2x32xi32> to vector<2x32xf32>
    %891 = arith.truncf %890 : vector<2x32xf32> to vector<2x32xbf16>
    %892 = arith.truncf %859 : vector<2x32xf32> to vector<2x32xbf16>
    %cst_231 = arith.constant dense<0.000000e+00> : vector<2x32xf32>
    %893 = tpu.matmul %891, %9, %cst_231 {dimension_numbers = #tpu.dot_dimension_numbers<[1], [0], [0], [1], [0, 0, 1, 1], [], []>} : vector<2x32xbf16>, vector<32x32xbf16>, vector<2x32xf32> -> vector<2x32xf32>
    %cst_232 = arith.constant dense<0.000000e+00> : vector<2x32xf32>
    %894 = tpu.matmul %892, %10, %cst_232 {dimension_numbers = #tpu.dot_dimension_numbers<[1], [0], [0], [1], [0, 0, 1, 1], [], []>} : vector<2x32xbf16>, vector<32x32xbf16>, vector<2x32xf32> -> vector<2x32xf32>
    %895 = vector.broadcast %11 : vector<1x32xf32> to vector<2x32xf32>
    %896 = arith.addf %894, %895 : vector<2x32xf32>
    %897 = vector.shape_cast %896 : vector<2x32xf32> to vector<2x1x32xf32>
    %898 = arith.extf %8 : vector<2x8x32xbf16> to vector<2x8x32xf32>
    %899 = vector.broadcast %897 : vector<2x1x32xf32> to vector<2x8x32xf32>
    %900 = arith.addf %899, %898 : vector<2x8x32xf32>
    %901 = math.tanh %900 : vector<2x8x32xf32>
    %902 = vector.shape_cast %12 : vector<1x32xf32> to vector<1x1x32xf32>
    %903 = vector.broadcast %902 : vector<1x1x32xf32> to vector<2x8x32xf32>
    %904 = arith.mulf %901, %903 : vector<2x8x32xf32>
    %cst_233 = arith.constant dense<0.000000e+00> : vector<2x8xf32>
    %905 = vector.multi_reduction <add>, %904, %cst_233 [2] : vector<2x8x32xf32> to vector<2x8xf32>
    %906 = vector.broadcast %13 : vector<1x1xf32> to vector<2x8xf32>
    %907 = arith.addf %905, %906 : vector<2x8xf32>
    %cst_234 = arith.constant dense<0xFF800000> : vector<2xf32>
    %908 = vector.multi_reduction <maximumf>, %907, %cst_234 [1] : vector<2x8xf32> to vector<2xf32>
    %909 = vector.shape_cast %908 : vector<2xf32> to vector<2x1xf32>
    %910 = vector.broadcast %909 : vector<2x1xf32> to vector<2x8xf32>
    %911 = arith.subf %907, %910 : vector<2x8xf32>
    %912 = math.exp %911 : vector<2x8xf32>
    %cst_235 = arith.constant dense<0.000000e+00> : vector<2xf32>
    %913 = vector.multi_reduction <add>, %912, %cst_235 [1] : vector<2x8xf32> to vector<2xf32>
    %914 = vector.shape_cast %913 : vector<2xf32> to vector<2x1xf32>
    %915 = tpu.reciprocal %914 {approx = true} : vector<2x1xf32> -> vector<2x1xf32>
    %916 = vector.broadcast %915 : vector<2x1xf32> to vector<2x8xf32>
    %917 = arith.mulf %912, %916 : vector<2x8xf32>
    %918 = vector.shape_cast %917 : vector<2x8xf32> to vector<2x8x1xf32>
    %919 = arith.extf %1 : vector<2x8x32xbf16> to vector<2x8x32xf32>
    %920 = vector.broadcast %918 : vector<2x8x1xf32> to vector<2x8x32xf32>
    %921 = arith.mulf %920, %919 : vector<2x8x32xf32>
    %cst_236 = arith.constant dense<0.000000e+00> : vector<2x32xf32>
    %922 = vector.multi_reduction <add>, %921, %cst_236 [1] : vector<2x8x32xf32> to vector<2x32xf32>
    %923 = arith.truncf %893 : vector<2x32xf32> to vector<2x32xbf16>
    %924 = arith.truncf %922 : vector<2x32xf32> to vector<2x32xbf16>
    %cst_237 = arith.constant dense<0.000000e+00> : vector<2x96xf32>
    %925 = tpu.matmul %923, %14, %cst_237 {dimension_numbers = #tpu.dot_dimension_numbers<[1], [0], [0], [1], [0, 0, 1, 1], [], []>} : vector<2x32xbf16>, vector<32x96xbf16>, vector<2x96xf32> -> vector<2x96xf32>
    %cst_238 = arith.constant dense<0.000000e+00> : vector<2x96xf32>
    %926 = tpu.matmul %924, %15, %cst_238 {dimension_numbers = #tpu.dot_dimension_numbers<[1], [0], [0], [1], [0, 0, 1, 1], [], []>} : vector<2x32xbf16>, vector<32x96xbf16>, vector<2x96xf32> -> vector<2x96xf32>
    %927 = arith.addf %925, %926 : vector<2x96xf32>
    %928 = vector.broadcast %17 : vector<1x96xf32> to vector<2x96xf32>
    %929 = arith.addf %927, %928 : vector<2x96xf32>
    %cst_239 = arith.constant dense<0.000000e+00> : vector<2x96xf32>
    %930 = tpu.matmul %892, %16, %cst_239 {dimension_numbers = #tpu.dot_dimension_numbers<[1], [0], [0], [1], [0, 0, 1, 1], [], []>} : vector<2x32xbf16>, vector<32x96xbf16>, vector<2x96xf32> -> vector<2x96xf32>
    %931 = vector.broadcast %18 : vector<1x96xf32> to vector<2x96xf32>
    %932 = arith.addf %930, %931 : vector<2x96xf32>
    %933 = arith.addf %929, %932 : vector<2x96xf32>
    %934 = vector.extract_strided_slice %933 {offsets = [0, 0], sizes = [2, 32], strides = [1, 1]} : vector<2x96xf32> to vector<2x32xf32>
    %935 = arith.negf %934 : vector<2x32xf32>
    %936 = math.exp %935 : vector<2x32xf32>
    %cst_240 = arith.constant 1.000000e+00 : f32
    %937 = vector.broadcast %cst_240 : f32 to vector<2x32xf32>
    %938 = arith.addf %937, %936 : vector<2x32xf32>
    %939 = arith.divf %937, %938 : vector<2x32xf32>
    %940 = vector.extract_strided_slice %933 {offsets = [0, 32], sizes = [2, 32], strides = [1, 1]} : vector<2x96xf32> to vector<2x32xf32>
    %941 = arith.negf %940 : vector<2x32xf32>
    %942 = math.exp %941 : vector<2x32xf32>
    %cst_241 = arith.constant 1.000000e+00 : f32
    %943 = vector.broadcast %cst_241 : f32 to vector<2x32xf32>
    %944 = arith.addf %943, %942 : vector<2x32xf32>
    %945 = arith.divf %943, %944 : vector<2x32xf32>
    %946 = vector.extract_strided_slice %929 {offsets = [0, 64], sizes = [2, 32], strides = [1, 1]} : vector<2x96xf32> to vector<2x32xf32>
    %947 = vector.extract_strided_slice %932 {offsets = [0, 64], sizes = [2, 32], strides = [1, 1]} : vector<2x96xf32> to vector<2x32xf32>
    %948 = arith.mulf %939, %947 : vector<2x32xf32>
    %949 = arith.addf %946, %948 : vector<2x32xf32>
    %950 = math.tanh %949 : vector<2x32xf32>
    %cst_242 = arith.constant 1.000000e+00 : f32
    %951 = vector.broadcast %cst_242 : f32 to vector<2x32xf32>
    %952 = arith.subf %951, %945 : vector<2x32xf32>
    %953 = arith.mulf %952, %950 : vector<2x32xf32>
    %954 = arith.mulf %945, %859 : vector<2x32xf32>
    %955 = arith.addf %953, %954 : vector<2x32xf32>
    %956 = arith.truncf %955 : vector<2x32xf32> to vector<2x32xbf16>
    %cst_243 = arith.constant dense<0.000000e+00> : vector<2x32xf32>
    %957 = tpu.matmul %956, %19, %cst_243 {dimension_numbers = #tpu.dot_dimension_numbers<[1], [0], [0], [1], [0, 0, 1, 1], [], []>} : vector<2x32xbf16>, vector<32x32xbf16>, vector<2x32xf32> -> vector<2x32xf32>
    %958 = vector.broadcast %20 : vector<1x32xf32> to vector<2x32xf32>
    %959 = arith.addf %957, %958 : vector<2x32xf32>
    %cst_244 = arith.constant dense<0xFF800000> : vector<2xf32>
    %960 = vector.multi_reduction <maximumf>, %959, %cst_244 [1] : vector<2x32xf32> to vector<2xf32>
    %961 = vector.shape_cast %960 : vector<2xf32> to vector<2x1xf32>
    %962 = vector.broadcast %961 : vector<2x1xf32> to vector<2x32xf32>
    %963 = arith.subf %959, %962 : vector<2x32xf32>
    %964 = math.exp %963 : vector<2x32xf32>
    %cst_245 = arith.constant dense<0.000000e+00> : vector<2xf32>
    %965 = vector.multi_reduction <add>, %964, %cst_245 [1] : vector<2x32xf32> to vector<2xf32>
    %966 = vector.shape_cast %965 : vector<2xf32> to vector<2x1xf32>
    %967 = math.log %966 : vector<2x1xf32>
    %968 = arith.addf %967, %961 : vector<2x1xf32>
    %969 = vector.broadcast %968 : vector<2x1xf32> to vector<2x32xf32>
    %970 = arith.subf %959, %969 : vector<2x32xf32>
    %c9 = arith.constant 9 : index
    %c0_246 = arith.constant 0 : index
    %c0_247 = arith.constant 0 : index
    %971 = vector.load %arg17[%c9, %c0_246, %c0_247] : memref<10x2x32xf32, #tpu.memory_space<vmem>>, vector<1x2x32xf32>
    %972 = vector.shape_cast %971 : vector<1x2x32xf32> to vector<2x32xf32>
    %973 = vector.shape_cast %970 : vector<2x32xf32> to vector<1x2x32xf32>
    tpu.vector_store %arg17[%c9, %c0_246, %c0_247], %973 {strides = array<i32>} : memref<10x2x32xf32, #tpu.memory_space<vmem>>, vector<1x2x32xf32>,
    %c9_248 = arith.constant 9 : index
    %c0_249 = arith.constant 0 : index
    %c0_250 = arith.constant 0 : index
    %974 = vector.load %arg18[%c9_248, %c0_249, %c0_250] : memref<10x2x8xf32, #tpu.memory_space<vmem>>, vector<1x2x8xf32>
    %975 = vector.shape_cast %974 : vector<1x2x8xf32> to vector<2x8xf32>
    %976 = vector.shape_cast %917 : vector<2x8xf32> to vector<1x2x8xf32>
    tpu.vector_store %arg18[%c9_248, %c0_249, %c0_250], %976 {strides = array<i32>} : memref<10x2x8xf32, #tpu.memory_space<vmem>>, vector<1x2x8xf32>,
    %c0_251 = arith.constant 0 : index
    %c0_252 = arith.constant 0 : index
    %977 = vector.load %arg19[%c0_251, %c0_252] : memref<2x32xf32, #tpu.memory_space<vmem>>, vector<2x32xf32>
    tpu.vector_store %arg19[%c0_251, %c0_252], %955 {strides = array<i32>} : memref<2x32xf32, #tpu.memory_space<vmem>>, vector<2x32xf32>,
    return
  }
}

</mosaic_0001>

<bundles_post_ra>
// kernel: tpu_custom_call.1
= control target key start
LH: loop header
LB: loop body
LE: loop exit
PB: predicated region body
PF: predicated region fallthrough
CT: control target
= control target key end

     0   :  { %s5179_s0 = inlined_call_operand.<no memory space> [shape: s32[1], index: 0, kind: input, shape index: {}]   ;;  %s5180_s1 = inlined_call_operand.hbm [shape: bf16[2,8,32], index: 1, kind: input, shape index: {}]   ;;  %s5181_s2 = inlined_call_operand.hbm [shape: f32[2,32], index: 2, kind: input, shape index: {}]   ;;  %s5182_s3 = inlined_call_operand.hbm [shape: bf16[32,32], index: 3, kind: input, shape index: {}]   ;;  %s5183_s4 = inlined_call_operand.hbm [shape: bf16[32,32], index: 4, kind: input, shape index: {}]   ;;  %s5184_s5 = inlined_call_operand.hbm [shape: f32[1,32], index: 5, kind: input, shape index: {}]   ;;  %s5185_s6 = inlined_call_operand.hbm [shape: bf16[32,32], index: 6, kind: input, shape index: {}]   ;;  %s5186_s7 = inlined_call_operand.hbm [shape: f32[1,32], index: 7, kind: input, shape index: {}]   ;;  %s5187_s8 = inlined_call_operand.hbm [shape: f32[1,32], index: 8, kind: input, shape index: {}]   ;;  %s5188_s9 = inlined_call_operand.<no memory space> [shape: f32[1,1], index: 9, kind: input, shape index: {}]   ;;  %s5189_s10 = inlined_call_operand.hbm [shape: bf16[32,96], index: 10, kind: input, shape index: {}]   ;;  %s5190_s11 = inlined_call_operand.hbm [shape: bf16[32,96], index: 11, kind: input, shape index: {}]   ;;  %s5191_s12 = inlined_call_operand.hbm [shape: bf16[32,96], index: 12, kind: input, shape index: {}]   ;;  %s5192_s13 = inlined_call_operand.hbm [shape: f32[1,96], index: 13, kind: input, shape index: {}]   ;;  %s5193_s14 = inlined_call_operand.hbm [shape: f32[1,96], index: 14, kind: input, shape index: {}]   ;;  %s5194_s15 = inlined_call_operand.vmem [shape: bf16[32,32], index: 15, kind: input, shape index: {}]   ;;  %s5195_s16 = inlined_call_operand.vmem [shape: f32[1,32], index: 16, kind: input, shape index: {}]   ;;  %s5196_s17 = inlined_call_operand.hbm [shape: f32[10,2,32], index: 17, kind: output, shape index: {0}]   ;;  %s5197_s18 = inlined_call_operand.vmem [shape: f32[10,2,8], index: 18, kind: output, shape index: {1}]   ;;  %s5198_s19 = inlined_call_operand.hbm [shape: f32[2,32], index: 19, kind: output, shape index: {2}]  }
   0x1   :  { %5199 = sst [smem:[#allocation37_spill]] %s5179_s0  ;;  %v26_v0 = vstv %s5188_s9 }
   0x2   :  { %5200 = sst [smem:[#allocation38_spill]] %s5180_s1  ;;  %27 = vst [vmem:[#allocation3] sm:$0x1] %v26_v0 }
   0x3   :  { %5201 = sst [smem:[#allocation39_spill]] %s5181_s2 }
   0x4   :  { %5202 = sst [smem:[#allocation40_spill]] %s5182_s3 }
   0x5   :  { %28 = vsyncpa [#allocation5], 0 }
   0x6   :  { %29 = vsyncpa [#allocation8], 0 }
   0x7   :  { %30 = vsyncpa [#allocation11], 0 }
   0x8   :  { %31 = vsyncpa [#allocation14], 0 }
   0x9   :  { %32 = vsyncpa [#allocation17], 0 }
   0xa   :  { %33 = vsyncpa [#allocation20], 0 }
   0xb   :  { %34 = vsyncpa [#allocation23], 0 }
   0xc   :  { %35 = vsyncpa [#allocation6], 0  ;;  %s5203_s1 = sld [smem:[#allocation39_spill]] }
  0x12   :  { %s57_s22 = sshll.u32 %s5203_s1, 4  ;;  %s58_s22 = int_to_ptr.hbm [resolvable:$true] %s57_s22 }
  0x13   :  { %36 = vsyncpa [#allocation27], 0  ;;  %s4030_s2 = smov [#allocation7]   ;;  %s80_s25 = sshll.u32 %s5183_s4, 4  ;;  %s81_s25 = int_to_ptr.hbm [resolvable:$true] %s80_s25 }
  0x14   :  { %s59_s23 = sshll.u32 %s4030_s2, 4  ;;  %s4031_s3 = smov [#allocation10]   ;;  %s60_s23 = int_to_ptr.vmem [resolvable:$true] %s59_s23 }
  0x15   :  { %62 = dma.hbm_to_vmem [thread:$0]  %s58_s22, 32, %s60_s23, [#allocation8]  }
  0x16   :  { %s82_s26 = sshll.u32 %s4031_s3, 4  ;;  %s104_s29 = sshll.u32 %s5185_s6, 4  ;;  %s83_s26 = int_to_ptr.vmem [resolvable:$true] %s82_s26  ;;  %s105_s29 = int_to_ptr.hbm [resolvable:$true] %s104_s29 }
  0x17   :  { %s4032_s0 = smov 64   ;;  %s4033_s30 = smov 4  }
  0x18   :  { %88 = dma.hbm_to_vmem [thread:$0]  %s81_s25, 256, %s83_s26, [#allocation11], %s4032_s0, %s4032_s0, %s4033_s30  }
  0x19   :  { %s129_s1 = sshll.u32 %s5187_s8, 4  ;;  %s4034_s4 = smov [#allocation13]   ;;  %s130_s1 = int_to_ptr.hbm [resolvable:$true] %s129_s1 }
  0x1a   :  { %s106_s22 = sshll.u32 %s4034_s4, 4  ;;  %s4035_s6 = smov [#allocation16]   ;;  %s107_s22 = int_to_ptr.vmem [resolvable:$true] %s106_s22 }
  0x1b   :  { %112 = dma.hbm_to_vmem [thread:$0]  %s105_s29, 256, %s107_s22, [#allocation14], %s4032_s0, %s4032_s0, %s4033_s30  }
  0x1c   :  { %s131_s2 = sshll.u32 %s4035_s6, 4  ;;  %s154_s24 = sshll.u32 %s5190_s11, 4  ;;  %s132_s2 = int_to_ptr.vmem [resolvable:$true] %s131_s2  ;;  %s155_s24 = int_to_ptr.hbm [resolvable:$true] %s154_s24 }
  0x1d   :  { %134 = dma.hbm_to_vmem [thread:$0]  %s130_s1, 16, %s132_s2, [#allocation17]  }
  0x1e   :  { %s181_s8 = sshll.u32 %s5192_s13, 4  ;;  %s4036_s26 = smov [#allocation19]   ;;  %s182_s8 = int_to_ptr.hbm [resolvable:$true] %s181_s8 }
  0x1f   :  { %s156_s27 = sshll.u32 %s4036_s26, 4  ;;  %s4037_s28 = smov [#allocation22]   ;;  %s157_s27 = int_to_ptr.vmem [resolvable:$true] %s156_s27 }
  0x20   :  { %162 = dma.hbm_to_vmem [thread:$0]  %s155_s24, 256, %s157_s27, [#allocation20], %s4032_s0, %s4032_s0, %s4033_s30  }
  0x21   :  { %s183_s29 = sshll.u32 %s4037_s28, 4  ;;  %s5204_s11 = sld [smem:[#allocation38_spill]]  ;;  %s184_s29 = int_to_ptr.vmem [resolvable:$true] %s183_s29 }
  0x22   :  { %186 = dma.hbm_to_vmem [thread:$0]  %s182_s8, 16, %s184_s29, [#allocation23]  }
  0x23   :  { %s5205_s13 = sld [smem:[#allocation40_spill]]  ;;  %s4038_s2 = smov [#allocation4]  }
  0x24   :  { %s45_s23 = sshll.u32 %s4038_s2, 4  ;;  %s4039_s9 = smov [#allocation9]   ;;  %s46_s23 = int_to_ptr.vmem [resolvable:$true] %s45_s23 }
  0x25   :  { %s69_s24 = sshll.u32 %s4039_s9, 4  ;;  %s94_s26 = sshll.u32 %s5184_s5, 4  ;;  %s70_s24 = int_to_ptr.vmem [resolvable:$true] %s69_s24  ;;  %s95_s26 = int_to_ptr.hbm [resolvable:$true] %s94_s26 }
  0x26   :  { %s118_s28 = sshll.u32 %s5186_s7, 4  ;;  %s4040_s29 = smov [#allocation12]   ;;  %s119_s28 = int_to_ptr.hbm [resolvable:$true] %s118_s28 }
  0x27   :  { %s43_s4 = sshll.u32 %s5204_s11, 4  ;;  %s96_s20 = sshll.u32 %s4040_s29, 4  ;;  %s44_s4 = int_to_ptr.hbm [resolvable:$true] %s43_s4  ;;  %s97_s20 = int_to_ptr.vmem [resolvable:$true] %s96_s20 }
  0x28   :  { %51 = dma.hbm_to_vmem [thread:$0]  %s44_s4, 128, %s46_s23, [#allocation5], %s4032_s0, %s4032_s0, %s4033_s30  }
  0x29   :  { %s67_s6 = sshll.u32 %s5205_s13, 4  ;;  %s4041_s21 = smov [#allocation15]   ;;  %s68_s6 = int_to_ptr.hbm [resolvable:$true] %s67_s6 }
  0x2a   :  { %75 = dma.hbm_to_vmem [thread:$0]  %s68_s6, 256, %s70_s24, [#allocation8], %s4032_s0, %s4032_s0, %s4033_s30  }
  0x2b   :  { %99 = dma.hbm_to_vmem [thread:$0]  %s95_s26, 16, %s97_s20, [#allocation11]  }
  0x2c   :  { %s120_s11 = sshll.u32 %s4041_s21, 4  ;;  %s141_s5 = sshll.u32 %s5189_s10, 4  ;;  %s121_s11 = int_to_ptr.vmem [resolvable:$true] %s120_s11  ;;  %s142_s5 = int_to_ptr.hbm [resolvable:$true] %s141_s5 }
  0x2d   :  { %123 = dma.hbm_to_vmem [thread:$0]  %s119_s28, 16, %s121_s11, [#allocation14]  }
  0x2e   :  { %s167_s6 = sshll.u32 %s5191_s12, 4  ;;  %s4042_s2 = smov [#allocation18]   ;;  %s168_s6 = int_to_ptr.hbm [resolvable:$true] %s167_s6 }
  0x2f   :  { %s143_s7 = sshll.u32 %s4042_s2, 4  ;;  %s4043_s23 = smov [#allocation21]   ;;  %s144_s7 = int_to_ptr.vmem [resolvable:$true] %s143_s7 }
  0x30   :  { %149 = dma.hbm_to_vmem [thread:$0]  %s142_s5, 256, %s144_s7, [#allocation17], %s4032_s0, %s4032_s0, %s4033_s30  }
  0x31   :  { %s169_s9 = sshll.u32 %s4043_s23, 4  ;;  %s192_s10 = sshll.u32 %s5193_s14, 4  ;;  %s170_s9 = int_to_ptr.vmem [resolvable:$true] %s169_s9  ;;  %s193_s10 = int_to_ptr.hbm [resolvable:$true] %s192_s10 }
  0x32   :  { %175 = dma.hbm_to_vmem [thread:$0]  %s168_s6, 256, %s170_s9, [#allocation20], %s4032_s0, %s4032_s0, %s4033_s30  }
  0x33   :  { %s4044_s12 = smov [#allocation24]  }
  0x34   :  { %s194_s3 = sshll.u32 %s4044_s12, 4  ;;  %s195_s3 = int_to_ptr.vmem [resolvable:$true] %s194_s3 }
  0x35   :  { %197 = dma.hbm_to_vmem [thread:$0]  %s193_s10, 16, %s195_s3, [#allocation23]  }
  0x36   :  { %4012 = dma.done.wait [#allocation5], 128  }
  0x37   :  { %4013 = vsyncadd [#allocation5], 4294967168 }
  0x38   :  { %4014 = dma.done.wait [#allocation8], 288  }
  0x39   :  { %4015 = vsyncadd [#allocation8], 4294967008 }
  0x3a   :  { %4016 = dma.done.wait [#allocation11], 272  }
  0x3b   :  { %4017 = vsyncadd [#allocation11], 4294967024 }
  0x3c   :  { %4018 = dma.done.wait [#allocation14], 272  }
  0x3d   :  { %4019 = vsyncadd [#allocation14], 4294967024 }
  0x3e   :  { %4020 = dma.done.wait [#allocation17], 272  }
  0x3f   :  { %4021 = vsyncadd [#allocation17], 4294967024 }
  0x40   :  { %4022 = dma.done.wait [#allocation20], 512  }
  0x41   :  { %4023 = vsyncadd [#allocation20], 4294966784 }
  0x42   :  { %4024 = dma.done.wait [#allocation23], 32  }
  0x43   :  { %4025 = vsyncadd [#allocation23], 4294967264  ;;  %v3368_v1 = vld [vmem:[#allocation13 + $0x8] sm:$0xff]  ;;  %v4215_v2 = vld [vmem:[#allocation10 + $0x8] sm:$0xff]  ;;  %vm284_vm0 = vcmask 261120   ;;  %v4045_v8 = vmov 0   ;;  %v255_v36 = vlaneseq }
  0x44   :  { %v3367_v3 = vld [vmem:[#allocation13] sm:$0xff]  ;;  %v4217_v4 = vld [vmem:[#allocation10] sm:$0xff]  ;;  %294 = vmatpush.bf16.msra.mxu0 %v3368_v1  ;;  %394 = vmatpush.bf16.msra.mxu2 %v4215_v2  ;;  %v4220_v5 = vld [vmem:[#allocation7] sm:$0x3]  ;;  %vm436_vm1 = vcmask 1041409   ;;  %vm439_vm2 = vcmask 58368  }
  0x45   :  { %v3366_v6 = vld [vmem:[#allocation4] sm:$0xff]  ;;  %v4224_v7 = vpack.c.bf16 %v4220_v5, %v4220_v5  ;;  %3403 = vset.pattern.permute.xlu1 %v4045_v8  ;;  %3404 = vset.pattern.permute.xlu2 %v4045_v8  ;;  %v3409_v9 = vld [vmem:[#allocation3] ss:$0 sm:$0xff]  ;;  %v3406_v10 = vld [vmem:[#allocation15] ss:$0 sm:$0xff]  ;;  %v4247_v38 = vand.u32 127, %v255_v36 }
  0x46   :  { %3405 = vset.pattern.permute.xlu0 %v4045_v8  ;;  %427 = vperm.xlu1 %3403, %v3409_v9   ;;  %v4230_v14 = vld [vmem:[#allocation12] ss:$0 sm:$0xff]  ;;  %v4239_v28 = vld [vmem:[#allocation16] ss:$0 sm:$0xff]  ;;  %v4259_v61 = vld [vmem:[#allocation9 + $0x8] sm:$0xff]  ;;  %s5206_s26 = sld [smem:[#allocation37_spill]] }
  0x47   :  { %363 = vmatpush.bf16.msra.mxu1 %v4259_v61  ;;  %v4262_v62 = vld [vmem:[#allocation9] sm:$0xff]  ;;  %v4046_v1 = vmov 0.0   ;;  %v4273_v8 = vld [vmem:[#allocation21] sm:$0xff]  ;;  %s4047_s28 = smov 96   ;;  %s4048_s29 = smov 32   ;;  %vm680_vm8 = vcmask 254976  }
  0x48   :  { %295 = vmatpush.bf16.msra.mxu0 %v3367_v3  ;;  %395 = vmatpush.bf16.msra.mxu2 %v4217_v4  ;;  %v4267_v0 = vld [vmem:[#allocation21 + $0x8] sm:$0xff]  ;;  %s3193_s25 = sshll.u32 %s5198_s19, 4  ;;  %s4050_s19 = smov [#allocation25]   ;;  %s3194_s25 = int_to_ptr.hbm [resolvable:$true] %s3193_s25 }
  0x49   :  { %s3175_s10 = sshll.u32 %s4050_s19, 4  ;;  %s3177_s14 = sshll.u32 %s5196_s17, 4  ;;  %s3176_s10 = int_to_ptr.vmem [resolvable:$true] %s3175_s10  ;;  %s3178_s14 = int_to_ptr.hbm [resolvable:$true] %s3177_s14 }
  0x4a   :  { %s4051_s30 = smov 2  }
  0x4b   :  { %3228 = vmatmul.msk.bf16.vlgmr.msra.gmra.mxu0 %vm284_vm0, %v3366_v6  ;;  %3247 = vmatmul.msk.bf16.vlgmr.msra.gmra.mxu2 %vm284_vm0, %v4224_v7 }
  0x4c   :  { %v336_v63 = vstv %s5206_s26  ;;  %364 = vmatpush.bf16.msra.mxu1 %v4262_v62 }
  0x4d   :  { %vm337_vm3 = vcmp.eq.s32.totalorder %v4247_v38, %v336_v63 }
  0x4e   :  { %v3229_v3 = vsel %vm337_vm3, 1.0, %v4046_v1 }
  0x4f   :  { %v340_v6 = vpack.c.bf16 %v3229_v3, %v3229_v3 }
  0x50   :  { %595 = vmatpush.bf16.msrb.mxu1 %v4267_v0 }
  0x51   :  { %3238 = vmatmul.msk.bf16.vlgmr.msra.gmra.mxu1 %vm284_vm0, %v340_v6  ;;  %v4323_v6 = vld [vmem:[#allocation22] ss:$0 sm:$0xff] }
  0x54   :  { %596 = vmatpush.bf16.msrb.mxu1 %v4273_v8 }
  0x61   :  { %3274 = vmatmul.msk.bf16.vlgmr.msrb.gmra.mxu1 %vm284_vm0, %v4224_v7  ;;  %v4287_v7 = vld [vmem:[#allocation18] sm:$0xff] }
  0xb8   :  { %v4245_v37 = vpop.permute.xlu1 %427 }
  0xc8   :  { %v297_v11 = vpop.f32.mrf.mxu0 }
  0xc9   :  { %v298_v12 = vadd.f32 %v3406_v10, %v297_v11 }
  0xcb   :  { %v302_v13 = vpack.c.bf16 %v298_v12, %v298_v12 }
  0xcd   :  { %v4232_v16 = vunpack.c.l.bf16 %v302_v13 }
  0xce   :  { %v397_v15 = vpop.f32.mrf.mxu2 }
  0xcf   :  { %v398_v17 = vadd.f32 %v4230_v14, %v397_v15 }
  0xd0   :  { %v299_v18 = vpop.f32.mrf.mxu0 }
  0xd1   :  { %v402_v19 = vrot.slane %v398_v17, 1  ;;  %v405_v20 = vperm.slane %v398_v17, 0  ;;  %v300_v21 = vadd.f32 %v3406_v10, %v299_v18  ;;  %v257_v17 = vld [vmem:[#allocation4] sm:$0xff]  }
  0xd2   :  { %v4279_v18 = vunpack.c.l.bf16 %v257_v17 }
  0xd3   :  { %v409_v22 = vadd.f32 %v405_v20, %v4232_v16  ;;  %v303_v23 = vpack.c.bf16 %v300_v21, %v300_v21  ;;  %v406_v24 = vperm.slane %v402_v19, 0  ;;  %v4281_v20 = vld [vmem:[#allocation18 + $0x8] sm:$0xff]  ;;  %v4283_v21 = vld [vmem:[#allocation19 + $0x8] sm:$0xff] }
  0xd4   :  { %563 = vmatpush.bf16.msrb.mxu0 %v4281_v20  ;;  %535 = vmatpush.bf16.msra.mxu3 %v4283_v21 }
  0xd5   :  { %3413 = vtanh.f32 %v409_v22  ;;  %v4236_v25 = vunpack.c.l.bf16 %v303_v23  ;;  %v4289_v22 = vld [vmem:[#allocation19] sm:$0xff]  ;;  %857 = vmatpush.bf16.msra.mxu1 %v4283_v21 }
  0xd6   :  { %v399_v26 = vpop.f32.mrf.mxu2 }
  0xd7   :  { %v410_v27 = vadd.f32 %v406_v24, %v4236_v25  ;;  %v366_v24 = vpop.f32.mrf.mxu1 }
  0xd8   :  { %v505_v26 = vpack.c.bf16 %v366_v24, %v366_v24  ;;  %564 = vmatpush.bf16.msrb.mxu0 %v4287_v7  ;;  %536 = vmatpush.bf16.msra.mxu3 %v4289_v22 }
  0xd9   :  { %3415 = vtanh.f32 %v410_v27  ;;  %858 = vmatpush.bf16.msra.mxu1 %v4289_v22 }
  0xdb   :  { %v3414_v29 = vpop.eup %3413  ;;  %3265 = vmatmul.msk.bf16.vlgmr.msrb.gmra.mxu0 %vm284_vm0, %v505_v26 }
  0xdc   :  { %v416_v30 = vmul.f32 %v3414_v29, %v4239_v28  ;;  %743 = vmatpush.bf16.msra.mxu0 %v4215_v2  ;;  %730 = vmatpush.bf16.msrb.mxu3 %v4259_v61 }
  0xdd   :  { %1004 = vmatpush.bf16.msrb.mxu1 %v4259_v61 }
  0xde   :  { %v418_v31 = vsel %vm284_vm0, %v416_v30, 0.0 }
  0xdf   :  { %v3416_v32 = vpop.eup %3415  ;;  %419 = vadd.xlane.f32.xlu0 %v418_v31  ;;  %v368_v30 = vpop.f32.mrf.mxu1 }
  0xe0   :  { %v417_v33 = vmul.f32 %v3416_v32, %v4239_v28  ;;  %744 = vmatpush.bf16.msra.mxu0 %v4217_v4  ;;  %731 = vmatpush.bf16.msrb.mxu3 %v4262_v62  ;;  %v4304_v32 = vunpack.c.h.bf16 %v257_v17 }
  0xe1   :  { %1005 = vmatpush.bf16.msrb.mxu1 %v4262_v62 }
  0xe2   :  { %v421_v34 = vsel %vm284_vm0, %v417_v33, 0.0  ;;  %v4306_v33 = vld [vmem:[#allocation24] ss:$0 sm:$0xff] }
  0xe7   :  { %422 = vadd.xlane.f32.xlu0 %v421_v34  ;;  %v598_v36 = vpop.f32.mrf.mxu1 }
 0x152   :  { %v420_v35 = vpop.xlane.xlu0 %419 }
 0x153   :  { %v430_v39 = vadd.f32 %v4245_v37, %v420_v35 }
 0x155   :  { %v434_v42 = vperm.slane %v430_v39, %v4247_v38 }
 0x158   :  { %v566_v63 = vpop.f32.mrf.mxu0 }
 0x15a   :  { %v423_v40 = vpop.xlane.xlu0 %422 }
 0x15b   :  { %v431_v41 = vadd.f32 %v4245_v37, %v423_v40 }
 0x15d   :  { %v435_v43 = vperm.slane %v431_v41, %v4247_v38 }
 0x15f   :  { %v437_v44 = vsel %vm436_vm1, %v435_v43, %v434_v42  ;;  %v599_v42 = vadd.f32 %v4306_v33, %v598_v36 }
 0x160   :  { %v440_v45 = vsel %vm439_vm2, %v437_v44, -inf  ;;  %v568_v3 = vpop.f32.mrf.mxu0 }
 0x161   :  { %441 = vmax.xlane.f32.xlu1 %v440_v45 }
 0x1d4   :  { %v442_v46 = vpop.xlane.xlu1 %441 }
 0x1d5   :  { %v444_v47 = vperm.slane %v442_v46, 0  ;;  %v445_v48 = vperm.slane %v442_v46, 1 }
 0x1d7   :  { %v448_v49 = vsub.f32 %v430_v39, %v444_v47  ;;  %v449_v51 = vsub.f32 %v431_v41, %v445_v48 }
 0x1d9   :  { %v450_v50 = vmul.f32 1.442695, %v448_v49  ;;  %v452_v52 = vmul.f32 1.442695, %v449_v51 }
 0x1db   :  { %3417 = vpow2.f32 %v450_v50  ;;  %v600_v50 = vpop.f32.mrf.mxu1 }
 0x1dc   :  { %3419 = vpow2.f32 %v452_v52 }
 0x1e1   :  { %v3418_v53 = vpop.eup %3417 }
 0x1e2   :  { %457 = vperm.xlu2 %3404, %v3418_v53   ;;  %v3420_v54 = vpop.eup %3419 }
 0x1ea   :  { %460 = vperm.xlu2 %3404, %v3420_v54  }
 0x23c   :  { %v458_v55 = vpop.permute.xlu2 %457 }
 0x23d   :  { %v462_v57 = vperm.slane %v458_v55, %v4247_v38 }
 0x244   :  { %v461_v56 = vpop.permute.xlu2 %460 }
 0x245   :  { %v463_v58 = vperm.slane %v461_v56, %v4247_v38 }
 0x247   :  { %v464_v59 = vsel %vm436_vm1, %v463_v58, %v462_v57 }
 0x248   :  { %v466_v60 = vsel %vm439_vm2, %v464_v59, 0.0 }
 0x249   :  { %467 = vadd.xlane.f32.xlu0 %v466_v60 }
 0x2bc   :  { %v468_v9 = vpop.xlane.xlu0 %467 }
 0x2bd   :  { %3421 = vrcp.f32 %v468_v9 }
 0x2c3   :  { %v3422_v10 = vpop.eup %3421 }
 0x2c4   :  { %v472_v11 = vperm.slane %v3422_v10, 1  ;;  %v471_v12 = vperm.slane %v3422_v10, 0 }
 0x2c6   :  { %v476_v13 = vmul.f32 %v3420_v54, %v472_v11  ;;  %v475_v15 = vmul.f32 %v3418_v53, %v471_v12 }
 0x2c8   :  { %486 = vperm.xlu0 %3405, %v476_v13   ;;  %481 = vperm.xlu2 %3404, %v475_v15  }
 0x2d0   :  { %623 = vrot.lane.b32.xlu2 %v599_v42, %s4032_s0 }
 0x322   :  { %v482_v19 = vpop.permute.xlu2 %481 }
 0x323   :  { %v489_v23 = vmul.f32 %v482_v19, %v4279_v18  ;;  %v695_v39 = vperm.slane %v482_v19, %v4247_v38 }
 0x325   :  { %v491_v27 = vsel %vm284_vm0, %v489_v23, 0.0 }
 0x326   :  { %v492_v29 = vrot.slane %v491_v27, 4 }
 0x328   :  { %v493_v31 = vadd.f32 %v492_v29, %v491_v27 }
 0x32a   :  { %v494_v34 = vrot.slane %v493_v31, 2 }
 0x32c   :  { %v495_v43 = vadd.f32 %v494_v34, %v493_v31  ;;  %v624_v34 = vpop.permute.xlu2 %623 }
 0x32e   :  { %v496_v47 = vrot.slane %v495_v43, 1 }
 0x330   :  { %v497_v52 = vadd.f32 %v496_v47, %v495_v43 }
 0x332   :  { %v506_v55 = vpack.c.bf16 %v497_v52, %v497_v52 }
 0x334   :  { %v510_v57 = vunpack.c.l.b16 %v506_v55 }
 0x33a   :  { %v487_v35 = vpop.permute.xlu0 %486 }
 0x33b   :  { %v490_v40 = vmul.f32 %v487_v35, %v4304_v32  ;;  %v696_v41 = vperm.slane %v487_v35, %v4247_v38 }
 0x33d   :  { %v498_v44 = vsel %vm284_vm0, %v490_v40, 0.0  ;;  %v697_v45 = vsel %vm436_vm1, %v696_v41, %v695_v39 }
 0x33e   :  { %v499_v46 = vrot.slane %v498_v44, 4  ;;  %699 = vst.msk [vmem:[%s5197_s18] sm:$0x3] %vm439_vm2, %v697_v45  ;;  %v4339_v45 = vld [vmem:[%s5194_s15] sm:$0xff] }
 0x340   :  { %v500_v48 = vadd.f32 %v499_v46, %v498_v44  ;;  %v4333_v44 = vld [vmem:[%s5194_s15 + $0x8] sm:$0xff] }
 0x341   :  { %673 = vmatpush.bf16.msrb.mxu2 %v4333_v44  ;;  %946 = vmatpush.bf16.msrb.mxu0 %v4333_v44 }
 0x342   :  { %v501_v49 = vrot.slane %v500_v48, 2 }
 0x344   :  { %v502_v51 = vadd.f32 %v501_v49, %v500_v48 }
 0x345   :  { %674 = vmatpush.bf16.msrb.mxu2 %v4339_v45  ;;  %947 = vmatpush.bf16.msrb.mxu0 %v4339_v45 }
 0x346   :  { %v503_v53 = vrot.slane %v502_v51, 1 }
 0x348   :  { %v504_v54 = vadd.f32 %v503_v53, %v502_v51 }
 0x349   :  { %873 = vmatpush.bf16.msra.mxu2 %v4281_v20 }
 0x34a   :  { %v507_v56 = vpack.c.bf16 %v504_v54, %v504_v54 }
 0x34c   :  { %v511_v58 = vunpack.c.l.b16 %v507_v56 }
 0x34d   :  { %874 = vmatpush.bf16.msra.mxu2 %v4287_v7 }
 0x34e   :  { %v512_v59 = vsel %vm436_vm1, %v511_v58, %v510_v57  ;;  %v4365_v57 = vld [vmem:[%s5195_s16] ss:$0 sm:$0xff] }
 0x34f   :  { %v513_v60 = vpack.c.b16 %v512_v59, %v512_v59 }
 0x351   :  { %3256 = vmatmul.msk.bf16.vlgmr.msra.gmra.mxu3 %vm284_vm0, %v513_v60 }
 0x352   :  { %887 = vmatpush.bf16.msra.mxu3 %v4267_v0 }
 0x356   :  { %888 = vmatpush.bf16.msra.mxu3 %v4273_v8 }
 0x3d4   :  { %v538_v9 = vpop.f32.mrf.mxu3 }
 0x3d5   :  { %v567_v10 = vadd.f32 %v566_v63, %v538_v9 }
 0x3d7   :  { %v573_v11 = vadd.f32 %v4323_v6, %v567_v10 }
 0x3d9   :  { %v602_v12 = vadd.f32 %v599_v42, %v573_v11 }
 0x3db   :  { %v3275_v13 = vmul.f32 -1.442695, %v602_v12 }
 0x3dc   :  { %v540_v15 = vpop.f32.mrf.mxu3 }
 0x3dd   :  { %3423 = vpow2.f32 %v3275_v13 }
 0x3e3   :  { %v3424_v17 = vpop.eup %3423 }
 0x3e4   :  { %v606_v19 = vadd.f32 1.0, %v3424_v17 }
 0x3e6   :  { %3425 = vrcp.f32 %v606_v19  ;;  %v618_v27 = vand.u32 2147483648, %v606_v19  ;;  %v616_v30 = vand.u32 2147483647, %v606_v19  ;;  %vm612_vm5 = vweird.f32 %v606_v19 }
 0x3e8   :  { %v619_v35 = vor.u32 1.1754944e-38, %v618_v27  ;;  %vm617_vm7 = vcmp.eq.f32.partialorder %v616_v30, 8.507059e+37 }
 0x3ec   :  { %v3426_v23 = vpop.eup %3425 }
 0x3ed   :  { %v608_v24 = vmul.f32 %v3426_v23, %v606_v19  ;;  %vm613_vm4 = vweird.f32 %v3426_v23 }
 0x3ee   :  { %vm614_vm6 = vmor %vm612_vm5, %vm613_vm4 }
 0x3ef   :  { %v609_v26 = vsub.f32 1.0, %v608_v24 }
 0x3f1   :  { %v610_v29 = vmul.f32 %v3426_v23, %v609_v26 }
 0x3f3   :  { %v611_v31 = vadd.f32 %v3426_v23, %v610_v29 }
 0x3f5   :  { %v615_v36 = vsel %vm614_vm6, %v3426_v23, %v611_v31 }
 0x3f6   :  { %v620_v39 = vsel %vm617_vm7, %v619_v35, %v615_v36 }
 0x3f7   :  { %v626_v40 = vmul.f32 %v624_v34, %v620_v39  ;;  %v633_v46 = vsub.f32 1.0, %v620_v39 }
 0x3f9   :  { %628 = vrot.lane.b32.xlu2 %v626_v40, %s4032_s0 }
 0x453   :  { %v629_v41 = vpop.permute.xlu2 %628 }
 0x454   :  { %v631_v42 = vadd.f32 %v629_v41, %v573_v11 }
 0x456   :  { %3427 = vtanh.f32 %v631_v42 }
 0x45c   :  { %v3428_v43 = vpop.eup %3427 }
 0x45d   :  { %635 = vrot.lane.b32.xlu2 %v3428_v43, %s4047_s28 }
 0x465   :  { %640 = vrot.lane.b32.xlu2 %v4220_v5, %s4048_s29 }
 0x4b7   :  { %v636_v5 = vpop.permute.xlu2 %635 }
 0x4b8   :  { %v638_v48 = vmul.f32 %v636_v5, %v633_v46 }
 0x4bf   :  { %v641_v47 = vpop.permute.xlu2 %640 }
 0x4c0   :  { %v643_v49 = vmul.f32 %v641_v47, %v620_v39 }
 0x4c2   :  { %v4346_v50 = vadd.f32 %v643_v49, %v638_v48 }
 0x4c4   :  { %v645_v51 = vpack.c.bf16 %v4346_v50, %v4346_v50 }
 0x4c6   :  { %650 = vrot.lane.b32.xlu1 %v645_v51, %s4047_s28 }
 0x538   :  { %v4351_v52 = vpop.permute.xlu1 %650 }
 0x539   :  { %3284 = vmatmul.msk.bf16.vlgmr.msrb.gmra.mxu2 %vm284_vm0, %v4351_v52  ;;  %3287 = vmatmul.msk.bf16.vlgmr.msra.gmra.mxu0 %vm284_vm0, %v4351_v52 }
 0x53a   :  { %1017 = vmatpush.bf16.msrb.mxu2 %v4215_v2  ;;  %1147 = vmatpush.bf16.msra.mxu0 %v4281_v20 }
 0x53e   :  { %1018 = vmatpush.bf16.msrb.mxu2 %v4217_v4  ;;  %1148 = vmatpush.bf16.msra.mxu0 %v4287_v7 }
 0x5b6   :  { %v746_v53 = vpop.f32.mrf.mxu0 }
 0x5b7   :  { %v747_v54 = vadd.f32 %v4230_v14, %v746_v53 }
 0x5b9   :  { %v751_v55 = vrot.slane %v747_v54, 1  ;;  %v752_v56 = vperm.slane %v747_v54, 0 }
 0x5bb   :  { %v753_v58 = vperm.slane %v751_v55, 0  ;;  %v756_v59 = vadd.f32 %v752_v56, %v4232_v16 }
 0x5bc   :  { %v676_v60 = vpop.f32.mrf.mxu2 }
 0x5bd   :  { %v757_v63 = vadd.f32 %v753_v58, %v4236_v25  ;;  %3429 = vtanh.f32 %v756_v59  ;;  %v4370_v3 = vadd.f32 %v4365_v57, %v676_v60 }
 0x5be   :  { %v748_v9 = vpop.f32.mrf.mxu0 }
 0x5bf   :  { %3431 = vtanh.f32 %v757_v63  ;;  %v681_v10 = vsel %vm680_vm8, %v4370_v3, -inf }
 0x5c0   :  { %682 = vmax.xlane.f32.xlu2 %v681_v10 }
 0x5c3   :  { %v3430_v11 = vpop.eup %3429 }
 0x5c4   :  { %v678_v12 = vpop.f32.mrf.mxu2  ;;  %v760_v13 = vmul.f32 %v3430_v11, %v4239_v28 }
 0x5c5   :  { %v3432_v15 = vpop.eup %3431 }
 0x5c6   :  { %v762_v17 = vsel %vm284_vm0, %v760_v13, 0.0  ;;  %v761_v19 = vmul.f32 %v3432_v15, %v4239_v28 }
 0x5c7   :  { %763 = vadd.xlane.f32.xlu0 %v762_v17 }
 0x5c8   :  { %v765_v23 = vsel %vm284_vm0, %v761_v19, 0.0 }
 0x5c9   :  { %766 = vadd.xlane.f32.xlu1 %v765_v23 }
 0x633   :  { %v4378_v24 = vpop.xlane.xlu2 %682 }
 0x634   :  { %vm700_vm9 = vcmp.eq.f32.partialorder %v4370_v3, %v4378_v24 }
 0x635   :  { %v701_v26 = vsel %vm700_vm9, %v4247_v38, 32 }
 0x636   :  { %v702_v27 = vsel %vm680_vm8, %v701_v26, 2147483647 }
 0x637   :  { %v704_v29 = vshra.s32 %v702_v27, 16  ;;  %v703_v43 = vand.u32 65535, %v702_v27 }
 0x639   :  { %v706_v30 = vcvt.s32.f32 %v704_v29  ;;  %v705_v46 = vcvt.s32.f32 %v703_v43 }
 0x63a   :  { %v764_v31 = vpop.xlane.xlu0 %763 }
 0x63b   :  { %v768_v34 = vadd.f32 %v764_v31, %v4245_v37  ;;  %707 = vmin.xlane.f32.xlu2 %v706_v30 }
 0x63c   :  { %v767_v35 = vpop.xlane.xlu1 %766 }
 0x63d   :  { %v769_v36 = vadd.f32 %v767_v35, %v4245_v37  ;;  %v772_v39 = vperm.slane %v768_v34, %v4247_v38 }
 0x63f   :  { %v773_v40 = vperm.slane %v769_v36, %v4247_v38 }
 0x641   :  { %v774_v41 = vsel %vm436_vm1, %v773_v40, %v772_v39 }
 0x642   :  { %v776_v42 = vsel %vm439_vm2, %v774_v41, -inf }
 0x643   :  { %777 = vmax.xlane.f32.xlu2 %v776_v42 }
 0x6ae   :  { %v708_v5 = vpop.xlane.xlu2 %707 }
 0x6af   :  { %vm709_vm10 = vcmp.eq.f32.partialorder %v706_v30, %v708_v5  ;;  %v714_v60 = vcvt.f32.s32 %v708_v5 }
 0x6b0   :  { %v710_v47 = vsel %vm709_vm10, %v705_v46, inf }
 0x6b1   :  { %711 = vmin.xlane.f32.xlu0 %v710_v47  ;;  %v715_v9 = vshll.u32 %v714_v60, 16 }
 0x6b6   :  { %v778_v48 = vpop.xlane.xlu2 %777 }
 0x6b7   :  { %v780_v49 = vperm.slane %v778_v48, 0  ;;  %v781_v51 = vperm.slane %v778_v48, 1 }
 0x6b9   :  { %v784_v53 = vsub.f32 %v768_v34, %v780_v49  ;;  %v785_v54 = vsub.f32 %v769_v36, %v781_v51 }
 0x6bb   :  { %v786_v55 = vmul.f32 1.442695, %v784_v53  ;;  %v788_v56 = vmul.f32 1.442695, %v785_v54 }
 0x6bd   :  { %3433 = vpow2.f32 %v786_v55 }
 0x6be   :  { %3435 = vpow2.f32 %v788_v56 }
 0x6c3   :  { %v3434_v58 = vpop.eup %3433 }
 0x6c4   :  { %v3436_v59 = vpop.eup %3435  ;;  %793 = vperm.xlu2 %3404, %v3434_v58  }
 0x6c5   :  { %796 = vperm.xlu0 %3405, %v3436_v59  }
 0x71e   :  { %v794_v15 = vpop.permute.xlu2 %793 }
 0x71f   :  { %v798_v19 = vperm.slane %v794_v15, %v4247_v38 }
 0x724   :  { %v712_v63 = vpop.xlane.xlu0 %711 }
 0x725   :  { %v713_v10 = vcvt.f32.s32 %v712_v63 }
 0x727   :  { %v716_v11 = vadd.s32 %v715_v9, %v713_v10 }
 0x729   :  { %vm717_vm11 = vcmp.eq.s32.totalorder %v4247_v38, %v716_v11 }
 0x72a   :  { %v3285_v12 = vsel %vm717_vm11, 1.0, %v4046_v1 }
 0x72b   :  { %v720_v13 = vpack.c.bf16 %v3285_v12, %v3285_v12 }
 0x72d   :  { %3286 = vmatmul.msk.bf16.vlgmr.msrb.gmra.mxu3 %vm284_vm0, %v720_v13 }
 0x72e   :  { %1131 = vmatpush.bf16.msrb.mxu3 %v4283_v21 }
 0x732   :  { %1132 = vmatpush.bf16.msrb.mxu3 %v4289_v22 }
 0x737   :  { %v797_v17 = vpop.permute.xlu0 %796 }
 0x738   :  { %v799_v23 = vperm.slane %v797_v17, %v4247_v38 }
 0x73a   :  { %v800_v26 = vsel %vm436_vm1, %v799_v23, %v798_v19 }
 0x73b   :  { %v802_v27 = vsel %vm439_vm2, %v800_v26, 0.0 }
 0x73c   :  { %803 = vadd.xlane.f32.xlu1 %v802_v27 }
 0x73d   :  { %3290 = vmatmul.msk.bf16.vlgmr.msra.gmra.mxu3 %vm284_vm0, %v4351_v52 }
 0x73e   :  { %1278 = vmatpush.bf16.msra.mxu3 %v4259_v61 }
 0x742   :  { %1279 = vmatpush.bf16.msra.mxu3 %v4262_v62 }
 0x7af   :  { %v804_v29 = vpop.xlane.xlu1 %803 }
 0x7b0   :  { %3437 = vrcp.f32 %v804_v29  ;;  %v733_v30 = vpop.f32.mrf.mxu3 }
 0x7b1   :  { %v839_v31 = vpack.c.bf16 %v733_v30, %v733_v30 }
 0x7b3   :  { %3289 = vmatmul.msk.bf16.vlgmr.msra.gmra.mxu2 %vm284_vm0, %v839_v31 }
 0x7b4   :  { %1220 = vmatpush.bf16.msra.mxu2 %v4333_v44 }
 0x7b6   :  { %v3438_v34 = vpop.eup %3437 }
 0x7b7   :  { %v808_v35 = vperm.slane %v3438_v34, 1  ;;  %v807_v36 = vperm.slane %v3438_v34, 0 }
 0x7b8   :  { %v735_v39 = vpop.f32.mrf.mxu3  ;;  %1221 = vmatpush.bf16.msra.mxu2 %v4339_v45 }
 0x7b9   :  { %v812_v40 = vmul.f32 %v3436_v59, %v808_v35  ;;  %v811_v52 = vmul.f32 %v3434_v58, %v807_v36 }
 0x7bb   :  { %820 = vperm.xlu0 %3405, %v812_v40   ;;  %815 = vperm.xlu1 %3403, %v811_v52  }
 0x7c0   :  { %v890_v41 = vpop.f32.mrf.mxu3 }
 0x7c1   :  { %v891_v42 = vadd.f32 %v4306_v33, %v890_v41 }
 0x7c3   :  { %915 = vrot.lane.b32.xlu2 %v891_v42, %s4032_s0 }
 0x7c8   :  { %v892_v43 = vpop.f32.mrf.mxu3 }
 0x82d   :  { %v821_v5 = vpop.permute.xlu0 %820  ;;  %v816_v46 = vpop.permute.xlu1 %815 }
 0x82e   :  { %v824_v47 = vmul.f32 %v821_v5, %v4304_v32  ;;  %v969_v48 = vperm.slane %v821_v5, %v4247_v38  ;;  %v823_v49 = vmul.f32 %v816_v46, %v4279_v18  ;;  %v968_v51 = vperm.slane %v816_v46, %v4247_v38 }
 0x830   :  { %v832_v53 = vsel %vm284_vm0, %v824_v47, 0.0  ;;  %v825_v54 = vsel %vm284_vm0, %v823_v49, 0.0  ;;  %v970_v55 = vsel %vm436_vm1, %v969_v48, %v968_v51 }
 0x831   :  { %v833_v56 = vrot.slane %v832_v53, 4  ;;  %v826_v58 = vrot.slane %v825_v54, 4  ;;  %3293 = vst.msk [vmem:[%s5197_s18 + $0x2] sm:$0x3] %vm439_vm2, %v970_v55 }
 0x833   :  { %v834_v59 = vadd.f32 %v833_v56, %v832_v53  ;;  %v827_v60 = vadd.f32 %v826_v58, %v825_v54 }
 0x835   :  { %v835_v63 = vrot.slane %v834_v59, 2  ;;  %v828_v9 = vrot.slane %v827_v60, 2 }
 0x836   :  { %v876_v10 = vpop.f32.mrf.mxu2 }
 0x837   :  { %v836_v11 = vadd.f32 %v835_v63, %v834_v59  ;;  %v829_v12 = vadd.f32 %v828_v9, %v827_v60 }
 0x839   :  { %v837_v13 = vrot.slane %v836_v11, 1  ;;  %v830_v15 = vrot.slane %v829_v12, 1 }
 0x83b   :  { %v838_v17 = vadd.f32 %v837_v13, %v836_v11  ;;  %v831_v19 = vadd.f32 %v830_v15, %v829_v12 }
 0x83d   :  { %v841_v23 = vpack.c.bf16 %v838_v17, %v838_v17  ;;  %v840_v26 = vpack.c.bf16 %v831_v19, %v831_v19 }
 0x83e   :  { %v878_v27 = vpop.f32.mrf.mxu2 }
 0x83f   :  { %v845_v29 = vunpack.c.l.b16 %v841_v23  ;;  %v844_v30 = vunpack.c.l.b16 %v840_v26 }
 0x841   :  { %v846_v31 = vsel %vm436_vm1, %v845_v29, %v844_v30 }
 0x842   :  { %v847_v34 = vpack.c.b16 %v846_v31, %v846_v31 }
 0x844   :  { %3288 = vmatmul.msk.bf16.vlgmr.msra.gmra.mxu1 %vm284_vm0, %v847_v34 }
 0x845   :  { %1161 = vmatpush.bf16.msra.mxu1 %v4267_v0 }
 0x849   :  { %1162 = vmatpush.bf16.msra.mxu1 %v4273_v8 }
 0x8c1   :  { %v860_v35 = vpop.f32.mrf.mxu1 }
 0x8c2   :  { %v877_v36 = vadd.f32 %v876_v10, %v860_v35 }
 0x8c4   :  { %v880_v39 = vadd.f32 %v4323_v6, %v877_v36 }
 0x8c6   :  { %v894_v40 = vadd.f32 %v891_v42, %v880_v39  ;;  %v916_v42 = vpop.permute.xlu2 %915 }
 0x8c8   :  { %v3291_v52 = vmul.f32 -1.442695, %v894_v40 }
 0x8c9   :  { %v862_v41 = vpop.f32.mrf.mxu1 }
 0x8ca   :  { %3439 = vpow2.f32 %v3291_v52 }
 0x8d0   :  { %v3440_v43 = vpop.eup %3439 }
 0x8d1   :  { %v898_v5 = vadd.f32 1.0, %v3440_v43 }
 0x8d3   :  { %3441 = vrcp.f32 %v898_v5  ;;  %v910_v49 = vand.u32 2147483648, %v898_v5  ;;  %v908_v53 = vand.u32 2147483647, %v898_v5  ;;  %vm904_vm13 = vweird.f32 %v898_v5 }
 0x8d5   :  { %v911_v55 = vor.u32 1.1754944e-38, %v910_v49  ;;  %vm909_vm15 = vcmp.eq.f32.partialorder %v908_v53, 8.507059e+37 }
 0x8d9   :  { %v3442_v46 = vpop.eup %3441 }
 0x8da   :  { %v900_v47 = vmul.f32 %v3442_v46, %v898_v5  ;;  %vm905_vm12 = vweird.f32 %v3442_v46 }
 0x8db   :  { %vm906_vm14 = vmor %vm904_vm13, %vm905_vm12 }
 0x8dc   :  { %v901_v48 = vsub.f32 1.0, %v900_v47 }
 0x8de   :  { %v902_v51 = vmul.f32 %v3442_v46, %v901_v48 }
 0x8e0   :  { %v903_v54 = vadd.f32 %v3442_v46, %v902_v51 }
 0x8e2   :  { %v907_v56 = vsel %vm906_vm14, %v3442_v46, %v903_v54 }
 0x8e3   :  { %v912_v58 = vsel %vm909_vm15, %v911_v55, %v907_v56 }
 0x8e4   :  { %v918_v59 = vmul.f32 %v916_v42, %v912_v58  ;;  %v925_v10 = vsub.f32 1.0, %v912_v58  ;;  %v931_v12 = vmul.f32 %v912_v58, %v4346_v50 }
 0x8e6   :  { %920 = vrot.lane.b32.xlu0 %v918_v59, %s4032_s0 }
 0x958   :  { %v921_v60 = vpop.permute.xlu0 %920 }
 0x959   :  { %v923_v63 = vadd.f32 %v921_v60, %v880_v39 }
 0x95b   :  { %3443 = vtanh.f32 %v923_v63 }
 0x961   :  { %v3444_v9 = vpop.eup %3443 }
 0x962   :  { %927 = vrot.lane.b32.xlu2 %v3444_v9, %s4047_s28 }
 0x9bc   :  { %v928_v11 = vpop.permute.xlu2 %927 }
 0x9bd   :  { %v930_v13 = vmul.f32 %v928_v11, %v925_v10 }
 0x9bf   :  { %v4427_v15 = vadd.f32 %v931_v12, %v930_v13 }
 0x9c1   :  { %v933_v17 = vpack.c.bf16 %v4427_v15, %v4427_v15 }
 0x9c3   :  { %935 = vrot.lane.b32.xlu0 %v933_v17, %s4047_s28 }
 0xa35   :  { %v4432_v19 = vpop.permute.xlu0 %935 }
 0xa36   :  { %3292 = vmatmul.msk.bf16.vlgmr.msrb.gmra.mxu0 %vm284_vm0, %v4432_v19  ;;  %3296 = vmatmul.msk.bf16.vlgmr.msrb.gmra.mxu2 %vm284_vm0, %v4432_v19 }
 0xa37   :  { %1291 = vmatpush.bf16.msrb.mxu0 %v4215_v2  ;;  %1421 = vmatpush.bf16.msrb.mxu2 %v4281_v20 }
 0xa3b   :  { %1292 = vmatpush.bf16.msrb.mxu0 %v4217_v4  ;;  %1422 = vmatpush.bf16.msrb.mxu2 %v4287_v7 }
 0xab3   :  { %v949_v50 = vpop.f32.mrf.mxu0 }
 0xab4   :  { %v4443_v23 = vadd.f32 %v4365_v57, %v949_v50 }
 0xab6   :  { %v953_v26 = vsel %vm680_vm8, %v4443_v23, -inf }
 0xab7   :  { %954 = vmax.xlane.f32.xlu1 %v953_v26 }
 0xab9   :  { %v1020_v27 = vpop.f32.mrf.mxu2 }
 0xaba   :  { %v1021_v29 = vadd.f32 %v4230_v14, %v1020_v27 }
 0xabb   :  { %v951_v30 = vpop.f32.mrf.mxu0 }
 0xabc   :  { %v1025_v31 = vrot.slane %v1021_v29, 1  ;;  %v1026_v2 = vperm.slane %v1021_v29, 0 }
 0xabe   :  { %v1027_v34 = vperm.slane %v1025_v31, 0  ;;  %v1030_v35 = vadd.f32 %v1026_v2, %v4232_v16 }
 0xac0   :  { %v1031_v4 = vadd.f32 %v1027_v34, %v4236_v25  ;;  %3445 = vtanh.f32 %v1030_v35 }
 0xac1   :  { %v1022_v36 = vpop.f32.mrf.mxu2 }
 0xac2   :  { %3447 = vtanh.f32 %v1031_v4 }
 0xac6   :  { %v3446_v39 = vpop.eup %3445 }
 0xac7   :  { %v1034_v40 = vmul.f32 %v3446_v39, %v4239_v28 }
 0xac8   :  { %v3448_v52 = vpop.eup %3447 }
 0xac9   :  { %v1036_v41 = vsel %vm284_vm0, %v1034_v40, 0.0  ;;  %v1035_v43 = vmul.f32 %v3448_v52, %v4239_v28 }
 0xaca   :  { %1037 = vadd.xlane.f32.xlu2 %v1036_v41 }
 0xacb   :  { %v1039_v14 = vsel %vm284_vm0, %v1035_v43, 0.0 }
 0xacc   :  { %1040 = vadd.xlane.f32.xlu0 %v1039_v14 }
 0xb2a   :  { %v4454_v5 = vpop.xlane.xlu1 %954 }
 0xb2b   :  { %vm974_vm3 = vcmp.eq.f32.partialorder %v4443_v23, %v4454_v5 }
 0xb2c   :  { %v975_v46 = vsel %vm974_vm3, %v4247_v38, 32 }
 0xb2d   :  { %v976_v47 = vsel %vm680_vm8, %v975_v46, 2147483647 }
 0xb2e   :  { %v978_v48 = vshra.s32 %v976_v47, 16  ;;  %v977_v59 = vand.u32 65535, %v976_v47 }
 0xb30   :  { %v980_v49 = vcvt.s32.f32 %v978_v48  ;;  %v979_v63 = vcvt.s32.f32 %v977_v59 }
 0xb32   :  { %981 = vmin.xlane.f32.xlu1 %v980_v49 }
 0xb3d   :  { %v1038_v51 = vpop.xlane.xlu2 %1037 }
 0xb3e   :  { %v1042_v53 = vadd.f32 %v1038_v51, %v4245_v37 }
 0xb3f   :  { %v1041_v28 = vpop.xlane.xlu0 %1040 }
 0xb40   :  { %v1043_v54 = vadd.f32 %v1041_v28, %v4245_v37  ;;  %v1046_v55 = vperm.slane %v1042_v53, %v4247_v38 }
 0xb42   :  { %v1047_v56 = vperm.slane %v1043_v54, %v4247_v38 }
 0xb44   :  { %v1048_v42 = vsel %vm436_vm1, %v1047_v56, %v1046_v55 }
 0xb45   :  { %v1050_v58 = vsel %vm439_vm2, %v1048_v42, -inf }
 0xb46   :  { %1051 = vmax.xlane.f32.xlu2 %v1050_v58 }
 0xba5   :  { %v982_v60 = vpop.xlane.xlu1 %981 }
 0xba6   :  { %vm983_vm4 = vcmp.eq.f32.partialorder %v980_v49, %v982_v60  ;;  %v988_v30 = vcvt.f32.s32 %v982_v60 }
 0xba7   :  { %v984_v9 = vsel %vm983_vm4, %v979_v63, inf }
 0xba8   :  { %985 = vmin.xlane.f32.xlu0 %v984_v9  ;;  %v989_v2 = vshll.u32 %v988_v30, 16 }
 0xbb9   :  { %v1052_v10 = vpop.xlane.xlu2 %1051 }
 0xbba   :  { %v1054_v11 = vperm.slane %v1052_v10, 0  ;;  %v1055_v12 = vperm.slane %v1052_v10, 1 }
 0xbbc   :  { %v1058_v13 = vsub.f32 %v1042_v53, %v1054_v11  ;;  %v1059_v17 = vsub.f32 %v1043_v54, %v1055_v12 }
 0xbbe   :  { %v1060_v50 = vmul.f32 1.442695, %v1058_v13  ;;  %v1062_v26 = vmul.f32 1.442695, %v1059_v17 }
 0xbc0   :  { %3449 = vpow2.f32 %v1060_v50 }
 0xbc1   :  { %3451 = vpow2.f32 %v1062_v26 }
 0xbc6   :  { %v3450_v27 = vpop.eup %3449 }
 0xbc7   :  { %v3452_v29 = vpop.eup %3451  ;;  %1067 = vperm.xlu1 %3403, %v3450_v27  }
 0xbc8   :  { %1070 = vperm.xlu2 %3404, %v3452_v29  }
 0xc1b   :  { %v986_v31 = vpop.xlane.xlu0 %985 }
 0xc1c   :  { %v987_v34 = vcvt.f32.s32 %v986_v31 }
 0xc1e   :  { %v990_v35 = vadd.s32 %v989_v2, %v987_v34 }
 0xc20   :  { %vm991_vm5 = vcmp.eq.s32.totalorder %v4247_v38, %v990_v35 }
 0xc21   :  { %v3294_v4 = vsel %vm991_vm5, 1.0, %v4046_v1 }
 0xc22   :  { %v994_v36 = vpack.c.bf16 %v3294_v4, %v3294_v4  ;;  %v1071_v39 = vpop.permute.xlu2 %1070 }
 0xc23   :  { %v1073_v52 = vperm.slane %v1071_v39, %v4247_v38 }
 0xc24   :  { %3295 = vmatmul.msk.bf16.vlgmr.msrb.gmra.mxu1 %vm284_vm0, %v994_v36 }
 0xc25   :  { %1405 = vmatpush.bf16.msrb.mxu1 %v4283_v21 }
 0xc29   :  { %1406 = vmatpush.bf16.msrb.mxu1 %v4289_v22 }
 0xc34   :  { %3299 = vmatmul.msk.bf16.vlgmr.msra.gmra.mxu1 %vm284_vm0, %v4432_v19 }
 0xc35   :  { %1552 = vmatpush.bf16.msra.mxu1 %v4259_v61 }
 0xc39   :  { %v1068_v40 = vpop.permute.xlu1 %1067  ;;  %1553 = vmatpush.bf16.msra.mxu1 %v4262_v62 }
 0xc3a   :  { %v1072_v41 = vperm.slane %v1068_v40, %v4247_v38 }
 0xc3c   :  { %v1074_v43 = vsel %vm436_vm1, %v1073_v52, %v1072_v41 }
 0xc3d   :  { %v1076_v14 = vsel %vm439_vm2, %v1074_v43, 0.0 }
 0xc3e   :  { %1077 = vadd.xlane.f32.xlu0 %v1076_v14 }
 0xca1   :  { %v1007_v21 = vpop.f32.mrf.mxu1 }
 0xca2   :  { %v1113_v22 = vpack.c.bf16 %v1007_v21, %v1007_v21 }
 0xca4   :  { %3298 = vmatmul.msk.bf16.vlgmr.msra.gmra.mxu0 %vm284_vm0, %v1113_v22 }
 0xca5   :  { %1494 = vmatpush.bf16.msra.mxu0 %v4333_v44 }
 0xca9   :  { %v1009_v61 = vpop.f32.mrf.mxu1  ;;  %1495 = vmatpush.bf16.msra.mxu0 %v4339_v45 }
 0xcb1   :  { %v1164_v19 = vpop.f32.mrf.mxu1  ;;  %v1078_v62 = vpop.xlane.xlu0 %1077 }
 0xcb2   :  { %v1165_v46 = vadd.f32 %v4306_v33, %v1164_v19  ;;  %3453 = vrcp.f32 %v1078_v62 }
 0xcb4   :  { %1189 = vrot.lane.b32.xlu2 %v1165_v46, %s4032_s0 }
 0xcb8   :  { %v3454_v47 = vpop.eup %3453 }
 0xcb9   :  { %v1166_v48 = vpop.f32.mrf.mxu1  ;;  %v1082_v49 = vperm.slane %v3454_v47, 1  ;;  %v1081_v51 = vperm.slane %v3454_v47, 0 }
 0xcbb   :  { %v1086_v53 = vmul.f32 %v3452_v29, %v1082_v49  ;;  %v1085_v28 = vmul.f32 %v3450_v27, %v1081_v51 }
 0xcbd   :  { %1094 = vperm.xlu1 %3403, %v1086_v53   ;;  %1089 = vperm.xlu0 %3405, %v1085_v28  }
 0xd21   :  { %v1150_v54 = vpop.f32.mrf.mxu0 }
 0xd29   :  { %v1152_v55 = vpop.f32.mrf.mxu0 }
 0xd2f   :  { %v1095_v56 = vpop.permute.xlu1 %1094  ;;  %v1090_v42 = vpop.permute.xlu0 %1089 }
 0xd30   :  { %v1098_v58 = vmul.f32 %v1095_v56, %v4304_v32  ;;  %v1243_v59 = vperm.slane %v1095_v56, %v4247_v38  ;;  %v1097_v33 = vmul.f32 %v1090_v42, %v4279_v18  ;;  %v1242_v60 = vperm.slane %v1090_v42, %v4247_v38 }
 0xd32   :  { %v1106_v63 = vsel %vm284_vm0, %v1098_v58, 0.0  ;;  %v1099_v9 = vsel %vm284_vm0, %v1097_v33, 0.0  ;;  %v1244_v10 = vsel %vm436_vm1, %v1243_v59, %v1242_v60 }
 0xd33   :  { %v1107_v11 = vrot.slane %v1106_v63, 4  ;;  %v1100_v12 = vrot.slane %v1099_v9, 4  ;;  %3302 = vst.msk [vmem:[%s5197_s18 + $0x4] sm:$0x3] %vm439_vm2, %v1244_v10 }
 0xd35   :  { %v1108_v13 = vadd.f32 %v1107_v11, %v1106_v63  ;;  %v1101_v17 = vadd.f32 %v1100_v12, %v1099_v9  ;;  %v4514_v12 = vld [vmem:[#allocation10 + $0x8] sm:$0xff] }
 0xd37   :  { %v1109_v50 = vrot.slane %v1108_v13, 2  ;;  %v1102_v26 = vrot.slane %v1101_v17, 2 }
 0xd39   :  { %v1110_v27 = vadd.f32 %v1109_v50, %v1108_v13  ;;  %v1103_v29 = vadd.f32 %v1102_v26, %v1101_v17  ;;  %v4522_v17 = vld [vmem:[#allocation12] ss:$0 sm:$0xff] }
 0xd3b   :  { %v1111_v30 = vrot.slane %v1110_v27, 1  ;;  %v1104_v31 = vrot.slane %v1103_v29, 1 }
 0xd3d   :  { %v1112_v2 = vadd.f32 %v1111_v30, %v1110_v27  ;;  %v1105_v34 = vadd.f32 %v1104_v31, %v1103_v29 }
 0xd3f   :  { %v1115_v35 = vpack.c.bf16 %v1112_v2, %v1112_v2  ;;  %v1114_v4 = vpack.c.bf16 %v1105_v34, %v1105_v34 }
 0xd41   :  { %v1119_v36 = vunpack.c.l.b16 %v1115_v35  ;;  %v1118_v39 = vunpack.c.l.b16 %v1114_v4 }
 0xd43   :  { %v1120_v40 = vsel %vm436_vm1, %v1119_v36, %v1118_v39  ;;  %v4532_v36 = vld [vmem:[#allocation16] ss:$0 sm:$0xff] }
 0xd44   :  { %v1121_v52 = vpack.c.b16 %v1120_v40, %v1120_v40 }
 0xd46   :  { %3297 = vmatmul.msk.bf16.vlgmr.msrb.gmra.mxu3 %vm284_vm0, %v1121_v52 }
 0xd47   :  { %1435 = vmatpush.bf16.msrb.mxu3 %v4267_v0 }
 0xd4b   :  { %1436 = vmatpush.bf16.msrb.mxu3 %v4273_v8 }
 0xdc9   :  { %v1134_v41 = vpop.f32.mrf.mxu3 }
 0xdca   :  { %v1151_v43 = vadd.f32 %v1150_v54, %v1134_v41 }
 0xdcc   :  { %v1154_v14 = vadd.f32 %v4323_v6, %v1151_v43  ;;  %v1190_v6 = vpop.permute.xlu2 %1189 }
 0xdce   :  { %v1168_v21 = vadd.f32 %v1165_v46, %v1154_v14 }
 0xdd0   :  { %v3300_v22 = vmul.f32 -1.442695, %v1168_v21 }
 0xdd1   :  { %v1136_v61 = vpop.f32.mrf.mxu3 }
 0xdd2   :  { %3455 = vpow2.f32 %v3300_v22 }
 0xdd8   :  { %v3456_v19 = vpop.eup %3455 }
 0xdd9   :  { %v1172_v62 = vadd.f32 1.0, %v3456_v19 }
 0xddb   :  { %3457 = vrcp.f32 %v1172_v62  ;;  %v1184_v51 = vand.u32 2147483648, %v1172_v62  ;;  %v1182_v0 = vand.u32 2147483647, %v1172_v62  ;;  %vm1178_vm7 = vweird.f32 %v1172_v62 }
 0xddd   :  { %v1185_v8 = vor.u32 1.1754944e-38, %v1184_v51  ;;  %vm1183_vm10 = vcmp.eq.f32.partialorder %v1182_v0, 8.507059e+37 }
 0xde1   :  { %v3458_v47 = vpop.eup %3457 }
 0xde2   :  { %v1174_v48 = vmul.f32 %v3458_v47, %v1172_v62  ;;  %vm1179_vm6 = vweird.f32 %v3458_v47 }
 0xde3   :  { %vm1180_vm9 = vmor %vm1178_vm7, %vm1179_vm6 }
 0xde4   :  { %v1175_v49 = vsub.f32 1.0, %v1174_v48 }
 0xde6   :  { %v1176_v53 = vmul.f32 %v3458_v47, %v1175_v49 }
 0xde8   :  { %v1177_v28 = vadd.f32 %v3458_v47, %v1176_v53 }
 0xdea   :  { %v1181_v54 = vsel %vm1180_vm9, %v3458_v47, %v1177_v28 }
 0xdeb   :  { %v1186_v46 = vsel %vm1183_vm10, %v1185_v8, %v1181_v54 }
 0xdec   :  { %v1192_v55 = vmul.f32 %v1190_v6, %v1186_v46  ;;  %v1199_v59 = vsub.f32 1.0, %v1186_v46  ;;  %v1205_v60 = vmul.f32 %v1186_v46, %v4427_v15  ;;  %v4518_v15 = vld [vmem:[#allocation10] sm:$0xff] }
 0xdee   :  { %1194 = vrot.lane.b32.xlu1 %v1192_v55, %s4032_s0 }
 0xe60   :  { %v1195_v56 = vpop.permute.xlu1 %1194 }
 0xe61   :  { %v1197_v42 = vadd.f32 %v1195_v56, %v1154_v14 }
 0xe63   :  { %3459 = vtanh.f32 %v1197_v42 }
 0xe69   :  { %v3460_v58 = vpop.eup %3459 }
 0xe6a   :  { %1201 = vrot.lane.b32.xlu2 %v3460_v58, %s4047_s28 }
 0xec4   :  { %v1202_v33 = vpop.permute.xlu2 %1201 }
 0xec5   :  { %v1204_v63 = vmul.f32 %v1202_v33, %v1199_v59 }
 0xec7   :  { %v4503_v9 = vadd.f32 %v1205_v60, %v1204_v63 }
 0xec9   :  { %v1207_v10 = vpack.c.bf16 %v4503_v9, %v4503_v9 }
 0xecb   :  { %1209 = vrot.lane.b32.xlu0 %v1207_v10, %s4047_s28 }
 0xf3d   :  { %v4508_v11 = vpop.permute.xlu0 %1209 }
 0xf3e   :  { %3301 = vmatmul.msk.bf16.vlgmr.msra.gmra.mxu2 %vm284_vm0, %v4508_v11  ;;  %3305 = vmatmul.msk.bf16.vlgmr.msrb.gmra.mxu0 %vm284_vm0, %v4508_v11 }
 0xf3f   :  { %1565 = vmatpush.bf16.msra.mxu2 %v4514_v12  ;;  %1695 = vmatpush.bf16.msrb.mxu0 %v4281_v20 }
 0xf43   :  { %1566 = vmatpush.bf16.msra.mxu2 %v4518_v15  ;;  %1696 = vmatpush.bf16.msrb.mxu0 %v4287_v7 }
 0xfbb   :  { %v1294_v13 = vpop.f32.mrf.mxu0 }
 0xfbc   :  { %v1295_v50 = vadd.f32 %v4522_v17, %v1294_v13 }
 0xfbe   :  { %v1299_v26 = vrot.slane %v1295_v50, 1  ;;  %v1300_v27 = vperm.slane %v1295_v50, 0 }
 0xfc0   :  { %v1301_v29 = vperm.slane %v1299_v26, 0  ;;  %v1304_v30 = vadd.f32 %v1300_v27, %v4232_v16 }
 0xfc1   :  { %v1223_v31 = vpop.f32.mrf.mxu2 }
 0xfc2   :  { %v1305_v2 = vadd.f32 %v1301_v29, %v4236_v25  ;;  %3461 = vtanh.f32 %v1304_v30  ;;  %v4528_v20 = vadd.f32 %v4365_v57, %v1223_v31  ;;  %v4553_v31 = vld [vmem:[#allocation19 + $0x8] sm:$0xff] }
 0xfc3   :  { %v1296_v34 = vpop.f32.mrf.mxu0 }
 0xfc4   :  { %3463 = vtanh.f32 %v1305_v2  ;;  %v1227_v7 = vsel %vm680_vm8, %v4528_v20, -inf  ;;  %v4556_v2 = vld [vmem:[#allocation19] sm:$0xff] }
 0xfc5   :  { %1228 = vmax.xlane.f32.xlu1 %v1227_v7 }
 0xfc8   :  { %v3462_v35 = vpop.eup %3461 }
 0xfc9   :  { %v1225_v4 = vpop.f32.mrf.mxu2  ;;  %v1308_v39 = vmul.f32 %v4532_v36, %v3462_v35 }
 0xfca   :  { %v3464_v40 = vpop.eup %3463 }
 0xfcb   :  { %v1310_v52 = vsel %vm284_vm0, %v1308_v39, 0.0  ;;  %v1309_v41 = vmul.f32 %v4532_v36, %v3464_v40 }
 0xfcc   :  { %1311 = vadd.xlane.f32.xlu2 %v1310_v52  ;;  %v4565_v52 = vld [vmem:[#allocation9 + $0x8] sm:$0xff] }
 0xfcd   :  { %v1313_v57 = vsel %vm284_vm0, %v1309_v41, 0.0  ;;  %v4568_v41 = vld [vmem:[#allocation9] sm:$0xff] }
 0xfce   :  { %1314 = vadd.xlane.f32.xlu0 %v1313_v57 }
0x1038   :  { %v4538_v43 = vpop.xlane.xlu1 %1228 }
0x1039   :  { %vm1248_vm11 = vcmp.eq.f32.partialorder %v4528_v20, %v4538_v43 }
0x103a   :  { %v1249_v14 = vsel %vm1248_vm11, %v4247_v38, 32 }
0x103b   :  { %v1250_v21 = vsel %vm680_vm8, %v1249_v14, 2147483647 }
0x103c   :  { %v1252_v22 = vshra.s32 %v1250_v21, 16  ;;  %v1251_v28 = vand.u32 65535, %v1250_v21 }
0x103e   :  { %v1254_v61 = vcvt.s32.f32 %v1252_v22  ;;  %v1253_v54 = vcvt.s32.f32 %v1251_v28 }
0x103f   :  { %v1312_v19 = vpop.xlane.xlu2 %1311 }
0x1040   :  { %v1316_v62 = vadd.f32 %v1312_v19, %v4245_v37  ;;  %1255 = vmin.xlane.f32.xlu1 %v1254_v61 }
0x1041   :  { %v1315_v47 = vpop.xlane.xlu0 %1314 }
0x1042   :  { %v1317_v48 = vadd.f32 %v1315_v47, %v4245_v37  ;;  %v1320_v49 = vperm.slane %v1316_v62, %v4247_v38 }
0x1044   :  { %v1321_v51 = vperm.slane %v1317_v48, %v4247_v38 }
0x1046   :  { %v1322_v53 = vsel %vm436_vm1, %v1321_v51, %v1320_v49  ;;  %v4574_v49 = vld [vmem:[#allocation24] ss:$0 sm:$0xff] }
0x1047   :  { %v1324_v0 = vsel %vm439_vm2, %v1322_v53, -inf }
0x1048   :  { %1325 = vmax.xlane.f32.xlu2 %v1324_v0 }
0x10b3   :  { %v1256_v8 = vpop.xlane.xlu1 %1255 }
0x10b4   :  { %vm1257_vm12 = vcmp.eq.f32.partialorder %v1254_v61, %v1256_v8  ;;  %v1262_v10 = vcvt.f32.s32 %v1256_v8 }
0x10b5   :  { %v1258_v6 = vsel %vm1257_vm12, %v1253_v54, inf }
0x10b6   :  { %1259 = vmin.xlane.f32.xlu0 %v1258_v6  ;;  %v1263_v50 = vshll.u32 %v1262_v10, 16 }
0x10bb   :  { %v1326_v46 = vpop.xlane.xlu2 %1325 }
0x10bc   :  { %v1328_v55 = vperm.slane %v1326_v46, 0  ;;  %v1329_v56 = vperm.slane %v1326_v46, 1 }
0x10be   :  { %v1332_v42 = vsub.f32 %v1316_v62, %v1328_v55  ;;  %v1333_v58 = vsub.f32 %v1317_v48, %v1329_v56 }
0x10c0   :  { %v1334_v59 = vmul.f32 1.442695, %v1332_v42  ;;  %v1336_v33 = vmul.f32 1.442695, %v1333_v58 }
0x10c2   :  { %3465 = vpow2.f32 %v1334_v59 }
0x10c3   :  { %3467 = vpow2.f32 %v1336_v33 }
0x10c8   :  { %v3466_v60 = vpop.eup %3465 }
0x10c9   :  { %v3468_v63 = vpop.eup %3467  ;;  %1341 = vperm.xlu1 %3403, %v3466_v60  }
0x10ca   :  { %1344 = vperm.xlu2 %3404, %v3468_v63  }
0x1124   :  { %v1345_v34 = vpop.permute.xlu2 %1344 }
0x1125   :  { %v1347_v35 = vperm.slane %v1345_v34, %v4247_v38 }
0x1129   :  { %v1260_v13 = vpop.xlane.xlu0 %1259 }
0x112a   :  { %v1261_v26 = vcvt.f32.s32 %v1260_v13 }
0x112c   :  { %v1264_v27 = vadd.s32 %v1263_v50, %v1261_v26 }
0x112e   :  { %vm1265_vm13 = vcmp.eq.s32.totalorder %v4247_v38, %v1264_v27 }
0x112f   :  { %v3303_v29 = vsel %vm1265_vm13, 1.0, %v4046_v1 }
0x1130   :  { %v1268_v30 = vpack.c.bf16 %v3303_v29, %v3303_v29 }
0x1132   :  { %3304 = vmatmul.msk.bf16.vlgmr.msra.gmra.mxu3 %vm284_vm0, %v1268_v30 }
0x1133   :  { %1679 = vmatpush.bf16.msra.mxu3 %v4553_v31 }
0x1137   :  { %1680 = vmatpush.bf16.msra.mxu3 %v4556_v2 }
0x113b   :  { %v1342_v7 = vpop.permute.xlu1 %1341 }
0x113c   :  { %v1346_v4 = vperm.slane %v1342_v7, %v4247_v38 }
0x113e   :  { %v1348_v39 = vsel %vm436_vm1, %v1347_v35, %v1346_v4 }
0x113f   :  { %v1350_v40 = vsel %vm439_vm2, %v1348_v39, 0.0 }
0x1140   :  { %1351 = vadd.xlane.f32.xlu0 %v1350_v40 }
0x1142   :  { %3308 = vmatmul.msk.bf16.vlgmr.msrb.gmra.mxu3 %vm284_vm0, %v4508_v11 }
0x1143   :  { %1826 = vmatpush.bf16.msrb.mxu3 %v4565_v52 }
0x1147   :  { %1827 = vmatpush.bf16.msrb.mxu3 %v4568_v41 }
0x11b3   :  { %v1352_v57 = vpop.xlane.xlu0 %1351 }
0x11b4   :  { %3469 = vrcp.f32 %v1352_v57  ;;  %v4591_v57 = vld [vmem:[#allocation21 + $0x8] sm:$0xff] }
0x11b5   :  { %v1281_v14 = vpop.f32.mrf.mxu3 }
0x11b6   :  { %v1387_v21 = vpack.c.bf16 %v1281_v14, %v1281_v14  ;;  %v4594_v14 = vld [vmem:[#allocation21] sm:$0xff] }
0x11b8   :  { %3307 = vmatmul.msk.bf16.vlgmr.msrb.gmra.mxu2 %vm284_vm0, %v1387_v21 }
0x11b9   :  { %1768 = vmatpush.bf16.msrb.mxu2 %v4333_v44 }
0x11ba   :  { %v3470_v22 = vpop.eup %3469 }
0x11bb   :  { %v1356_v61 = vperm.slane %v3470_v22, 1  ;;  %v1355_v19 = vperm.slane %v3470_v22, 0 }
0x11bd   :  { %v1283_v11 = vpop.f32.mrf.mxu3  ;;  %v1360_v62 = vmul.f32 %v3468_v63, %v1356_v61  ;;  %v1359_v47 = vmul.f32 %v3466_v60, %v1355_v19  ;;  %1769 = vmatpush.bf16.msrb.mxu2 %v4339_v45  ;;  %v4597_v61 = vld [vmem:[#allocation22] ss:$0 sm:$0xff] }
0x11bf   :  { %1368 = vperm.xlu2 %3404, %v1360_v62   ;;  %1363 = vperm.xlu0 %3405, %v1359_v47  }
0x11c5   :  { %v1438_v48 = vpop.f32.mrf.mxu3 }
0x11c6   :  { %v1439_v51 = vadd.f32 %v4574_v49, %v1438_v48 }
0x11c8   :  { %1463 = vrot.lane.b32.xlu1 %v1439_v51, %s4032_s0 }
0x11cd   :  { %v1440_v53 = vpop.f32.mrf.mxu3 }
0x1219   :  { %v1369_v0 = vpop.permute.xlu2 %1368 }
0x121a   :  { %v1372_v44 = vmul.f32 %v1369_v0, %v4304_v32  ;;  %v1517_v45 = vperm.slane %v1369_v0, %v4247_v38 }
0x121c   :  { %v1380_v28 = vsel %vm284_vm0, %v1372_v44, 0.0 }
0x121d   :  { %v1381_v8 = vrot.slane %v1380_v28, 4 }
0x121f   :  { %v1382_v54 = vadd.f32 %v1381_v8, %v1380_v28 }
0x1221   :  { %v1383_v6 = vrot.slane %v1382_v54, 2 }
0x1223   :  { %v1384_v42 = vadd.f32 %v1383_v6, %v1382_v54 }
0x1225   :  { %v1385_v60 = vrot.slane %v1384_v42, 1 }
0x1227   :  { %v1386_v13 = vadd.f32 %v1385_v60, %v1384_v42 }
0x1229   :  { %v1389_v29 = vpack.c.bf16 %v1386_v13, %v1386_v13 }
0x122b   :  { %v1393_v7 = vunpack.c.l.b16 %v1389_v29  ;;  %v4615_v29 = vld [vmem:[#allocation18 + $0x8] sm:$0xff] }
0x1231   :  { %v1364_v46 = vpop.permute.xlu0 %1363 }
0x1232   :  { %v1371_v55 = vmul.f32 %v1364_v46, %v4279_v18  ;;  %v1516_v56 = vperm.slane %v1364_v46, %v4247_v38 }
0x1234   :  { %v1373_v58 = vsel %vm284_vm0, %v1371_v55, 0.0  ;;  %v1518_v59 = vsel %vm436_vm1, %v1517_v45, %v1516_v56 }
0x1235   :  { %v1374_v33 = vrot.slane %v1373_v58, 4  ;;  %3311 = vst.msk [vmem:[%s5197_s18 + $0x6] sm:$0x3] %vm439_vm2, %v1518_v59 }
0x1237   :  { %v1375_v63 = vadd.f32 %v1374_v33, %v1373_v58 }
0x1239   :  { %v1376_v10 = vrot.slane %v1375_v63, 2 }
0x123b   :  { %v1377_v50 = vadd.f32 %v1376_v10, %v1375_v63  ;;  %v1424_v26 = vpop.f32.mrf.mxu2 }
0x123d   :  { %v1378_v27 = vrot.slane %v1377_v50, 1 }
0x123f   :  { %v1379_v30 = vadd.f32 %v1378_v27, %v1377_v50 }
0x1241   :  { %v1388_v34 = vpack.c.bf16 %v1379_v30, %v1379_v30 }
0x1243   :  { %v1392_v35 = vunpack.c.l.b16 %v1388_v34  ;;  %v1426_v4 = vpop.f32.mrf.mxu2  ;;  %v4625_v34 = vld [vmem:[%s5195_s16] ss:$0 sm:$0xff] }
0x1245   :  { %v1394_v39 = vsel %vm436_vm1, %v1393_v7, %v1392_v35 }
0x1246   :  { %v1395_v40 = vpack.c.b16 %v1394_v39, %v1394_v39 }
0x1248   :  { %3306 = vmatmul.msk.bf16.vlgmr.msrb.gmra.mxu1 %vm284_vm0, %v1395_v40 }
0x1249   :  { %1709 = vmatpush.bf16.msrb.mxu1 %v4591_v57 }
0x124d   :  { %1710 = vmatpush.bf16.msrb.mxu1 %v4594_v14 }
0x12c5   :  { %v1408_v21 = vpop.f32.mrf.mxu1 }
0x12c6   :  { %v1425_v22 = vadd.f32 %v1424_v26, %v1408_v21 }
0x12c8   :  { %v1428_v19 = vadd.f32 %v4597_v61, %v1425_v22 }
0x12ca   :  { %v1442_v11 = vadd.f32 %v1439_v51, %v1428_v19  ;;  %v1464_v51 = vpop.permute.xlu1 %1463 }
0x12cc   :  { %v3309_v62 = vmul.f32 -1.442695, %v1442_v11 }
0x12cd   :  { %v1410_v47 = vpop.f32.mrf.mxu1 }
0x12ce   :  { %3471 = vpow2.f32 %v3309_v62 }
0x12d4   :  { %v3472_v48 = vpop.eup %3471 }
0x12d5   :  { %v1446_v53 = vadd.f32 1.0, %v3472_v48 }
0x12d7   :  { %3473 = vrcp.f32 %v1446_v53  ;;  %v1458_v8 = vand.u32 2147483648, %v1446_v53  ;;  %v1456_v6 = vand.u32 2147483647, %v1446_v53  ;;  %vm1452_vm15 = vweird.f32 %v1446_v53 }
0x12d9   :  { %v1459_v45 = vor.u32 1.1754944e-38, %v1458_v8  ;;  %vm1457_vm4 = vcmp.eq.f32.partialorder %v1456_v6, 8.507059e+37 }
0x12dd   :  { %v3474_v0 = vpop.eup %3473 }
0x12de   :  { %v1448_v44 = vmul.f32 %v3474_v0, %v1446_v53  ;;  %vm1453_vm14 = vweird.f32 %v3474_v0 }
0x12df   :  { %vm1454_vm3 = vmor %vm1452_vm15, %vm1453_vm14 }
0x12e0   :  { %v1449_v28 = vsub.f32 1.0, %v1448_v44 }
0x12e2   :  { %v1450_v54 = vmul.f32 %v3474_v0, %v1449_v28 }
0x12e4   :  { %v1451_v46 = vadd.f32 %v3474_v0, %v1450_v54 }
0x12e6   :  { %v1455_v55 = vsel %vm1454_vm3, %v3474_v0, %v1451_v46 }
0x12e7   :  { %v1460_v56 = vsel %vm1457_vm4, %v1459_v45, %v1455_v55 }
0x12e8   :  { %v1466_v42 = vmul.f32 %v1464_v51, %v1460_v56  ;;  %v1473_v60 = vsub.f32 1.0, %v1460_v56  ;;  %v1479_v10 = vmul.f32 %v1460_v56, %v4503_v9  ;;  %v4619_v9 = vld [vmem:[#allocation18] sm:$0xff] }
0x12ea   :  { %1468 = vrot.lane.b32.xlu0 %v1466_v42, %s4032_s0 }
0x135c   :  { %v1469_v58 = vpop.permute.xlu0 %1468 }
0x135d   :  { %v1471_v59 = vadd.f32 %v1469_v58, %v1428_v19 }
0x135f   :  { %3475 = vtanh.f32 %v1471_v59 }
0x1365   :  { %v3476_v33 = vpop.eup %3475 }
0x1366   :  { %1475 = vrot.lane.b32.xlu2 %v3476_v33, %s4047_s28 }
0x13c0   :  { %v1476_v63 = vpop.permute.xlu2 %1475 }
0x13c1   :  { %v1478_v13 = vmul.f32 %v1476_v63, %v1473_v60 }
0x13c3   :  { %v4603_v50 = vadd.f32 %v1479_v10, %v1478_v13 }
0x13c5   :  { %v1481_v26 = vpack.c.bf16 %v4603_v50, %v4603_v50 }
0x13c7   :  { %1483 = vrot.lane.b32.xlu1 %v1481_v26, %s4047_s28 }
0x1439   :  { %v4608_v27 = vpop.permute.xlu1 %1483 }
0x143a   :  { %3310 = vmatmul.msk.bf16.vlgmr.msra.gmra.mxu0 %vm284_vm0, %v4608_v27  ;;  %3314 = vmatmul.msk.bf16.vlgmr.msra.gmra.mxu2 %vm284_vm0, %v4608_v27 }
0x143b   :  { %1839 = vmatpush.bf16.msra.mxu0 %v4514_v12  ;;  %1969 = vmatpush.bf16.msra.mxu2 %v4615_v29 }
0x143f   :  { %1840 = vmatpush.bf16.msra.mxu0 %v4518_v15  ;;  %1970 = vmatpush.bf16.msra.mxu2 %v4619_v9 }
0x14b7   :  { %v1497_v30 = vpop.f32.mrf.mxu0 }
0x14b8   :  { %v4628_v7 = vadd.f32 %v4625_v34, %v1497_v30 }
0x14ba   :  { %v1501_v35 = vsel %vm680_vm8, %v4628_v7, -inf }
0x14bb   :  { %1502 = vmax.xlane.f32.xlu0 %v1501_v35 }
0x14bd   :  { %v1568_v4 = vpop.f32.mrf.mxu2 }
0x14be   :  { %v1569_v39 = vadd.f32 %v4522_v17, %v1568_v4 }
0x14bf   :  { %v1499_v40 = vpop.f32.mrf.mxu0 }
0x14c0   :  { %v1573_v21 = vrot.slane %v1569_v39, 1  ;;  %v1574_v22 = vperm.slane %v1569_v39, 0 }
0x14c2   :  { %v1575_v19 = vperm.slane %v1573_v21, 0  ;;  %v1578_v11 = vadd.f32 %v1574_v22, %v4232_v16 }
0x14c4   :  { %v1579_v62 = vadd.f32 %v1575_v19, %v4236_v25  ;;  %3477 = vtanh.f32 %v1578_v11 }
0x14c5   :  { %v1570_v47 = vpop.f32.mrf.mxu2 }
0x14c6   :  { %3479 = vtanh.f32 %v1579_v62 }
0x14ca   :  { %v3478_v48 = vpop.eup %3477 }
0x14cb   :  { %v1582_v53 = vmul.f32 %v4532_v36, %v3478_v48 }
0x14cc   :  { %v3480_v0 = vpop.eup %3479 }
0x14cd   :  { %v1584_v44 = vsel %vm284_vm0, %v1582_v53, 0.0  ;;  %v1583_v28 = vmul.f32 %v4532_v36, %v3480_v0 }
0x14ce   :  { %1585 = vadd.xlane.f32.xlu2 %v1584_v44 }
0x14cf   :  { %v1587_v8 = vsel %vm284_vm0, %v1583_v28, 0.0 }
0x14d0   :  { %1588 = vadd.xlane.f32.xlu1 %v1587_v8 }
0x152e   :  { %v4639_v54 = vpop.xlane.xlu0 %1502 }
0x152f   :  { %vm1522_vm5 = vcmp.eq.f32.partialorder %v4628_v7, %v4639_v54 }
0x1530   :  { %v1523_v6 = vsel %vm1522_vm5, %v4247_v38, 32 }
0x1531   :  { %v1524_v46 = vsel %vm680_vm8, %v1523_v6, 2147483647 }
0x1532   :  { %v1526_v45 = vshra.s32 %v1524_v46, 16  ;;  %v1525_v10 = vand.u32 65535, %v1524_v46 }
0x1534   :  { %v1528_v55 = vcvt.s32.f32 %v1526_v45  ;;  %v1527_v26 = vcvt.s32.f32 %v1525_v10 }
0x1536   :  { %1529 = vmin.xlane.f32.xlu0 %v1528_v55 }
0x1541   :  { %v1586_v51 = vpop.xlane.xlu2 %1585 }
0x1542   :  { %v1590_v56 = vadd.f32 %v1586_v51, %v4245_v37 }
0x1543   :  { %v1589_v42 = vpop.xlane.xlu1 %1588 }
0x1544   :  { %v1591_v58 = vadd.f32 %v1589_v42, %v4245_v37  ;;  %v1594_v59 = vperm.slane %v1590_v56, %v4247_v38 }
0x1546   :  { %v1595_v33 = vperm.slane %v1591_v58, %v4247_v38 }
0x1548   :  { %v1596_v60 = vsel %vm436_vm1, %v1595_v33, %v1594_v59  ;;  %v4674_v33 = vld [vmem:[%s5194_s15] sm:$0xff] }
0x1549   :  { %v1598_v63 = vsel %vm439_vm2, %v1596_v60, -inf }
0x154a   :  { %1599 = vmax.xlane.f32.xlu2 %v1598_v63 }
0x15a9   :  { %v1530_v13 = vpop.xlane.xlu0 %1529 }
0x15aa   :  { %vm1531_vm6 = vcmp.eq.f32.partialorder %v1528_v55, %v1530_v13  ;;  %v1536_v47 = vcvt.f32.s32 %v1530_v13 }
0x15ab   :  { %v1532_v30 = vsel %vm1531_vm6, %v1527_v26, inf }
0x15ac   :  { %1533 = vmin.xlane.f32.xlu1 %v1532_v30  ;;  %v1537_v53 = vshll.u32 %v1536_v47, 16 }
0x15bd   :  { %v1600_v35 = vpop.xlane.xlu2 %1599 }
0x15be   :  { %v1602_v4 = vperm.slane %v1600_v35, 0  ;;  %v1603_v39 = vperm.slane %v1600_v35, 1 }
0x15c0   :  { %v1606_v40 = vsub.f32 %v1590_v56, %v1602_v4  ;;  %v1607_v21 = vsub.f32 %v1591_v58, %v1603_v39 }
0x15c2   :  { %v1608_v22 = vmul.f32 1.442695, %v1606_v40  ;;  %v1610_v19 = vmul.f32 1.442695, %v1607_v21 }
0x15c4   :  { %3481 = vpow2.f32 %v1608_v22 }
0x15c5   :  { %3483 = vpow2.f32 %v1610_v19 }
0x15ca   :  { %v3482_v11 = vpop.eup %3481 }
0x15cb   :  { %v3484_v62 = vpop.eup %3483  ;;  %1615 = vperm.xlu0 %3405, %v3482_v11  }
0x15cc   :  { %1618 = vperm.xlu2 %3404, %v3484_v62  }
0x161f   :  { %v1534_v48 = vpop.xlane.xlu1 %1533 }
0x1620   :  { %v1535_v0 = vcvt.f32.s32 %v1534_v48 }
0x1622   :  { %v1538_v44 = vadd.s32 %v1537_v53, %v1535_v0 }
0x1624   :  { %vm1539_vm7 = vcmp.eq.s32.totalorder %v4247_v38, %v1538_v44 }
0x1625   :  { %v3312_v28 = vsel %vm1539_vm7, 1.0, %v4046_v1 }
0x1626   :  { %v1542_v8 = vpack.c.bf16 %v3312_v28, %v3312_v28  ;;  %v1619_v6 = vpop.permute.xlu2 %1618 }
0x1627   :  { %v1621_v45 = vperm.slane %v1619_v6, %v4247_v38 }
0x1628   :  { %3313 = vmatmul.msk.bf16.vlgmr.msra.gmra.mxu1 %vm284_vm0, %v1542_v8 }
0x1629   :  { %1953 = vmatpush.bf16.msra.mxu1 %v4553_v31 }
0x162d   :  { %1954 = vmatpush.bf16.msra.mxu1 %v4556_v2 }
0x1638   :  { %3317 = vmatmul.msk.bf16.vlgmr.msrb.gmra.mxu1 %vm284_vm0, %v4608_v27  ;;  %v4668_v27 = vld [vmem:[%s5194_s15 + $0x8] sm:$0xff] }
0x1639   :  { %2100 = vmatpush.bf16.msrb.mxu1 %v4565_v52 }
0x163d   :  { %v1616_v46 = vpop.permute.xlu0 %1615  ;;  %2101 = vmatpush.bf16.msrb.mxu1 %v4568_v41 }
0x163e   :  { %v1620_v55 = vperm.slane %v1616_v46, %v4247_v38 }
0x1640   :  { %v1622_v51 = vsel %vm436_vm1, %v1621_v45, %v1620_v55 }
0x1641   :  { %v1624_v56 = vsel %vm439_vm2, %v1622_v51, 0.0 }
0x1642   :  { %1625 = vadd.xlane.f32.xlu1 %v1624_v56 }
0x16a5   :  { %v1555_v42 = vpop.f32.mrf.mxu1 }
0x16a6   :  { %v1661_v58 = vpack.c.bf16 %v1555_v42, %v1555_v42 }
0x16a8   :  { %3316 = vmatmul.msk.bf16.vlgmr.msrb.gmra.mxu0 %vm284_vm0, %v1661_v58 }
0x16a9   :  { %2042 = vmatpush.bf16.msrb.mxu0 %v4668_v27 }
0x16ad   :  { %v1557_v59 = vpop.f32.mrf.mxu1  ;;  %2043 = vmatpush.bf16.msrb.mxu0 %v4674_v33 }
0x16b5   :  { %v1712_v60 = vpop.f32.mrf.mxu1  ;;  %v1626_v63 = vpop.xlane.xlu1 %1625 }
0x16b6   :  { %v1713_v10 = vadd.f32 %v4574_v49, %v1712_v60  ;;  %3485 = vrcp.f32 %v1626_v63 }
0x16b8   :  { %1737 = vrot.lane.b32.xlu2 %v1713_v10, %s4032_s0 }
0x16bc   :  { %v3486_v13 = vpop.eup %3485 }
0x16bd   :  { %v1714_v26 = vpop.f32.mrf.mxu1  ;;  %v1630_v30 = vperm.slane %v3486_v13, 1  ;;  %v1629_v35 = vperm.slane %v3486_v13, 0 }
0x16bf   :  { %v1634_v4 = vmul.f32 %v3484_v62, %v1630_v30  ;;  %v1633_v39 = vmul.f32 %v3482_v11, %v1629_v35 }
0x16c1   :  { %1642 = vperm.xlu0 %3405, %v1634_v4   ;;  %1637 = vperm.xlu1 %3403, %v1633_v39  }
0x1725   :  { %v1698_v40 = vpop.f32.mrf.mxu0 }
0x172d   :  { %v1700_v21 = vpop.f32.mrf.mxu0 }
0x1733   :  { %v1643_v22 = vpop.permute.xlu0 %1642  ;;  %v1638_v19 = vpop.permute.xlu1 %1637 }
0x1734   :  { %v1646_v47 = vmul.f32 %v1643_v22, %v4304_v32  ;;  %v1791_v48 = vperm.slane %v1643_v22, %v4247_v38  ;;  %v1645_v53 = vmul.f32 %v1638_v19, %v4279_v18  ;;  %v1790_v0 = vperm.slane %v1638_v19, %v4247_v38 }
0x1736   :  { %v1654_v44 = vsel %vm284_vm0, %v1646_v47, 0.0  ;;  %v1647_v28 = vsel %vm284_vm0, %v1645_v53, 0.0  ;;  %v1792_v11 = vsel %vm436_vm1, %v1791_v48, %v1790_v0 }
0x1737   :  { %v1655_v62 = vrot.slane %v1654_v44, 4  ;;  %v1648_v8 = vrot.slane %v1647_v28, 4  ;;  %3320 = vst.msk [vmem:[%s5197_s18 + $0x8] sm:$0x3] %vm439_vm2, %v1792_v11 }
0x1739   :  { %v1656_v6 = vadd.f32 %v1655_v62, %v1654_v44  ;;  %v1649_v46 = vadd.f32 %v1648_v8, %v1647_v28 }
0x173b   :  { %v1657_v45 = vrot.slane %v1656_v6, 2  ;;  %v1650_v55 = vrot.slane %v1649_v46, 2 }
0x173d   :  { %v1658_v51 = vadd.f32 %v1657_v45, %v1656_v6  ;;  %v1651_v56 = vadd.f32 %v1650_v55, %v1649_v46 }
0x173f   :  { %v1659_v42 = vrot.slane %v1658_v51, 1  ;;  %v1652_v58 = vrot.slane %v1651_v56, 1 }
0x1741   :  { %v1660_v59 = vadd.f32 %v1659_v42, %v1658_v51  ;;  %v1653_v60 = vadd.f32 %v1652_v58, %v1651_v56 }
0x1743   :  { %v1663_v63 = vpack.c.bf16 %v1660_v59, %v1660_v59  ;;  %v1662_v13 = vpack.c.bf16 %v1653_v60, %v1653_v60 }
0x1745   :  { %v1667_v26 = vunpack.c.l.b16 %v1663_v63  ;;  %v1666_v30 = vunpack.c.l.b16 %v1662_v13 }
0x1747   :  { %v1668_v35 = vsel %vm436_vm1, %v1667_v26, %v1666_v30 }
0x1748   :  { %v1669_v4 = vpack.c.b16 %v1668_v35, %v1668_v35 }
0x174a   :  { %3315 = vmatmul.msk.bf16.vlgmr.msra.gmra.mxu3 %vm284_vm0, %v1669_v4 }
0x174b   :  { %1983 = vmatpush.bf16.msra.mxu3 %v4591_v57 }
0x174f   :  { %1984 = vmatpush.bf16.msra.mxu3 %v4594_v14 }
0x17cd   :  { %v1682_v39 = vpop.f32.mrf.mxu3 }
0x17ce   :  { %v1699_v21 = vadd.f32 %v1698_v40, %v1682_v39 }
0x17d0   :  { %v1702_v22 = vadd.f32 %v4597_v61, %v1699_v21 }
0x17d2   :  { %v1716_v19 = vadd.f32 %v1713_v10, %v1702_v22  ;;  %v1738_v10 = vpop.permute.xlu2 %1737 }
0x17d4   :  { %v3318_v47 = vmul.f32 -1.442695, %v1716_v19 }
0x17d5   :  { %v1684_v48 = vpop.f32.mrf.mxu3 }
0x17d6   :  { %3487 = vpow2.f32 %v3318_v47 }
0x17dc   :  { %v3488_v53 = vpop.eup %3487 }
0x17dd   :  { %v1720_v0 = vadd.f32 1.0, %v3488_v53 }
0x17df   :  { %3489 = vrcp.f32 %v1720_v0  ;;  %v1732_v62 = vand.u32 2147483648, %v1720_v0  ;;  %v1730_v6 = vand.u32 2147483647, %v1720_v0  ;;  %vm1726_vm10 = vweird.f32 %v1720_v0 }
0x17e1   :  { %v1733_v40 = vor.u32 1.1754944e-38, %v1732_v62  ;;  %vm1731_vm12 = vcmp.eq.f32.partialorder %v1730_v6, 8.507059e+37 }
0x17e5   :  { %v3490_v44 = vpop.eup %3489 }
0x17e6   :  { %v1722_v28 = vmul.f32 %v3490_v44, %v1720_v0  ;;  %vm1727_vm9 = vweird.f32 %v3490_v44 }
0x17e7   :  { %vm1728_vm11 = vmor %vm1726_vm10, %vm1727_vm9 }
0x17e8   :  { %v1723_v11 = vsub.f32 1.0, %v1722_v28 }
0x17ea   :  { %v1724_v8 = vmul.f32 %v3490_v44, %v1723_v11 }
0x17ec   :  { %v1725_v46 = vadd.f32 %v3490_v44, %v1724_v8 }
0x17ee   :  { %v1729_v45 = vsel %vm1728_vm11, %v3490_v44, %v1725_v46 }
0x17ef   :  { %v1734_v55 = vsel %vm1731_vm12, %v1733_v40, %v1729_v45 }
0x17f0   :  { %v1740_v51 = vmul.f32 %v1738_v10, %v1734_v55  ;;  %v1747_v59 = vsub.f32 1.0, %v1734_v55  ;;  %v1753_v63 = vmul.f32 %v1734_v55, %v4603_v50 }
0x17f2   :  { %1742 = vrot.lane.b32.xlu0 %v1740_v51, %s4032_s0 }
0x1864   :  { %v1743_v56 = vpop.permute.xlu0 %1742 }
0x1865   :  { %v1745_v42 = vadd.f32 %v1743_v56, %v1702_v22 }
0x1867   :  { %3491 = vtanh.f32 %v1745_v42 }
0x186d   :  { %v3492_v58 = vpop.eup %3491 }
0x186e   :  { %1749 = vrot.lane.b32.xlu2 %v3492_v58, %s4047_s28 }
0x18c8   :  { %v1750_v60 = vpop.permute.xlu2 %1749 }
0x18c9   :  { %v1752_v13 = vmul.f32 %v1750_v60, %v1747_v59 }
0x18cb   :  { %v4698_v26 = vadd.f32 %v1753_v63, %v1752_v13 }
0x18cd   :  { %v1755_v30 = vpack.c.bf16 %v4698_v26, %v4698_v26 }
0x18cf   :  { %1757 = vrot.lane.b32.xlu1 %v1755_v30, %s4047_s28 }
0x1941   :  { %v4703_v35 = vpop.permute.xlu1 %1757 }
0x1942   :  { %3319 = vmatmul.msk.bf16.vlgmr.msrb.gmra.mxu2 %vm284_vm0, %v4703_v35  ;;  %3323 = vmatmul.msk.bf16.vlgmr.msra.gmra.mxu0 %vm284_vm0, %v4703_v35 }
0x1943   :  { %2113 = vmatpush.bf16.msrb.mxu2 %v4514_v12  ;;  %2243 = vmatpush.bf16.msra.mxu0 %v4615_v29 }
0x1947   :  { %2114 = vmatpush.bf16.msrb.mxu2 %v4518_v15  ;;  %2244 = vmatpush.bf16.msra.mxu0 %v4619_v9 }
0x19bf   :  { %v1842_v50 = vpop.f32.mrf.mxu0 }
0x19c0   :  { %v1843_v4 = vadd.f32 %v4522_v17, %v1842_v50 }
0x19c2   :  { %v1847_v39 = vrot.slane %v1843_v4, 1  ;;  %v1848_v21 = vperm.slane %v1843_v4, 0 }
0x19c4   :  { %v1849_v22 = vperm.slane %v1847_v39, 0  ;;  %v1852_v19 = vadd.f32 %v1848_v21, %v4232_v16 }
0x19c5   :  { %v1771_v47 = vpop.f32.mrf.mxu2 }
0x19c6   :  { %v1853_v48 = vadd.f32 %v1849_v22, %v4236_v25  ;;  %3493 = vtanh.f32 %v1852_v19  ;;  %v4717_v12 = vadd.f32 %v4625_v34, %v1771_v47 }
0x19c7   :  { %v1844_v53 = vpop.f32.mrf.mxu0 }
0x19c8   :  { %3495 = vtanh.f32 %v1853_v48  ;;  %v1775_v15 = vsel %vm680_vm8, %v4717_v12, -inf }
0x19c9   :  { %1776 = vmax.xlane.f32.xlu0 %v1775_v15 }
0x19cc   :  { %v3494_v0 = vpop.eup %3493 }
0x19cd   :  { %v1773_v17 = vpop.f32.mrf.mxu2  ;;  %v1856_v44 = vmul.f32 %v4532_v36, %v3494_v0 }
0x19ce   :  { %v3496_v28 = vpop.eup %3495 }
0x19cf   :  { %v1858_v11 = vsel %vm284_vm0, %v1856_v44, 0.0  ;;  %v1857_v62 = vmul.f32 %v4532_v36, %v3496_v28 }
0x19d0   :  { %1859 = vadd.xlane.f32.xlu2 %v1858_v11 }
0x19d1   :  { %v1861_v8 = vsel %vm284_vm0, %v1857_v62, 0.0 }
0x19d2   :  { %1862 = vadd.xlane.f32.xlu1 %v1861_v8 }
0x1a3c   :  { %v4725_v6 = vpop.xlane.xlu0 %1776 }
0x1a3d   :  { %vm1796_vm13 = vcmp.eq.f32.partialorder %v4717_v12, %v4725_v6 }
0x1a3e   :  { %v1797_v46 = vsel %vm1796_vm13, %v4247_v38, 32 }
0x1a3f   :  { %v1798_v40 = vsel %vm680_vm8, %v1797_v46, 2147483647 }
0x1a40   :  { %v1800_v45 = vshra.s32 %v1798_v40, 16  ;;  %v1799_v63 = vand.u32 65535, %v1798_v40 }
0x1a42   :  { %v1802_v10 = vcvt.s32.f32 %v1800_v45  ;;  %v1801_v30 = vcvt.s32.f32 %v1799_v63 }
0x1a43   :  { %v1860_v55 = vpop.xlane.xlu2 %1859 }
0x1a44   :  { %v1864_v51 = vadd.f32 %v1860_v55, %v4245_v37  ;;  %1803 = vmin.xlane.f32.xlu0 %v1802_v10 }
0x1a45   :  { %v1863_v36 = vpop.xlane.xlu1 %1862 }
0x1a46   :  { %v1865_v56 = vadd.f32 %v1863_v36, %v4245_v37  ;;  %v1868_v42 = vperm.slane %v1864_v51, %v4247_v38 }
0x1a48   :  { %v1869_v58 = vperm.slane %v1865_v56, %v4247_v38 }
0x1a4a   :  { %v1870_v59 = vsel %vm436_vm1, %v1869_v58, %v1868_v42 }
0x1a4b   :  { %v1872_v60 = vsel %vm439_vm2, %v1870_v59, -inf }
0x1a4c   :  { %1873 = vmax.xlane.f32.xlu2 %v1872_v60 }
0x1ab7   :  { %v1804_v13 = vpop.xlane.xlu0 %1803 }
0x1ab8   :  { %vm1805_vm14 = vcmp.eq.f32.partialorder %v1802_v10, %v1804_v13  ;;  %v1810_v0 = vcvt.f32.s32 %v1804_v13 }
0x1ab9   :  { %v1806_v50 = vsel %vm1805_vm14, %v1801_v30, inf }
0x1aba   :  { %1807 = vmin.xlane.f32.xlu1 %v1806_v50  ;;  %v1811_v44 = vshll.u32 %v1810_v0, 16 }
0x1abf   :  { %v1874_v4 = vpop.xlane.xlu2 %1873 }
0x1ac0   :  { %v1876_v39 = vperm.slane %v1874_v4, 0  ;;  %v1877_v21 = vperm.slane %v1874_v4, 1 }
0x1ac2   :  { %v1880_v22 = vsub.f32 %v1864_v51, %v1876_v39  ;;  %v1881_v19 = vsub.f32 %v1865_v56, %v1877_v21 }
0x1ac4   :  { %v1882_v47 = vmul.f32 1.442695, %v1880_v22  ;;  %v1884_v48 = vmul.f32 1.442695, %v1881_v19 }
0x1ac6   :  { %3497 = vpow2.f32 %v1882_v47 }
0x1ac7   :  { %3499 = vpow2.f32 %v1884_v48 }
0x1acc   :  { %v3498_v53 = vpop.eup %3497 }
0x1acd   :  { %v3500_v15 = vpop.eup %3499  ;;  %1889 = vperm.xlu0 %3405, %v3498_v53  }
0x1ace   :  { %1892 = vperm.xlu2 %3404, %v3500_v15  }
0x1b28   :  { %v1893_v46 = vpop.permute.xlu2 %1892 }
0x1b29   :  { %v1895_v45 = vperm.slane %v1893_v46, %v4247_v38 }
0x1b2d   :  { %v1808_v17 = vpop.xlane.xlu1 %1807 }
0x1b2e   :  { %v1809_v28 = vcvt.f32.s32 %v1808_v17 }
0x1b30   :  { %v1812_v11 = vadd.s32 %v1811_v44, %v1809_v28 }
0x1b32   :  { %vm1813_vm15 = vcmp.eq.s32.totalorder %v4247_v38, %v1812_v11 }
0x1b33   :  { %v3321_v62 = vsel %vm1813_vm15, 1.0, %v4046_v1 }
0x1b34   :  { %v1816_v8 = vpack.c.bf16 %v3321_v62, %v3321_v62 }
0x1b36   :  { %3322 = vmatmul.msk.bf16.vlgmr.msrb.gmra.mxu3 %vm284_vm0, %v1816_v8 }
0x1b37   :  { %2227 = vmatpush.bf16.msrb.mxu3 %v4553_v31 }
0x1b3b   :  { %2228 = vmatpush.bf16.msrb.mxu3 %v4556_v2 }
0x1b3f   :  { %v1890_v40 = vpop.permute.xlu0 %1889 }
0x1b40   :  { %v1894_v10 = vperm.slane %v1890_v40, %v4247_v38 }
0x1b42   :  { %v1896_v55 = vsel %vm436_vm1, %v1895_v45, %v1894_v10 }
0x1b43   :  { %v1898_v51 = vsel %vm439_vm2, %v1896_v55, 0.0 }
0x1b44   :  { %1899 = vadd.xlane.f32.xlu1 %v1898_v51 }
0x1b46   :  { %3326 = vmatmul.msk.bf16.vlgmr.msra.gmra.mxu3 %vm284_vm0, %v4703_v35 }
0x1b47   :  { %2374 = vmatpush.bf16.msra.mxu3 %v4565_v52 }
0x1b4b   :  { %2375 = vmatpush.bf16.msra.mxu3 %v4568_v41 }
0x1bb7   :  { %v1900_v31 = vpop.xlane.xlu1 %1899 }
0x1bb8   :  { %3501 = vrcp.f32 %v1900_v31 }
0x1bb9   :  { %v1829_v2 = vpop.f32.mrf.mxu3 }
0x1bba   :  { %v1935_v36 = vpack.c.bf16 %v1829_v2, %v1829_v2 }
0x1bbc   :  { %3325 = vmatmul.msk.bf16.vlgmr.msra.gmra.mxu2 %vm284_vm0, %v1935_v36 }
0x1bbd   :  { %2316 = vmatpush.bf16.msra.mxu2 %v4668_v27 }
0x1bbe   :  { %v3502_v56 = vpop.eup %3501 }
0x1bbf   :  { %v1904_v42 = vperm.slane %v3502_v56, 1  ;;  %v1903_v58 = vperm.slane %v3502_v56, 0 }
0x1bc1   :  { %v1831_v59 = vpop.f32.mrf.mxu3  ;;  %v1908_v60 = vmul.f32 %v3500_v15, %v1904_v42  ;;  %v1907_v63 = vmul.f32 %v3498_v53, %v1903_v58  ;;  %2317 = vmatpush.bf16.msra.mxu2 %v4674_v33 }
0x1bc3   :  { %1916 = vperm.xlu0 %3405, %v1908_v60   ;;  %1911 = vperm.xlu1 %3403, %v1907_v63  }
0x1bc9   :  { %v1986_v52 = vpop.f32.mrf.mxu3 }
0x1bca   :  { %v1987_v41 = vadd.f32 %v4574_v49, %v1986_v52 }
0x1bcc   :  { %2011 = vrot.lane.b32.xlu2 %v1987_v41, %s4032_s0 }
0x1bd1   :  { %v1988_v35 = vpop.f32.mrf.mxu3 }
0x1c35   :  { %v1917_v13 = vpop.permute.xlu0 %1916  ;;  %v1912_v30 = vpop.permute.xlu1 %1911 }
0x1c36   :  { %v1920_v50 = vmul.f32 %v1917_v13, %v4304_v32  ;;  %v2065_v4 = vperm.slane %v1917_v13, %v4247_v38  ;;  %v1919_v39 = vmul.f32 %v1912_v30, %v4279_v18  ;;  %v2064_v21 = vperm.slane %v1912_v30, %v4247_v38 }
0x1c38   :  { %v1928_v22 = vsel %vm284_vm0, %v1920_v50, 0.0  ;;  %v1921_v19 = vsel %vm284_vm0, %v1919_v39, 0.0  ;;  %v2066_v47 = vsel %vm436_vm1, %v2065_v4, %v2064_v21 }
0x1c39   :  { %v1929_v49 = vrot.slane %v1928_v22, 4  ;;  %v1922_v48 = vrot.slane %v1921_v19, 4  ;;  %3329 = vst.msk [vmem:[%s5197_s18 + $0xa] sm:$0x3] %vm439_vm2, %v2066_v47 }
0x1c3b   :  { %v1930_v53 = vadd.f32 %v1929_v49, %v1928_v22  ;;  %v1923_v15 = vadd.f32 %v1922_v48, %v1921_v19 }
0x1c3d   :  { %v1931_v0 = vrot.slane %v1930_v53, 2  ;;  %v1924_v17 = vrot.slane %v1923_v15, 2 }
0x1c3f   :  { %v1932_v44 = vadd.f32 %v1931_v0, %v1930_v53  ;;  %v1925_v28 = vadd.f32 %v1924_v17, %v1923_v15  ;;  %v1972_v11 = vpop.f32.mrf.mxu2 }
0x1c41   :  { %v1933_v62 = vrot.slane %v1932_v44, 1  ;;  %v1926_v8 = vrot.slane %v1925_v28, 1 }
0x1c43   :  { %v1934_v46 = vadd.f32 %v1933_v62, %v1932_v44  ;;  %v1927_v40 = vadd.f32 %v1926_v8, %v1925_v28  ;;  %v4785_v62 = vld [vmem:[#allocation10 + $0x8] sm:$0xff] }
0x1c45   :  { %v1937_v45 = vpack.c.bf16 %v1934_v46, %v1934_v46  ;;  %v1936_v10 = vpack.c.bf16 %v1927_v40, %v1927_v40 }
0x1c47   :  { %v1941_v55 = vunpack.c.l.b16 %v1937_v45  ;;  %v1940_v51 = vunpack.c.l.b16 %v1936_v10  ;;  %v1974_v31 = vpop.f32.mrf.mxu2  ;;  %v4798_v10 = vld [vmem:[#allocation12] ss:$0 sm:$0xff] }
0x1c49   :  { %v1942_v2 = vsel %vm436_vm1, %v1941_v55, %v1940_v51 }
0x1c4a   :  { %v1943_v36 = vpack.c.b16 %v1942_v2, %v1942_v2 }
0x1c4c   :  { %3324 = vmatmul.msk.bf16.vlgmr.msra.gmra.mxu1 %vm284_vm0, %v1943_v36 }
0x1c4d   :  { %2257 = vmatpush.bf16.msra.mxu1 %v4591_v57 }
0x1c51   :  { %2258 = vmatpush.bf16.msra.mxu1 %v4594_v14 }
0x1cc9   :  { %v1956_v56 = vpop.f32.mrf.mxu1 }
0x1cca   :  { %v1973_v42 = vadd.f32 %v1972_v11, %v1956_v56 }
0x1ccc   :  { %v1976_v58 = vadd.f32 %v4597_v61, %v1973_v42  ;;  %v2012_v61 = vpop.permute.xlu2 %2011  ;;  %v4803_v42 = vld [vmem:[#allocation16] ss:$0 sm:$0xff] }
0x1cce   :  { %v1990_v59 = vadd.f32 %v1987_v41, %v1976_v58 }
0x1cd0   :  { %v3327_v60 = vmul.f32 -1.442695, %v1990_v59 }
0x1cd1   :  { %v1958_v63 = vpop.f32.mrf.mxu1 }
0x1cd2   :  { %3503 = vpow2.f32 %v3327_v60 }
0x1cd8   :  { %v3504_v52 = vpop.eup %3503 }
0x1cd9   :  { %v1994_v35 = vadd.f32 1.0, %v3504_v52 }
0x1cdb   :  { %3505 = vrcp.f32 %v1994_v35  ;;  %v2006_v4 = vand.u32 2147483648, %v1994_v35  ;;  %v2004_v57 = vand.u32 2147483647, %v1994_v35  ;;  %vm2000_vm4 = vweird.f32 %v1994_v35 }
0x1cdd   :  { %v2007_v14 = vor.u32 1.1754944e-38, %v2006_v4  ;;  %vm2005_vm6 = vcmp.eq.f32.partialorder %v2004_v57, 8.507059e+37 }
0x1ce1   :  { %v3506_v13 = vpop.eup %3505 }
0x1ce2   :  { %v1996_v30 = vmul.f32 %v3506_v13, %v1994_v35  ;;  %vm2001_vm3 = vweird.f32 %v3506_v13 }
0x1ce3   :  { %vm2002_vm5 = vmor %vm2000_vm4, %vm2001_vm3 }
0x1ce4   :  { %v1997_v50 = vsub.f32 1.0, %v1996_v30 }
0x1ce6   :  { %v1998_v39 = vmul.f32 %v3506_v13, %v1997_v50 }
0x1ce8   :  { %v1999_v21 = vadd.f32 %v3506_v13, %v1998_v39 }
0x1cea   :  { %v2003_v22 = vsel %vm2002_vm5, %v3506_v13, %v1999_v21 }
0x1ceb   :  { %v2008_v41 = vsel %vm2005_vm6, %v2007_v14, %v2003_v22 }
0x1cec   :  { %v2014_v19 = vmul.f32 %v2012_v61, %v2008_v41  ;;  %v2021_v53 = vsub.f32 1.0, %v2008_v41  ;;  %v2027_v0 = vmul.f32 %v2008_v41, %v4698_v26  ;;  %v4789_v26 = vld [vmem:[#allocation10] sm:$0xff] }
0x1cee   :  { %2016 = vrot.lane.b32.xlu0 %v2014_v19, %s4032_s0 }
0x1d60   :  { %v2017_v47 = vpop.permute.xlu0 %2016 }
0x1d61   :  { %v2019_v49 = vadd.f32 %v2017_v47, %v1976_v58 }
0x1d63   :  { %3507 = vtanh.f32 %v2019_v49 }
0x1d69   :  { %v3508_v48 = vpop.eup %3507 }
0x1d6a   :  { %2023 = vrot.lane.b32.xlu2 %v3508_v48, %s4047_s28 }
0x1dc4   :  { %v2024_v15 = vpop.permute.xlu2 %2023 }
0x1dc5   :  { %v2026_v17 = vmul.f32 %v2024_v15, %v2021_v53 }
0x1dc7   :  { %v4774_v44 = vadd.f32 %v2027_v0, %v2026_v17 }
0x1dc9   :  { %v2029_v28 = vpack.c.bf16 %v4774_v44, %v4774_v44 }
0x1dcb   :  { %2031 = vrot.lane.b32.xlu0 %v2029_v28, %s4047_s28 }
0x1e3d   :  { %v4779_v11 = vpop.permute.xlu0 %2031 }
0x1e3e   :  { %3328 = vmatmul.msk.bf16.vlgmr.msrb.gmra.mxu0 %vm284_vm0, %v4779_v11  ;;  %3332 = vmatmul.msk.bf16.vlgmr.msrb.gmra.mxu2 %vm284_vm0, %v4779_v11 }
0x1e3f   :  { %2387 = vmatpush.bf16.msrb.mxu0 %v4785_v62  ;;  %2517 = vmatpush.bf16.msrb.mxu2 %v4615_v29 }
0x1e43   :  { %2388 = vmatpush.bf16.msrb.mxu0 %v4789_v26  ;;  %2518 = vmatpush.bf16.msrb.mxu2 %v4619_v9 }
0x1ebb   :  { %v2045_v8 = vpop.f32.mrf.mxu0 }
0x1ebc   :  { %v4794_v46 = vadd.f32 %v4625_v34, %v2045_v8 }
0x1ebe   :  { %v2049_v40 = vsel %vm680_vm8, %v4794_v46, -inf }
0x1ebf   :  { %2050 = vmax.xlane.f32.xlu1 %v2049_v40 }
0x1ec1   :  { %v2116_v45 = vpop.f32.mrf.mxu2 }
0x1ec2   :  { %v2117_v55 = vadd.f32 %v4798_v10, %v2116_v45 }
0x1ec3   :  { %v2047_v29 = vpop.f32.mrf.mxu0 }
0x1ec4   :  { %v2121_v51 = vrot.slane %v2117_v55, 1  ;;  %v2122_v31 = vperm.slane %v2117_v55, 0 }
0x1ec6   :  { %v2123_v2 = vperm.slane %v2121_v51, 0  ;;  %v2126_v36 = vadd.f32 %v2122_v31, %v4232_v16 }
0x1ec8   :  { %v2127_v9 = vadd.f32 %v2123_v2, %v4236_v25  ;;  %3509 = vtanh.f32 %v2126_v36 }
0x1ec9   :  { %v2118_v34 = vpop.f32.mrf.mxu2 }
0x1eca   :  { %3511 = vtanh.f32 %v2127_v9 }
0x1ece   :  { %v3510_v56 = vpop.eup %3509 }
0x1ecf   :  { %v2130_v58 = vmul.f32 %v4803_v42, %v3510_v56 }
0x1ed0   :  { %v3512_v59 = vpop.eup %3511 }
0x1ed1   :  { %v2132_v60 = vsel %vm284_vm0, %v2130_v58, 0.0  ;;  %v2131_v63 = vmul.f32 %v4803_v42, %v3512_v59  ;;  %v4824_v58 = vld [vmem:[#allocation19 + $0x8] sm:$0xff]  ;;  %v4827_v59 = vld [vmem:[#allocation19] sm:$0xff] }
0x1ed2   :  { %2133 = vadd.xlane.f32.xlu2 %v2132_v60  ;;  %v4832_v60 = vld [vmem:[#allocation9 + $0x8] sm:$0xff] }
0x1ed3   :  { %v2135_v52 = vsel %vm284_vm0, %v2131_v63, 0.0 }
0x1ed4   :  { %2136 = vadd.xlane.f32.xlu0 %v2135_v52 }
0x1f32   :  { %v4809_v35 = vpop.xlane.xlu1 %2050 }
0x1f33   :  { %vm2070_vm7 = vcmp.eq.f32.partialorder %v4794_v46, %v4809_v35 }
0x1f34   :  { %v2071_v13 = vsel %vm2070_vm7, %v4247_v38, 32 }
0x1f35   :  { %v2072_v30 = vsel %vm680_vm8, %v2071_v13, 2147483647  ;;  %v4835_v13 = vld [vmem:[#allocation9] sm:$0xff] }
0x1f36   :  { %v2074_v50 = vshra.s32 %v2072_v30, 16  ;;  %v2073_v47 = vand.u32 65535, %v2072_v30 }
0x1f38   :  { %v2076_v4 = vcvt.s32.f32 %v2074_v50  ;;  %v2075_v48 = vcvt.s32.f32 %v2073_v47 }
0x1f3a   :  { %2077 = vmin.xlane.f32.xlu1 %v2076_v4 }
0x1f45   :  { %v2134_v39 = vpop.xlane.xlu2 %2133 }
0x1f46   :  { %v2138_v57 = vadd.f32 %v2134_v39, %v4245_v37 }
0x1f47   :  { %v2137_v21 = vpop.xlane.xlu0 %2136 }
0x1f48   :  { %v2139_v14 = vadd.f32 %v2137_v21, %v4245_v37  ;;  %v2142_v22 = vperm.slane %v2138_v57, %v4247_v38 }
0x1f4a   :  { %v2143_v61 = vperm.slane %v2139_v14, %v4247_v38 }
0x1f4c   :  { %v2144_v41 = vsel %vm436_vm1, %v2143_v61, %v2142_v22  ;;  %v4845_v61 = vld [vmem:[#allocation24] ss:$0 sm:$0xff] }
0x1f4d   :  { %v2146_v19 = vsel %vm439_vm2, %v2144_v41, -inf }
0x1f4e   :  { %2147 = vmax.xlane.f32.xlu2 %v2146_v19 }
0x1fad   :  { %v2078_v49 = vpop.xlane.xlu1 %2077 }
0x1fae   :  { %vm2079_vm9 = vcmp.eq.f32.partialorder %v2076_v4, %v2078_v49  ;;  %v2084_v51 = vcvt.f32.s32 %v2078_v49 }
0x1faf   :  { %v2080_v53 = vsel %vm2079_vm9, %v2075_v48, inf }
0x1fb0   :  { %2081 = vmin.xlane.f32.xlu0 %v2080_v53  ;;  %v2085_v2 = vshll.u32 %v2084_v51, 16 }
0x1fc1   :  { %v2148_v15 = vpop.xlane.xlu2 %2147 }
0x1fc2   :  { %v2150_v0 = vperm.slane %v2148_v15, 0  ;;  %v2151_v17 = vperm.slane %v2148_v15, 1 }
0x1fc4   :  { %v2154_v28 = vsub.f32 %v2138_v57, %v2150_v0  ;;  %v2155_v8 = vsub.f32 %v2139_v14, %v2151_v17 }
0x1fc6   :  { %v2156_v40 = vmul.f32 1.442695, %v2154_v28  ;;  %v2158_v45 = vmul.f32 1.442695, %v2155_v8 }
0x1fc8   :  { %3513 = vpow2.f32 %v2156_v40 }
0x1fc9   :  { %3515 = vpow2.f32 %v2158_v45 }
0x1fce   :  { %v3514_v55 = vpop.eup %3513 }
0x1fcf   :  { %v3516_v29 = vpop.eup %3515  ;;  %2163 = vperm.xlu1 %3403, %v3514_v55  }
0x1fd0   :  { %2166 = vperm.xlu2 %3404, %v3516_v29  }
0x2023   :  { %v2082_v31 = vpop.xlane.xlu0 %2081 }
0x2024   :  { %v2083_v36 = vcvt.f32.s32 %v2082_v31 }
0x2026   :  { %v2086_v9 = vadd.s32 %v2085_v2, %v2083_v36 }
0x2028   :  { %vm2087_vm10 = vcmp.eq.s32.totalorder %v4247_v38, %v2086_v9 }
0x2029   :  { %v3330_v34 = vsel %vm2087_vm10, 1.0, %v4046_v1 }
0x202a   :  { %v2090_v56 = vpack.c.bf16 %v3330_v34, %v3330_v34  ;;  %v2167_v63 = vpop.permute.xlu2 %2166 }
0x202b   :  { %v2169_v30 = vperm.slane %v2167_v63, %v4247_v38 }
0x202c   :  { %3331 = vmatmul.msk.bf16.vlgmr.msrb.gmra.mxu1 %vm284_vm0, %v2090_v56 }
0x202d   :  { %2501 = vmatpush.bf16.msrb.mxu1 %v4824_v58 }
0x2031   :  { %2502 = vmatpush.bf16.msrb.mxu1 %v4827_v59 }
0x203c   :  { %3335 = vmatmul.msk.bf16.vlgmr.msra.gmra.mxu1 %vm284_vm0, %v4779_v11 }
0x203d   :  { %2648 = vmatpush.bf16.msra.mxu1 %v4832_v60 }
0x2041   :  { %v2164_v52 = vpop.permute.xlu1 %2163  ;;  %2649 = vmatpush.bf16.msra.mxu1 %v4835_v13 }
0x2042   :  { %v2168_v50 = vperm.slane %v2164_v52, %v4247_v38 }
0x2044   :  { %v2170_v4 = vsel %vm436_vm1, %v2169_v30, %v2168_v50 }
0x2045   :  { %v2172_v39 = vsel %vm439_vm2, %v2170_v4, 0.0 }
0x2046   :  { %2173 = vadd.xlane.f32.xlu0 %v2172_v39 }
0x20a9   :  { %v2103_v11 = vpop.f32.mrf.mxu1 }
0x20aa   :  { %v2209_v57 = vpack.c.bf16 %v2103_v11, %v2103_v11 }
0x20ac   :  { %3334 = vmatmul.msk.bf16.vlgmr.msra.gmra.mxu0 %vm284_vm0, %v2209_v57 }
0x20ad   :  { %2590 = vmatpush.bf16.msra.mxu0 %v4668_v27 }
0x20b1   :  { %v2105_v21 = vpop.f32.mrf.mxu1  ;;  %2591 = vmatpush.bf16.msra.mxu0 %v4674_v33 }
0x20b9   :  { %v2260_v14 = vpop.f32.mrf.mxu1  ;;  %v2174_v22 = vpop.xlane.xlu0 %2173 }
0x20ba   :  { %v2261_v41 = vadd.f32 %v4845_v61, %v2260_v14  ;;  %3517 = vrcp.f32 %v2174_v22 }
0x20bc   :  { %2285 = vrot.lane.b32.xlu2 %v2261_v41, %s4032_s0 }
0x20c0   :  { %v3518_v19 = vpop.eup %3517 }
0x20c1   :  { %v2262_v47 = vpop.f32.mrf.mxu1  ;;  %v2178_v49 = vperm.slane %v3518_v19, 1  ;;  %v2177_v48 = vperm.slane %v3518_v19, 0 }
0x20c2   :  { %v4862_v47 = vld [vmem:[#allocation21 + $0x8] sm:$0xff] }
0x20c3   :  { %v2182_v53 = vmul.f32 %v3516_v29, %v2178_v49  ;;  %v2181_v15 = vmul.f32 %v3514_v55, %v2177_v48  ;;  %v4865_v49 = vld [vmem:[#allocation21] sm:$0xff] }
0x20c5   :  { %2190 = vperm.xlu1 %3403, %v2182_v53   ;;  %2185 = vperm.xlu0 %3405, %v2181_v15   ;;  %v4868_v15 = vld [vmem:[#allocation22] ss:$0 sm:$0xff] }
0x2129   :  { %v2246_v27 = vpop.f32.mrf.mxu0 }
0x2131   :  { %v2248_v0 = vpop.f32.mrf.mxu0 }
0x2137   :  { %v2191_v33 = vpop.permute.xlu1 %2190  ;;  %v2186_v17 = vpop.permute.xlu0 %2185 }
0x2138   :  { %v2194_v28 = vmul.f32 %v2191_v33, %v4304_v32  ;;  %v2339_v8 = vperm.slane %v2191_v33, %v4247_v38  ;;  %v2193_v40 = vmul.f32 %v2186_v17, %v4279_v18  ;;  %v2338_v45 = vperm.slane %v2186_v17, %v4247_v38 }
0x213a   :  { %v2202_v51 = vsel %vm284_vm0, %v2194_v28, 0.0  ;;  %v2195_v31 = vsel %vm284_vm0, %v2193_v40, 0.0  ;;  %v2340_v55 = vsel %vm436_vm1, %v2339_v8, %v2338_v45 }
0x213b   :  { %v2203_v29 = vrot.slane %v2202_v51, 4  ;;  %v2196_v2 = vrot.slane %v2195_v31, 4  ;;  %3338 = vst.msk [vmem:[%s5197_s18 + $0xc] sm:$0x3] %vm439_vm2, %v2340_v55 }
0x213d   :  { %v2204_v36 = vadd.f32 %v2203_v29, %v2202_v51  ;;  %v2197_v9 = vadd.f32 %v2196_v2, %v2195_v31 }
0x213f   :  { %v2205_v34 = vrot.slane %v2204_v36, 2  ;;  %v2198_v56 = vrot.slane %v2197_v9, 2 }
0x2141   :  { %v2206_v63 = vadd.f32 %v2205_v34, %v2204_v36  ;;  %v2199_v52 = vadd.f32 %v2198_v56, %v2197_v9 }
0x2143   :  { %v2207_v30 = vrot.slane %v2206_v63, 1  ;;  %v2200_v50 = vrot.slane %v2199_v52, 1 }
0x2145   :  { %v2208_v4 = vadd.f32 %v2207_v30, %v2206_v63  ;;  %v2201_v39 = vadd.f32 %v2200_v50, %v2199_v52 }
0x2147   :  { %v2211_v11 = vpack.c.bf16 %v2208_v4, %v2208_v4  ;;  %v2210_v57 = vpack.c.bf16 %v2201_v39, %v2201_v39 }
0x2149   :  { %v2215_v21 = vunpack.c.l.b16 %v2211_v11  ;;  %v2214_v14 = vunpack.c.l.b16 %v2210_v57 }
0x214b   :  { %v2216_v22 = vsel %vm436_vm1, %v2215_v21, %v2214_v14 }
0x214c   :  { %v2217_v19 = vpack.c.b16 %v2216_v22, %v2216_v22  ;;  %v4886_v22 = vld [vmem:[#allocation18 + $0x8] sm:$0xff] }
0x214e   :  { %3333 = vmatmul.msk.bf16.vlgmr.msrb.gmra.mxu3 %vm284_vm0, %v2217_v19 }
0x214f   :  { %2531 = vmatpush.bf16.msrb.mxu3 %v4862_v47 }
0x2153   :  { %2532 = vmatpush.bf16.msrb.mxu3 %v4865_v49 }
0x21d1   :  { %v2230_v48 = vpop.f32.mrf.mxu3 }
0x21d2   :  { %v2247_v53 = vadd.f32 %v2246_v27, %v2230_v48 }
0x21d4   :  { %v2250_v0 = vadd.f32 %v4868_v15, %v2247_v53 }
0x21d6   :  { %v2264_v33 = vadd.f32 %v2261_v41, %v2250_v0  ;;  %v2286_v41 = vpop.permute.xlu2 %2285 }
0x21d8   :  { %v3336_v17 = vmul.f32 -1.442695, %v2264_v33 }
0x21d9   :  { %v2232_v28 = vpop.f32.mrf.mxu3 }
0x21da   :  { %3519 = vpow2.f32 %v3336_v17 }
0x21e0   :  { %v3520_v8 = vpop.eup %3519 }
0x21e1   :  { %v2268_v40 = vadd.f32 1.0, %v3520_v8 }
0x21e3   :  { %3521 = vrcp.f32 %v2268_v40  ;;  %v2280_v55 = vand.u32 2147483648, %v2268_v40  ;;  %v2278_v2 = vand.u32 2147483647, %v2268_v40  ;;  %vm2274_vm12 = vweird.f32 %v2268_v40 }
0x21e5   :  { %v2281_v27 = vor.u32 1.1754944e-38, %v2280_v55  ;;  %vm2279_vm14 = vcmp.eq.f32.partialorder %v2278_v2, 8.507059e+37 }
0x21e9   :  { %v3522_v45 = vpop.eup %3521 }
0x21ea   :  { %v2270_v51 = vmul.f32 %v3522_v45, %v2268_v40  ;;  %vm2275_vm11 = vweird.f32 %v3522_v45  ;;  %v4899_v40 = vld [vmem:[%s5195_s16] ss:$0 sm:$0xff] }
0x21eb   :  { %vm2276_vm13 = vmor %vm2274_vm12, %vm2275_vm11 }
0x21ec   :  { %v2271_v31 = vsub.f32 1.0, %v2270_v51 }
0x21ee   :  { %v2272_v29 = vmul.f32 %v3522_v45, %v2271_v31 }
0x21f0   :  { %v2273_v36 = vadd.f32 %v3522_v45, %v2272_v29 }
0x21f2   :  { %v2277_v9 = vsel %vm2276_vm13, %v3522_v45, %v2273_v36 }
0x21f3   :  { %v2282_v34 = vsel %vm2279_vm14, %v2281_v27, %v2277_v9 }
0x21f4   :  { %v2288_v56 = vmul.f32 %v2286_v41, %v2282_v34  ;;  %v2295_v50 = vsub.f32 1.0, %v2282_v34  ;;  %v2301_v39 = vmul.f32 %v2282_v34, %v4774_v44  ;;  %v4890_v44 = vld [vmem:[#allocation18] sm:$0xff] }
0x21f6   :  { %2290 = vrot.lane.b32.xlu0 %v2288_v56, %s4032_s0 }
0x2268   :  { %v2291_v63 = vpop.permute.xlu0 %2290 }
0x2269   :  { %v2293_v52 = vadd.f32 %v2291_v63, %v2250_v0 }
0x226b   :  { %3523 = vtanh.f32 %v2293_v52 }
0x2271   :  { %v3524_v30 = vpop.eup %3523 }
0x2272   :  { %2297 = vrot.lane.b32.xlu1 %v3524_v30, %s4047_s28 }
0x22e4   :  { %v2298_v4 = vpop.permute.xlu1 %2297 }
0x22e5   :  { %v2300_v11 = vmul.f32 %v2298_v4, %v2295_v50 }
0x22e7   :  { %v4874_v57 = vadd.f32 %v2301_v39, %v2300_v11 }
0x22e9   :  { %v2303_v21 = vpack.c.bf16 %v4874_v57, %v4874_v57 }
0x22eb   :  { %2305 = vrot.lane.b32.xlu2 %v2303_v21, %s4047_s28 }
0x2345   :  { %v4879_v14 = vpop.permute.xlu2 %2305 }
0x2346   :  { %3337 = vmatmul.msk.bf16.vlgmr.msra.gmra.mxu2 %vm284_vm0, %v4879_v14  ;;  %3341 = vmatmul.msk.bf16.vlgmr.msrb.gmra.mxu0 %vm284_vm0, %v4879_v14 }
0x2347   :  { %2661 = vmatpush.bf16.msra.mxu2 %v4785_v62  ;;  %2791 = vmatpush.bf16.msrb.mxu0 %v4886_v22 }
0x234b   :  { %2662 = vmatpush.bf16.msra.mxu2 %v4789_v26  ;;  %2792 = vmatpush.bf16.msrb.mxu0 %v4890_v44 }
0x23c3   :  { %v2390_v19 = vpop.f32.mrf.mxu0 }
0x23c4   :  { %v2391_v48 = vadd.f32 %v4798_v10, %v2390_v19 }
0x23c6   :  { %v2395_v53 = vrot.slane %v2391_v48, 1  ;;  %v2396_v0 = vperm.slane %v2391_v48, 0 }
0x23c8   :  { %v2397_v33 = vperm.slane %v2395_v53, 0  ;;  %v2400_v17 = vadd.f32 %v2396_v0, %v4232_v16 }
0x23c9   :  { %v2319_v28 = vpop.f32.mrf.mxu2 }
0x23ca   :  { %v2401_v8 = vadd.f32 %v2397_v33, %v4236_v25  ;;  %3525 = vtanh.f32 %v2400_v17  ;;  %v4902_v45 = vadd.f32 %v4899_v40, %v2319_v28 }
0x23cb   :  { %v2392_v51 = vpop.f32.mrf.mxu0 }
0x23cc   :  { %3527 = vtanh.f32 %v2401_v8  ;;  %v2323_v31 = vsel %vm680_vm8, %v4902_v45, -inf }
0x23cd   :  { %2324 = vmax.xlane.f32.xlu0 %v2323_v31 }
0x23d0   :  { %v3526_v55 = vpop.eup %3525 }
0x23d1   :  { %v2321_v29 = vpop.f32.mrf.mxu2  ;;  %v2404_v2 = vmul.f32 %v4803_v42, %v3526_v55 }
0x23d2   :  { %v3528_v36 = vpop.eup %3527 }
0x23d3   :  { %v2406_v27 = vsel %vm284_vm0, %v2404_v2, 0.0  ;;  %v2405_v9 = vmul.f32 %v4803_v42, %v3528_v36 }
0x23d4   :  { %2407 = vadd.xlane.f32.xlu1 %v2406_v27 }
0x23d5   :  { %v2409_v41 = vsel %vm284_vm0, %v2405_v9, 0.0 }
0x23d6   :  { %2410 = vadd.xlane.f32.xlu2 %v2409_v41 }
0x2440   :  { %v4910_v34 = vpop.xlane.xlu0 %2324 }
0x2441   :  { %vm2344_vm15 = vcmp.eq.f32.partialorder %v4902_v45, %v4910_v34 }
0x2442   :  { %v2345_v56 = vsel %vm2344_vm15, %v4247_v38, 32 }
0x2443   :  { %v2346_v63 = vsel %vm680_vm8, %v2345_v56, 2147483647 }
0x2444   :  { %v2348_v52 = vshra.s32 %v2346_v63, 16  ;;  %v2347_v0 = vand.u32 65535, %v2346_v63 }
0x2446   :  { %v2350_v30 = vcvt.s32.f32 %v2348_v52  ;;  %v2349_v17 = vcvt.s32.f32 %v2347_v0 }
0x2447   :  { %v2408_v50 = vpop.xlane.xlu1 %2407 }
0x2448   :  { %v2412_v4 = vadd.f32 %v2408_v50, %v4245_v37  ;;  %2351 = vmin.xlane.f32.xlu0 %v2350_v30 }
0x2449   :  { %v2411_v39 = vpop.xlane.xlu2 %2410 }
0x244a   :  { %v2413_v11 = vadd.f32 %v2411_v39, %v4245_v37  ;;  %v2416_v21 = vperm.slane %v2412_v4, %v4247_v38 }
0x244c   :  { %v2417_v19 = vperm.slane %v2413_v11, %v4247_v38 }
0x244e   :  { %v2418_v48 = vsel %vm436_vm1, %v2417_v19, %v2416_v21 }
0x244f   :  { %v2420_v53 = vsel %vm439_vm2, %v2418_v48, -inf }
0x2450   :  { %2421 = vmax.xlane.f32.xlu1 %v2420_v53 }
0x24bb   :  { %v2352_v33 = vpop.xlane.xlu0 %2351 }
0x24bc   :  { %vm2353_vm3 = vcmp.eq.f32.partialorder %v2350_v30, %v2352_v33  ;;  %v2358_v41 = vcvt.f32.s32 %v2352_v33 }
0x24bd   :  { %v2354_v28 = vsel %vm2353_vm3, %v2349_v17, inf }
0x24be   :  { %2355 = vmin.xlane.f32.xlu2 %v2354_v28  ;;  %v2359_v63 = vshll.u32 %v2358_v41, 16  ;;  %v4939_v28 = vld [vmem:[%s5194_s15 + $0x8] sm:$0xff] }
0x24c3   :  { %v2422_v8 = vpop.xlane.xlu1 %2421 }
0x24c4   :  { %v2424_v51 = vperm.slane %v2422_v8, 0  ;;  %v2425_v31 = vperm.slane %v2422_v8, 1 }
0x24c6   :  { %v2428_v55 = vsub.f32 %v2412_v4, %v2424_v51  ;;  %v2429_v29 = vsub.f32 %v2413_v11, %v2425_v31 }
0x24c8   :  { %v2430_v2 = vmul.f32 1.442695, %v2428_v55  ;;  %v2432_v36 = vmul.f32 1.442695, %v2429_v29 }
0x24ca   :  { %3529 = vpow2.f32 %v2430_v2 }
0x24cb   :  { %3531 = vpow2.f32 %v2432_v36 }
0x24d0   :  { %v3530_v27 = vpop.eup %3529 }
0x24d1   :  { %v3532_v9 = vpop.eup %3531  ;;  %2437 = vperm.xlu0 %3405, %v3530_v27  }
0x24d2   :  { %2440 = vperm.xlu1 %3403, %v3532_v9  }
0x2531   :  { %v2356_v56 = vpop.xlane.xlu2 %2355 }
0x2532   :  { %v2357_v52 = vcvt.f32.s32 %v2356_v56 }
0x2534   :  { %v2360_v30 = vadd.s32 %v2359_v63, %v2357_v52 }
0x2536   :  { %vm2361_vm4 = vcmp.eq.s32.totalorder %v4247_v38, %v2360_v30 }
0x2537   :  { %v3339_v50 = vsel %vm2361_vm4, 1.0, %v4046_v1 }
0x2538   :  { %v2364_v39 = vpack.c.bf16 %v3339_v50, %v3339_v50 }
0x253a   :  { %3340 = vmatmul.msk.bf16.vlgmr.msra.gmra.mxu3 %vm284_vm0, %v2364_v39 }
0x253b   :  { %2775 = vmatpush.bf16.msra.mxu3 %v4824_v58 }
0x253f   :  { %2776 = vmatpush.bf16.msra.mxu3 %v4827_v59 }
0x2543   :  { %v2438_v4 = vpop.permute.xlu0 %2437 }
0x2544   :  { %v2441_v11 = vpop.permute.xlu1 %2440  ;;  %v2442_v21 = vperm.slane %v2438_v4, %v4247_v38 }
0x2545   :  { %v2443_v19 = vperm.slane %v2441_v11, %v4247_v38 }
0x2547   :  { %v2444_v48 = vsel %vm436_vm1, %v2443_v19, %v2442_v21 }
0x2548   :  { %v2446_v53 = vsel %vm439_vm2, %v2444_v48, 0.0 }
0x2549   :  { %2447 = vadd.xlane.f32.xlu2 %v2446_v53 }
0x254a   :  { %3344 = vmatmul.msk.bf16.vlgmr.msrb.gmra.mxu3 %vm284_vm0, %v4879_v14 }
0x254b   :  { %2922 = vmatpush.bf16.msrb.mxu3 %v4832_v60  ;;  %v4945_v60 = vld [vmem:[%s5194_s15] sm:$0xff] }
0x254f   :  { %2923 = vmatpush.bf16.msrb.mxu3 %v4835_v13 }
0x25bc   :  { %v2448_v0 = vpop.xlane.xlu2 %2447 }
0x25bd   :  { %3533 = vrcp.f32 %v2448_v0  ;;  %v2377_v33 = vpop.f32.mrf.mxu3 }
0x25be   :  { %v2483_v17 = vpack.c.bf16 %v2377_v33, %v2377_v33 }
0x25c0   :  { %3343 = vmatmul.msk.bf16.vlgmr.msrb.gmra.mxu2 %vm284_vm0, %v2483_v17 }
0x25c1   :  { %2864 = vmatpush.bf16.msrb.mxu2 %v4939_v28 }
0x25c3   :  { %v3534_v8 = vpop.eup %3533 }
0x25c4   :  { %v2452_v51 = vperm.slane %v3534_v8, 1  ;;  %v2451_v14 = vperm.slane %v3534_v8, 0 }
0x25c5   :  { %v2379_v31 = vpop.f32.mrf.mxu3  ;;  %2865 = vmatpush.bf16.msrb.mxu2 %v4945_v60 }
0x25c6   :  { %v2456_v13 = vmul.f32 %v3532_v9, %v2452_v51  ;;  %v2455_v55 = vmul.f32 %v3530_v27, %v2451_v14 }
0x25c8   :  { %2464 = vperm.xlu0 %3405, %v2456_v13   ;;  %2459 = vperm.xlu2 %3404, %v2455_v55  }
0x25cd   :  { %v2534_v29 = vpop.f32.mrf.mxu3 }
0x25ce   :  { %v2535_v2 = vadd.f32 %v4845_v61, %v2534_v29 }
0x25d0   :  { %2559 = vrot.lane.b32.xlu1 %v2535_v2, %s4032_s0 }
0x25d5   :  { %v2536_v36 = vpop.f32.mrf.mxu3 }
0x2622   :  { %v2460_v41 = vpop.permute.xlu2 %2459 }
0x2623   :  { %v2467_v56 = vmul.f32 %v2460_v41, %v4279_v18  ;;  %v2612_v9 = vperm.slane %v2460_v41, %v4247_v38 }
0x2625   :  { %v2469_v63 = vsel %vm284_vm0, %v2467_v56, 0.0 }
0x2626   :  { %v2470_v52 = vrot.slane %v2469_v63, 4 }
0x2628   :  { %v2471_v30 = vadd.f32 %v2470_v52, %v2469_v63 }
0x262a   :  { %v2472_v50 = vrot.slane %v2471_v30, 2 }
0x262c   :  { %v2473_v11 = vadd.f32 %v2472_v50, %v2471_v30 }
0x262e   :  { %v2474_v53 = vrot.slane %v2473_v11, 1 }
0x2630   :  { %v2475_v8 = vadd.f32 %v2474_v53, %v2473_v11 }
0x2632   :  { %v2484_v31 = vpack.c.bf16 %v2475_v8, %v2475_v8 }
0x2634   :  { %v2488_v36 = vunpack.c.l.b16 %v2484_v31 }
0x263a   :  { %v2465_v39 = vpop.permute.xlu0 %2464 }
0x263b   :  { %v2468_v27 = vmul.f32 %v2465_v39, %v4304_v32  ;;  %v2613_v4 = vperm.slane %v2465_v39, %v4247_v38 }
0x263d   :  { %v2476_v21 = vsel %vm284_vm0, %v2468_v27, 0.0  ;;  %v2614_v19 = vsel %vm436_vm1, %v2613_v4, %v2612_v9 }
0x263e   :  { %v2477_v48 = vrot.slane %v2476_v21, 4  ;;  %3347 = vst.msk [vmem:[%s5197_s18 + $0xe] sm:$0x3] %vm439_vm2, %v2614_v19 }
0x2640   :  { %v2478_v0 = vadd.f32 %v2477_v48, %v2476_v21 }
0x2642   :  { %v2479_v33 = vrot.slane %v2478_v0, 2 }
0x2643   :  { %v2520_v17 = vpop.f32.mrf.mxu2 }
0x2644   :  { %v2480_v51 = vadd.f32 %v2479_v33, %v2478_v0 }
0x2646   :  { %v2481_v14 = vrot.slane %v2480_v51, 1 }
0x2648   :  { %v2482_v13 = vadd.f32 %v2481_v14, %v2480_v51 }
0x264a   :  { %v2485_v55 = vpack.c.bf16 %v2482_v13, %v2482_v13 }
0x264b   :  { %v2522_v29 = vpop.f32.mrf.mxu2 }
0x264c   :  { %v2489_v41 = vunpack.c.l.b16 %v2485_v55 }
0x264e   :  { %v2490_v56 = vsel %vm436_vm1, %v2489_v41, %v2488_v36 }
0x264f   :  { %v2491_v63 = vpack.c.b16 %v2490_v56, %v2490_v56 }
0x2651   :  { %3342 = vmatmul.msk.bf16.vlgmr.msrb.gmra.mxu1 %vm284_vm0, %v2491_v63 }
0x2652   :  { %2805 = vmatpush.bf16.msrb.mxu1 %v4862_v47 }
0x2656   :  { %2806 = vmatpush.bf16.msrb.mxu1 %v4865_v49 }
0x26ce   :  { %v2504_v52 = vpop.f32.mrf.mxu1 }
0x26cf   :  { %v2521_v30 = vadd.f32 %v2520_v17, %v2504_v52 }
0x26d1   :  { %v2524_v50 = vadd.f32 %v4868_v15, %v2521_v30 }
0x26d3   :  { %v2538_v39 = vadd.f32 %v2535_v2, %v2524_v50  ;;  %v2560_v2 = vpop.permute.xlu1 %2559 }
0x26d5   :  { %v3345_v9 = vmul.f32 -1.442695, %v2538_v39 }
0x26d6   :  { %v2506_v27 = vpop.f32.mrf.mxu1 }
0x26d7   :  { %3535 = vpow2.f32 %v3345_v9 }
0x26dd   :  { %v3536_v4 = vpop.eup %3535 }
0x26de   :  { %v2542_v11 = vadd.f32 1.0, %v3536_v4 }
0x26e0   :  { %3537 = vrcp.f32 %v2542_v11  ;;  %v2554_v53 = vand.u32 2147483648, %v2542_v11  ;;  %v2552_v33 = vand.u32 2147483647, %v2542_v11  ;;  %vm2548_vm6 = vweird.f32 %v2542_v11 }
0x26e2   :  { %v2555_v17 = vor.u32 1.1754944e-38, %v2554_v53  ;;  %vm2553_vm9 = vcmp.eq.f32.partialorder %v2552_v33, 8.507059e+37 }
0x26e6   :  { %v3538_v21 = vpop.eup %3537 }
0x26e7   :  { %v2544_v19 = vmul.f32 %v3538_v21, %v2542_v11  ;;  %vm2549_vm5 = vweird.f32 %v3538_v21 }
0x26e8   :  { %vm2550_vm7 = vmor %vm2548_vm6, %vm2549_vm5 }
0x26e9   :  { %v2545_v48 = vsub.f32 1.0, %v2544_v19 }
0x26eb   :  { %v2546_v0 = vmul.f32 %v3538_v21, %v2545_v48 }
0x26ed   :  { %v2547_v8 = vadd.f32 %v3538_v21, %v2546_v0 }
0x26ef   :  { %v2551_v51 = vsel %vm2550_vm7, %v3538_v21, %v2547_v8 }
0x26f0   :  { %v2556_v14 = vsel %vm2553_vm9, %v2555_v17, %v2551_v51 }
0x26f1   :  { %v2562_v31 = vmul.f32 %v2560_v2, %v2556_v14  ;;  %v2569_v36 = vsub.f32 1.0, %v2556_v14  ;;  %v2575_v56 = vmul.f32 %v2556_v14, %v4874_v57 }
0x26f3   :  { %2564 = vrot.lane.b32.xlu0 %v2562_v31, %s4032_s0 }
0x2765   :  { %v2565_v13 = vpop.permute.xlu0 %2564 }
0x2766   :  { %v2567_v55 = vadd.f32 %v2565_v13, %v2524_v50 }
0x2768   :  { %3539 = vtanh.f32 %v2567_v55 }
0x276e   :  { %v3540_v29 = vpop.eup %3539 }
0x276f   :  { %2571 = vrot.lane.b32.xlu2 %v3540_v29, %s4047_s28 }
0x27c9   :  { %v2572_v41 = vpop.permute.xlu2 %2571 }
0x27ca   :  { %v2574_v63 = vmul.f32 %v2572_v41, %v2569_v36 }
0x27cc   :  { %v4969_v52 = vadd.f32 %v2575_v56, %v2574_v63 }
0x27ce   :  { %v2577_v30 = vpack.c.bf16 %v4969_v52, %v4969_v52 }
0x27d0   :  { %2579 = vrot.lane.b32.xlu1 %v2577_v30, %s4047_s28 }
0x2842   :  { %v4974_v39 = vpop.permute.xlu1 %2579 }
0x2843   :  { %3346 = vmatmul.msk.bf16.vlgmr.msra.gmra.mxu0 %vm284_vm0, %v4974_v39  ;;  %3350 = vmatmul.msk.bf16.vlgmr.msra.gmra.mxu2 %vm284_vm0, %v4974_v39 }
0x2844   :  { %2935 = vmatpush.bf16.msra.mxu0 %v4785_v62  ;;  %3065 = vmatpush.bf16.msra.mxu2 %v4886_v22 }
0x2848   :  { %2936 = vmatpush.bf16.msra.mxu0 %v4789_v26  ;;  %3066 = vmatpush.bf16.msra.mxu2 %v4890_v44 }
0x28c0   :  { %v2593_v57 = vpop.f32.mrf.mxu0 }
0x28c1   :  { %v4985_v50 = vadd.f32 %v4899_v40, %v2593_v57 }
0x28c3   :  { %v2597_v9 = vsel %vm680_vm8, %v4985_v50, -inf }
0x28c4   :  { %2598 = vmax.xlane.f32.xlu0 %v2597_v9 }
0x28c6   :  { %v2664_v27 = vpop.f32.mrf.mxu2 }
0x28c7   :  { %v2665_v4 = vadd.f32 %v4798_v10, %v2664_v27 }
0x28c8   :  { %v2595_v11 = vpop.f32.mrf.mxu0 }
0x28c9   :  { %v2669_v21 = vrot.slane %v2665_v4, 1  ;;  %v2670_v62 = vperm.slane %v2665_v4, 0 }
0x28cb   :  { %v2671_v19 = vperm.slane %v2669_v21, 0  ;;  %v2674_v22 = vadd.f32 %v2670_v62, %v4232_v16 }
0x28cd   :  { %v2675_v26 = vadd.f32 %v2671_v19, %v4236_v25  ;;  %3541 = vtanh.f32 %v2674_v22 }
0x28ce   :  { %v2666_v44 = vpop.f32.mrf.mxu2 }
0x28cf   :  { %3543 = vtanh.f32 %v2675_v26 }
0x28d3   :  { %v3542_v48 = vpop.eup %3541 }
0x28d4   :  { %v2678_v53 = vmul.f32 %v4803_v42, %v3542_v48 }
0x28d5   :  { %v3544_v0 = vpop.eup %3543 }
0x28d6   :  { %v2680_v33 = vsel %vm284_vm0, %v2678_v53, 0.0  ;;  %v2679_v8 = vmul.f32 %v4803_v42, %v3544_v0 }
0x28d7   :  { %2681 = vadd.xlane.f32.xlu2 %v2680_v33 }
0x28d8   :  { %v2683_v10 = vsel %vm284_vm0, %v2679_v8, 0.0 }
0x28d9   :  { %2684 = vadd.xlane.f32.xlu1 %v2683_v10 }
0x2937   :  { %v4996_v17 = vpop.xlane.xlu0 %2598 }
0x2938   :  { %vm2618_vm10 = vcmp.eq.f32.partialorder %v4985_v50, %v4996_v17 }
0x2939   :  { %v2619_v51 = vsel %vm2618_vm10, %v4247_v38, 32 }
0x293a   :  { %v2620_v2 = vsel %vm680_vm8, %v2619_v51, 2147483647 }
0x293b   :  { %v2622_v14 = vshra.s32 %v2620_v2, 16  ;;  %v2621_v30 = vand.u32 65535, %v2620_v2 }
0x293d   :  { %v2624_v31 = vcvt.s32.f32 %v2622_v14  ;;  %v2623_v9 = vcvt.s32.f32 %v2621_v30 }
0x293f   :  { %2625 = vmin.xlane.f32.xlu0 %v2624_v31 }
0x294a   :  { %v2682_v13 = vpop.xlane.xlu2 %2681 }
0x294b   :  { %v2686_v55 = vadd.f32 %v2682_v13, %v4245_v37 }
0x294c   :  { %v2685_v42 = vpop.xlane.xlu1 %2684 }
0x294d   :  { %v2687_v29 = vadd.f32 %v2685_v42, %v4245_v37  ;;  %v2690_v36 = vperm.slane %v2686_v55, %v4247_v38 }
0x294f   :  { %v2691_v41 = vperm.slane %v2687_v29, %v4247_v38 }
0x2951   :  { %v2692_v56 = vsel %vm436_vm1, %v2691_v41, %v2690_v36 }
0x2952   :  { %v2694_v63 = vsel %vm439_vm2, %v2692_v56, -inf }
0x2953   :  { %2695 = vmax.xlane.f32.xlu2 %v2694_v63 }
0x29b2   :  { %v2626_v57 = vpop.xlane.xlu0 %2625 }
0x29b3   :  { %vm2627_vm11 = vcmp.eq.f32.partialorder %v2624_v31, %v2626_v57  ;;  %v2632_v53 = vcvt.f32.s32 %v2626_v57 }
0x29b4   :  { %v2628_v27 = vsel %vm2627_vm11, %v2623_v9, inf }
0x29b5   :  { %2629 = vmin.xlane.f32.xlu1 %v2628_v27  ;;  %v2633_v33 = vshll.u32 %v2632_v53, 16 }
0x29c6   :  { %v2696_v4 = vpop.xlane.xlu2 %2695 }
0x29c7   :  { %v2698_v11 = vperm.slane %v2696_v4, 0  ;;  %v2699_v21 = vperm.slane %v2696_v4, 1 }
0x29c9   :  { %v2702_v62 = vsub.f32 %v2686_v55, %v2698_v11  ;;  %v2703_v19 = vsub.f32 %v2687_v29, %v2699_v21 }
0x29cb   :  { %v2704_v22 = vmul.f32 1.442695, %v2702_v62  ;;  %v2706_v26 = vmul.f32 1.442695, %v2703_v19 }
0x29cd   :  { %3545 = vpow2.f32 %v2704_v22 }
0x29ce   :  { %3547 = vpow2.f32 %v2706_v26 }
0x29d3   :  { %v3546_v44 = vpop.eup %3545 }
0x29d4   :  { %v3548_v48 = vpop.eup %3547  ;;  %2711 = vperm.xlu0 %3405, %v3546_v44  }
0x29d5   :  { %2714 = vperm.xlu2 %3404, %v3548_v48  }
0x2a28   :  { %v2630_v0 = vpop.xlane.xlu1 %2629 }
0x2a29   :  { %v2631_v8 = vcvt.f32.s32 %v2630_v0 }
0x2a2b   :  { %v2634_v10 = vadd.s32 %v2633_v33, %v2631_v8 }
0x2a2d   :  { %vm2635_vm12 = vcmp.eq.s32.totalorder %v4247_v38, %v2634_v10 }
0x2a2e   :  { %v3348_v51 = vsel %vm2635_vm12, 1.0, %v4046_v1 }
0x2a2f   :  { %v2638_v2 = vpack.c.bf16 %v3348_v51, %v3348_v51  ;;  %v2715_v14 = vpop.permute.xlu2 %2714 }
0x2a30   :  { %v2717_v13 = vperm.slane %v2715_v14, %v4247_v38 }
0x2a31   :  { %3349 = vmatmul.msk.bf16.vlgmr.msra.gmra.mxu1 %vm284_vm0, %v2638_v2 }
0x2a32   :  { %3049 = vmatpush.bf16.msra.mxu1 %v4824_v58 }
0x2a36   :  { %3050 = vmatpush.bf16.msra.mxu1 %v4827_v59 }
0x2a41   :  { %3353 = vmatmul.msk.bf16.vlgmr.msrb.gmra.mxu1 %vm284_vm0, %v4974_v39 }
0x2a46   :  { %v2712_v31 = vpop.permute.xlu0 %2711 }
0x2a47   :  { %v2716_v55 = vperm.slane %v2712_v31, %v4247_v38 }
0x2a49   :  { %v2718_v42 = vsel %vm436_vm1, %v2717_v13, %v2716_v55 }
0x2a4a   :  { %v2720_v29 = vsel %vm439_vm2, %v2718_v42, 0.0 }
0x2a4b   :  { %2721 = vadd.xlane.f32.xlu1 %v2720_v29 }
0x2aae   :  { %v2651_v36 = vpop.f32.mrf.mxu1 }
0x2aaf   :  { %v2757_v41 = vpack.c.bf16 %v2651_v36, %v2651_v36 }
0x2ab1   :  { %3352 = vmatmul.msk.bf16.vlgmr.msrb.gmra.mxu0 %vm284_vm0, %v2757_v41 }
0x2ab2   :  { %3138 = vmatpush.bf16.msrb.mxu0 %v4939_v28 }
0x2ab6   :  { %v2653_v58 = vpop.f32.mrf.mxu1  ;;  %3139 = vmatpush.bf16.msrb.mxu0 %v4945_v60 }
0x2abe   :  { %v2808_v59 = vpop.f32.mrf.mxu1  ;;  %v2722_v39 = vpop.xlane.xlu1 %2721 }
0x2abf   :  { %3549 = vrcp.f32 %v2722_v39  ;;  %v2809_v4 = vadd.f32 %v4845_v61, %v2808_v59 }
0x2ac5   :  { %v3550_v56 = vpop.eup %3549 }
0x2ac6   :  { %v2810_v63 = vpop.f32.mrf.mxu1  ;;  %v2726_v30 = vperm.slane %v3550_v56, 1  ;;  %v2725_v57 = vperm.slane %v3550_v56, 0 }
0x2ac8   :  { %v2730_v9 = vmul.f32 %v3548_v48, %v2726_v30  ;;  %v2729_v27 = vmul.f32 %v3546_v44, %v2725_v57 }
0x2aca   :  { %2738 = vperm.xlu0 %3405, %v2730_v9   ;;  %2733 = vperm.xlu1 %3403, %v2729_v27  }
0x2ad2   :  { %2833 = vrot.lane.b32.xlu0 %v2809_v4, %s4032_s0 }
0x2b2e   :  { %v2794_v11 = vpop.f32.mrf.mxu0 }
0x2b36   :  { %v2796_v28 = vpop.f32.mrf.mxu0 }
0x2b3c   :  { %v2739_v21 = vpop.permute.xlu0 %2738  ;;  %v2734_v62 = vpop.permute.xlu1 %2733 }
0x2b3d   :  { %v2742_v60 = vmul.f32 %v2739_v21, %v4304_v32  ;;  %v2887_v19 = vperm.slane %v2739_v21, %v4247_v38  ;;  %v2741_v22 = vmul.f32 %v2734_v62, %v4279_v18  ;;  %v2886_v26 = vperm.slane %v2734_v62, %v4247_v38 }
0x2b3f   :  { %v2750_v44 = vsel %vm284_vm0, %v2742_v60, 0.0  ;;  %v2743_v48 = vsel %vm284_vm0, %v2741_v22, 0.0  ;;  %v2888_v61 = vsel %vm436_vm1, %v2887_v19, %v2886_v26 }
0x2b40   :  { %v2751_v53 = vrot.slane %v2750_v44, 4  ;;  %v2744_v0 = vrot.slane %v2743_v48, 4  ;;  %3356 = vst.msk [vmem:[%s5197_s18 + $0x10] sm:$0x3] %vm439_vm2, %v2888_v61 }
0x2b42   :  { %v2752_v33 = vadd.f32 %v2751_v53, %v2750_v44  ;;  %v2745_v8 = vadd.f32 %v2744_v0, %v2743_v48 }
0x2b44   :  { %v2753_v10 = vrot.slane %v2752_v33, 2  ;;  %v2746_v51 = vrot.slane %v2745_v8, 2 }
0x2b46   :  { %v2754_v2 = vadd.f32 %v2753_v10, %v2752_v33  ;;  %v2747_v14 = vadd.f32 %v2746_v51, %v2745_v8 }
0x2b48   :  { %v2755_v31 = vrot.slane %v2754_v2, 1  ;;  %v2748_v13 = vrot.slane %v2747_v14, 1 }
0x2b4a   :  { %v2756_v55 = vadd.f32 %v2755_v31, %v2754_v2  ;;  %v2749_v42 = vadd.f32 %v2748_v13, %v2747_v14 }
0x2b4c   :  { %v2759_v29 = vpack.c.bf16 %v2756_v55, %v2756_v55  ;;  %v2758_v36 = vpack.c.bf16 %v2749_v42, %v2749_v42  ;;  %v3647_v55 = vld [vmem:[#allocation12] ss:$0 sm:$0xff] }
0x2b4e   :  { %v2763_v41 = vunpack.c.l.b16 %v2759_v29  ;;  %v2762_v58 = vunpack.c.l.b16 %v2758_v36 }
0x2b50   :  { %v2764_v59 = vsel %vm436_vm1, %v2763_v41, %v2762_v58 }
0x2b51   :  { %v2765_v39 = vpack.c.b16 %v2764_v59, %v2764_v59 }
0x2b53   :  { %3351 = vmatmul.msk.bf16.vlgmr.msra.gmra.mxu3 %vm284_vm0, %v2765_v39 }
0x2b54   :  { %3079 = vmatpush.bf16.msra.mxu3 %v4862_v47 }
0x2b58   :  { %3080 = vmatpush.bf16.msra.mxu3 %v4865_v49 }
0x2bd6   :  { %v2778_v56 = vpop.f32.mrf.mxu3 }
0x2bd7   :  { %v2795_v63 = vadd.f32 %v2794_v11, %v2778_v56 }
0x2bd9   :  { %v2798_v30 = vadd.f32 %v4868_v15, %v2795_v63  ;;  %v2834_v15 = vpop.permute.xlu0 %2833 }
0x2bdb   :  { %v2812_v57 = vadd.f32 %v2809_v4, %v2798_v30 }
0x2bdd   :  { %v3354_v9 = vmul.f32 -1.442695, %v2812_v57 }
0x2bde   :  { %v2780_v27 = vpop.f32.mrf.mxu3 }
0x2bdf   :  { %3551 = vpow2.f32 %v3354_v9  ;;  %v3648_v9 = vld [vmem:[#allocation16] ss:$0 sm:$0xff] }
0x2be5   :  { %v3552_v28 = vpop.eup %3551 }
0x2be6   :  { %v2816_v21 = vadd.f32 1.0, %v3552_v28 }
0x2be8   :  { %3553 = vrcp.f32 %v2816_v21  ;;  %v2828_v22 = vand.u32 2147483648, %v2816_v21  ;;  %v2826_v47 = vand.u32 2147483647, %v2816_v21  ;;  %vm2822_vm14 = vweird.f32 %v2816_v21 }
0x2bea   :  { %v2829_v49 = vor.u32 1.1754944e-38, %v2828_v22  ;;  %vm2827_vm3 = vcmp.eq.f32.partialorder %v2826_v47, 8.507059e+37 }
0x2bee   :  { %v3554_v62 = vpop.eup %3553 }
0x2bef   :  { %v2818_v60 = vmul.f32 %v3554_v62, %v2816_v21  ;;  %vm2823_vm13 = vweird.f32 %v3554_v62 }
0x2bf0   :  { %vm2824_vm15 = vmor %vm2822_vm14, %vm2823_vm13 }
0x2bf1   :  { %v2819_v19 = vsub.f32 1.0, %v2818_v60 }
0x2bf3   :  { %v2820_v26 = vmul.f32 %v3554_v62, %v2819_v19 }
0x2bf5   :  { %v2821_v44 = vadd.f32 %v3554_v62, %v2820_v26 }
0x2bf7   :  { %v2825_v11 = vsel %vm2824_vm15, %v3554_v62, %v2821_v44 }
0x2bf8   :  { %v2830_v4 = vsel %vm2827_vm3, %v2829_v49, %v2825_v11 }
0x2bf9   :  { %v2836_v48 = vmul.f32 %v2834_v15, %v2830_v4  ;;  %v2843_v33 = vsub.f32 1.0, %v2830_v4  ;;  %v2849_v10 = vmul.f32 %v2830_v4, %v4969_v52 }
0x2bfb   :  { %2838 = vrot.lane.b32.xlu2 %v2836_v48, %s4032_s0 }
0x2c55   :  { %v2839_v61 = vpop.permute.xlu2 %2838 }
0x2c56   :  { %v2841_v53 = vadd.f32 %v2839_v61, %v2798_v30 }
0x2c58   :  { %3555 = vtanh.f32 %v2841_v53 }
0x2c5e   :  { %v3556_v0 = vpop.eup %3555 }
0x2c5f   :  { %2845 = vrot.lane.b32.xlu0 %v3556_v0, %s4047_s28 }
0x2cd1   :  { %v2846_v8 = vpop.permute.xlu0 %2845 }
0x2cd2   :  { %v2848_v51 = vmul.f32 %v2846_v8, %v2843_v33 }
0x2cd4   :  { %v5043_v2 = vadd.f32 %v2849_v10, %v2848_v51 }
0x2cd6   :  { %v2851_v14 = vpack.c.bf16 %v5043_v2, %v5043_v2 }
0x2cd8   :  { %2853 = vrot.lane.b32.xlu2 %v2851_v14, %s4047_s28 }
0x2d32   :  { %v5048_v31 = vpop.permute.xlu2 %2853 }
0x2d33   :  { %3355 = vmatmul.msk.bf16.vlgmr.msrb.gmra.mxu2 %vm284_vm0, %v5048_v31  ;;  %3359 = vmatmul.msk.bf16.vlgmr.msra.gmra.mxu0 %vm284_vm0, %v5048_v31 }
0x2db0   :  { %v2938_v13 = vpop.f32.mrf.mxu0 }
0x2db1   :  { %v2939_v42 = vadd.f32 %v3647_v55, %v2938_v13 }
0x2db3   :  { %v2943_v52 = vrot.slane %v2939_v42, 1  ;;  %v2944_v29 = vperm.slane %v2939_v42, 0 }
0x2db5   :  { %v2945_v36 = vperm.slane %v2943_v52, 0  ;;  %v2948_v41 = vadd.f32 %v2944_v29, %v4232_v16 }
0x2db6   :  { %v2867_v58 = vpop.f32.mrf.mxu2 }
0x2db7   :  { %v2949_v59 = vadd.f32 %v2945_v36, %v4236_v25  ;;  %3557 = vtanh.f32 %v2948_v41  ;;  %v5057_v39 = vadd.f32 %v4899_v40, %v2867_v58 }
0x2db8   :  { %v2940_v56 = vpop.f32.mrf.mxu0 }
0x2db9   :  { %3559 = vtanh.f32 %v2949_v59  ;;  %v2871_v63 = vsel %vm680_vm8, %v5057_v39, -inf }
0x2dba   :  { %2872 = vmax.xlane.f32.xlu1 %v2871_v63 }
0x2dbd   :  { %v3558_v30 = vpop.eup %3557 }
0x2dbe   :  { %v2869_v57 = vpop.f32.mrf.mxu2  ;;  %v2952_v27 = vmul.f32 %v3648_v9, %v3558_v30 }
0x2dbf   :  { %v3560_v28 = vpop.eup %3559 }
0x2dc0   :  { %v2954_v16 = vsel %vm284_vm0, %v2952_v27, 0.0  ;;  %v2953_v21 = vmul.f32 %v3648_v9, %v3560_v28 }
0x2dc1   :  { %2955 = vadd.xlane.f32.xlu0 %v2954_v16 }
0x2dc2   :  { %v2957_v25 = vsel %vm284_vm0, %v2953_v21, 0.0 }
0x2dc3   :  { %2958 = vadd.xlane.f32.xlu2 %v2957_v25 }
0x2e2d   :  { %v5063_v40 = vpop.xlane.xlu1 %2872 }
0x2e2e   :  { %vm2892_vm4 = vcmp.eq.f32.partialorder %v5057_v39, %v5063_v40 }
0x2e2f   :  { %v2893_v62 = vsel %vm2892_vm4, %v4247_v38, 32 }
0x2e30   :  { %v2894_v60 = vsel %vm680_vm8, %v2893_v62, 2147483647 }
0x2e31   :  { %v2896_v19 = vshra.s32 %v2894_v60, 16  ;;  %v2895_v61 = vand.u32 65535, %v2894_v60 }
0x2e33   :  { %v2898_v22 = vcvt.s32.f32 %v2896_v19  ;;  %v2897_v0 = vcvt.s32.f32 %v2895_v61 }
0x2e34   :  { %v2956_v26 = vpop.xlane.xlu0 %2955 }
0x2e35   :  { %v2960_v47 = vadd.f32 %v2956_v26, %v4245_v37  ;;  %2899 = vmin.xlane.f32.xlu1 %v2898_v22 }
0x2e36   :  { %v2959_v44 = vpop.xlane.xlu2 %2958 }
0x2e37   :  { %v2961_v49 = vadd.f32 %v2959_v44, %v4245_v37  ;;  %v2964_v11 = vperm.slane %v2960_v47, %v4247_v38 }
0x2e39   :  { %v2965_v15 = vperm.slane %v2961_v49, %v4247_v38 }
0x2e3b   :  { %v2966_v4 = vsel %vm436_vm1, %v2965_v15, %v2964_v11 }
0x2e3c   :  { %v2968_v48 = vsel %vm439_vm2, %v2966_v4, -inf }
0x2e3d   :  { %2969 = vmax.xlane.f32.xlu2 %v2968_v48 }
0x2ea8   :  { %v2900_v53 = vpop.xlane.xlu1 %2899 }
0x2ea9   :  { %vm2901_vm5 = vcmp.eq.f32.partialorder %v2898_v22, %v2900_v53  ;;  %v2906_v29 = vcvt.f32.s32 %v2900_v53 }
0x2eaa   :  { %v2902_v33 = vsel %vm2901_vm5, %v2897_v0, inf }
0x2eab   :  { %2903 = vmin.xlane.f32.xlu0 %v2902_v33  ;;  %v2907_v41 = vshll.u32 %v2906_v29, 16 }
0x2eb0   :  { %v2970_v8 = vpop.xlane.xlu2 %2969 }
0x2eb1   :  { %v2972_v10 = vperm.slane %v2970_v8, 0  ;;  %v2973_v51 = vperm.slane %v2970_v8, 1 }
0x2eb3   :  { %v2976_v14 = vsub.f32 %v2960_v47, %v2972_v10  ;;  %v2977_v37 = vsub.f32 %v2961_v49, %v2973_v51  ;;  %v3649_v49 = vld [vmem:[#allocation24] ss:$0 sm:$0xff] }
0x2eb5   :  { %v2978_v13 = vmul.f32 1.442695, %v2976_v14  ;;  %v2980_v55 = vmul.f32 1.442695, %v2977_v37 }
0x2eb7   :  { %3561 = vpow2.f32 %v2978_v13 }
0x2eb8   :  { %3563 = vpow2.f32 %v2980_v55 }
0x2ebd   :  { %v3562_v42 = vpop.eup %3561 }
0x2ebe   :  { %v3564_v52 = vpop.eup %3563  ;;  %2985 = vperm.xlu1 %3403, %v3562_v42  }
0x2ebf   :  { %2988 = vperm.xlu2 %3404, %v3564_v52  }
0x2f19   :  { %v2989_v30 = vpop.permute.xlu2 %2988 }
0x2f1a   :  { %v2991_v9 = vperm.slane %v2989_v30, %v4247_v38 }
0x2f1e   :  { %v2904_v36 = vpop.xlane.xlu0 %2903 }
0x2f1f   :  { %v2905_v58 = vcvt.f32.s32 %v2904_v36 }
0x2f21   :  { %v2908_v59 = vadd.s32 %v2907_v41, %v2905_v58 }
0x2f23   :  { %vm2909_vm6 = vcmp.eq.s32.totalorder %v4247_v38, %v2908_v59 }
0x2f24   :  { %v3357_v56 = vsel %vm2909_vm6, 1.0, %v4046_v1 }
0x2f25   :  { %v2912_v63 = vpack.c.bf16 %v3357_v56, %v3357_v56 }
0x2f27   :  { %3358 = vmatmul.msk.bf16.vlgmr.msrb.gmra.mxu3 %vm284_vm0, %v2912_v63 }
0x2f30   :  { %v2986_v57 = vpop.permute.xlu1 %2985 }
0x2f31   :  { %v2990_v27 = vperm.slane %v2986_v57, %v4247_v38 }
0x2f33   :  { %v2992_v28 = vsel %vm436_vm1, %v2991_v9, %v2990_v27 }
0x2f34   :  { %v2994_v16 = vsel %vm439_vm2, %v2992_v28, 0.0 }
0x2f35   :  { %2995 = vadd.xlane.f32.xlu0 %v2994_v16  ;;  %v3650_v16 = vld [vmem:[#allocation22] ss:$0 sm:$0xff] }
0x2f37   :  { %3362 = vmatmul.msk.bf16.vlgmr.msra.gmra.mxu3 %vm284_vm0, %v5048_v31 }
0x2fa8   :  { %v2996_v21 = vpop.xlane.xlu0 %2995 }
0x2fa9   :  { %3565 = vrcp.f32 %v2996_v21 }
0x2faa   :  { %v2925_v1 = vpop.f32.mrf.mxu3 }
0x2fab   :  { %v3031_v25 = vpack.c.bf16 %v2925_v1, %v2925_v1 }
0x2fad   :  { %3361 = vmatmul.msk.bf16.vlgmr.msra.gmra.mxu2 %vm284_vm0, %v3031_v25 }
0x2faf   :  { %v3566_v62 = vpop.eup %3565 }
0x2fb0   :  { %v2999_v60 = vperm.slane %v3566_v62, 0  ;;  %v3000_v19 = vperm.slane %v3566_v62, 1 }
0x2fb2   :  { %v2927_v22 = vpop.f32.mrf.mxu3  ;;  %v3004_v26 = vmul.f32 %v3564_v52, %v3000_v19  ;;  %v3003_v47 = vmul.f32 %v3562_v42, %v2999_v60 }
0x2fb4   :  { %3012 = vperm.xlu1 %3403, %v3004_v26   ;;  %3007 = vperm.xlu0 %3405, %v3003_v47  }
0x2fba   :  { %v3082_v44 = vpop.f32.mrf.mxu3 }
0x2fbb   :  { %v3083_v11 = vadd.f32 %v3649_v49, %v3082_v44 }
0x2fbd   :  { %3107 = vrot.lane.b32.xlu2 %v3083_v11, %s4032_s0 }
0x2fc2   :  { %v3084_v31 = vpop.f32.mrf.mxu3 }
0x3026   :  { %v3013_v15 = vpop.permute.xlu1 %3012  ;;  %v3008_v4 = vpop.permute.xlu0 %3007 }
0x3027   :  { %v3016_v48 = vmul.f32 %v3013_v15, %v4304_v32  ;;  %v3161_v61 = vperm.slane %v3013_v15, %v4247_v38  ;;  %v3015_v53 = vmul.f32 %v3008_v4, %v4279_v18  ;;  %v3160_v0 = vperm.slane %v3008_v4, %v4247_v38 }
0x3029   :  { %v3024_v33 = vsel %vm284_vm0, %v3016_v48, 0.0  ;;  %v3017_v8 = vsel %vm284_vm0, %v3015_v53, 0.0  ;;  %v3162_v10 = vsel %vm436_vm1, %v3161_v61, %v3160_v0 }
0x302a   :  { %v3025_v51 = vrot.slane %v3024_v33, 4  ;;  %v3018_v14 = vrot.slane %v3017_v8, 4  ;;  %3365 = vst.msk [vmem:[%s5197_s18 + $0x12] sm:$0x3] %vm439_vm2, %v3162_v10  ;;  %v684_v10 = vsub.f32 %v4370_v3, %v4378_v24 }
0x302c   :  { %v3026_v32 = vadd.f32 %v3025_v51, %v3024_v33  ;;  %v3019_v37 = vadd.f32 %v3018_v14, %v3017_v8  ;;  %v685_v51 = vmul.f32 1.442695, %v684_v10  ;;  %v1504_v14 = vsub.f32 %v4628_v7, %v4639_v54 }
0x302e   :  { %v3027_v13 = vrot.slane %v3026_v32, 2  ;;  %v3020_v55 = vrot.slane %v3019_v37, 2 }
0x3030   :  { %v3028_v18 = vadd.f32 %v3027_v13, %v3026_v32  ;;  %v3021_v42 = vadd.f32 %v3020_v55, %v3019_v37  ;;  %v3068_v38 = vpop.f32.mrf.mxu2  ;;  %v1505_v32 = vmul.f32 1.442695, %v1504_v14  ;;  %v2326_v13 = vsub.f32 %v4902_v45, %v4910_v34 }
0x3032   :  { %v3029_v52 = vrot.slane %v3028_v18, 1  ;;  %v3022_v29 = vrot.slane %v3021_v42, 1 }
0x3034   :  { %v3030_v36 = vadd.f32 %v3029_v52, %v3028_v18  ;;  %v3023_v41 = vadd.f32 %v3022_v29, %v3021_v42  ;;  %v2327_v18 = vmul.f32 1.442695, %v2326_v13 }
0x3036   :  { %v3033_v58 = vpack.c.bf16 %v3030_v36, %v3030_v36  ;;  %v3032_v59 = vpack.c.bf16 %v3023_v41, %v3023_v41 }
0x3038   :  { %v3037_v56 = vunpack.c.l.b16 %v3033_v58  ;;  %v3036_v63 = vunpack.c.l.b16 %v3032_v59  ;;  %v3070_v30 = vpop.f32.mrf.mxu2 }
0x3039   :  { %v956_v30 = vsub.f32 %v4443_v23, %v4454_v5 }
0x303a   :  { %v3038_v57 = vsel %vm436_vm1, %v3037_v56, %v3036_v63 }
0x303b   :  { %v3039_v9 = vpack.c.b16 %v3038_v57, %v3038_v57  ;;  %v957_v57 = vmul.f32 1.442695, %v956_v30 }
0x303d   :  { %3360 = vmatmul.msk.bf16.vlgmr.msra.gmra.mxu1 %vm284_vm0, %v3039_v9  ;;  %v1778_v9 = vsub.f32 %v4717_v12, %v4725_v6 }
0x30ba   :  { %v3052_v27 = vpop.f32.mrf.mxu1 }
0x30bb   :  { %v3069_v28 = vadd.f32 %v3068_v38, %v3052_v27  ;;  %v1779_v27 = vmul.f32 1.442695, %v1778_v9 }
0x30bd   :  { %v3072_v21 = vadd.f32 %v3650_v16, %v3069_v28 }
0x30bf   :  { %v3086_v1 = vadd.f32 %v3083_v11, %v3072_v21  ;;  %v3108_v11 = vpop.permute.xlu2 %3107 }
0x30c1   :  { %v3363_v25 = vmul.f32 -1.442695, %v3086_v1 }
0x30c2   :  { %v3054_v62 = vpop.f32.mrf.mxu1 }
0x30c3   :  { %3567 = vpow2.f32 %v3363_v25 }
0x30c9   :  { %v3568_v60 = vpop.eup %3567 }
0x30ca   :  { %v3090_v19 = vadd.f32 1.0, %v3568_v60 }
0x30cc   :  { %3569 = vrcp.f32 %v3090_v19  ;;  %v3102_v44 = vand.u32 2147483648, %v3090_v19  ;;  %v3100_v31 = vand.u32 2147483647, %v3090_v19  ;;  %vm3096_vm2 = vweird.f32 %v3090_v19 }
0x30ce   :  { %v3103_v4 = vor.u32 1.1754944e-38, %v3102_v44  ;;  %vm3101_vm9 = vcmp.eq.f32.partialorder %v3100_v31, 8.507059e+37 }
0x30d2   :  { %v3570_v22 = vpop.eup %3569 }
0x30d3   :  { %v3092_v26 = vmul.f32 %v3570_v22, %v3090_v19  ;;  %vm3097_vm1 = vweird.f32 %v3570_v22 }
0x30d4   :  { %vm3098_vm7 = vmor %vm3096_vm2, %vm3097_vm1 }
0x30d5   :  { %v3093_v47 = vsub.f32 1.0, %v3092_v26 }
0x30d7   :  { %v3094_v49 = vmul.f32 %v3570_v22, %v3093_v47 }
0x30d9   :  { %v3095_v15 = vadd.f32 %v3570_v22, %v3094_v49 }
0x30db   :  { %v3099_v48 = vsel %vm3098_vm7, %v3570_v22, %v3095_v15 }
0x30dc   :  { %v3104_v61 = vsel %vm3101_vm9, %v3103_v4, %v3099_v48 }
0x30dd   :  { %v3110_v53 = vmul.f32 %v3108_v11, %v3104_v61  ;;  %v3117_v36 = vsub.f32 1.0, %v3104_v61  ;;  %v3123_v58 = vmul.f32 %v3104_v61, %v5043_v2  ;;  %v2600_v2 = vsub.f32 %v4985_v50, %v4996_v17 }
0x30df   :  { %3112 = vrot.lane.b32.xlu0 %v3110_v53, %s4032_s0  ;;  %v2601_v25 = vmul.f32 1.442695, %v2600_v2 }
0x3151   :  { %v3113_v0 = vpop.permute.xlu0 %3112 }
0x3152   :  { %v3115_v33 = vadd.f32 %v3113_v0, %v3072_v21 }
0x3154   :  { %3571 = vtanh.f32 %v3115_v33 }
0x3155   :  { %3573 = vpow2.f32 %v685_v51 }
0x3156   :  { %3575 = vpow2.f32 %v1505_v32 }
0x3157   :  { %3577 = vpow2.f32 %v2327_v18 }
0x3158   :  { %3579 = vpow2.f32 %v957_v57 }
0x315a   :  { %v3572_v8 = vpop.eup %3571 }
0x315b   :  { %3119 = vrot.lane.b32.xlu1 %v3572_v8, %s4047_s28  ;;  %v3574_v37 = vpop.eup %3573 }
0x315c   :  { %v687_v55 = vsel %vm680_vm8, %v3574_v37, 0.0  ;;  %v3576_v42 = vpop.eup %3575 }
0x315d   :  { %v1507_v38 = vsel %vm680_vm8, %v3576_v42, 0.0  ;;  %v3578_v52 = vpop.eup %3577  ;;  %v1230_v42 = vsub.f32 %v4528_v20, %v4538_v43 }
0x315e   :  { %v2329_v29 = vsel %vm680_vm8, %v3578_v52, 0.0  ;;  %v3580_v16 = vpop.eup %3579 }
0x315f   :  { %v959_v21 = vsel %vm680_vm8, %v3580_v16, 0.0 }
0x3185   :  { %688 = vadd.xlane.f32.xlu1 %v687_v55 }
0x318d   :  { %1508 = vadd.xlane.f32.xlu1 %v1507_v38  ;;  %v1231_v38 = vmul.f32 1.442695, %v1230_v42 }
0x3195   :  { %2330 = vadd.xlane.f32.xlu1 %v2329_v29  ;;  %v2052_v29 = vsub.f32 %v4794_v46, %v4809_v35 }
0x31cd   :  { %v3120_v41 = vpop.permute.xlu1 %3119 }
0x31ce   :  { %v3122_v59 = vmul.f32 %v3120_v41, %v3117_v36 }
0x31d0   :  { %v3124_v56 = vadd.f32 %v3123_v58, %v3122_v59  ;;  %v2874_v58 = vsub.f32 %v5057_v39, %v5063_v40 }
0x31d2   :  { %v3125_v63 = vpack.c.bf16 %v3124_v56, %v3124_v56 }
0x31d4   :  { %3127 = vrot.lane.b32.xlu2 %v3125_v63, %s4047_s28 }
0x31f8   :  { %v689_v28 = vpop.xlane.xlu1 %688 }
0x31f9   :  { %3581 = vlog2.f32 %v689_v28 }
0x31fa   :  { %3583 = vpow2.f32 %v1779_v27 }
0x31fd   :  { %960 = vadd.xlane.f32.xlu2 %v959_v21 }
0x31ff   :  { %v3582_v1 = vpop.eup %3581 }
0x3200   :  { %v691_v62 = vmul.f32 0.6931472, %v3582_v1  ;;  %v1509_v60 = vpop.xlane.xlu1 %1508  ;;  %v3584_v19 = vpop.eup %3583 }
0x3201   :  { %3585 = vlog2.f32 %v1509_v60  ;;  %v1781_v47 = vsel %vm680_vm8, %v3584_v19, 0.0 }
0x3202   :  { %v692_v22 = vadd.f32 %v691_v62, %v4378_v24  ;;  %3587 = vpow2.f32 %v2601_v25 }
0x3204   :  { %v693_v26 = vsub.f32 %v4370_v3, %v692_v22 }
0x3205   :  { %1782 = vadd.xlane.f32.xlu2 %v1781_v47 }
0x3206   :  { %694 = vst.msk [vmem:[#allocation25] sm:$0x3] %vm680_vm8, %v693_v26 }
0x3207   :  { %v3586_v44 = vpop.eup %3585 }
0x3208   :  { %v1511_v49 = vmul.f32 0.6931472, %v3586_v44  ;;  %v2331_v31 = vpop.xlane.xlu1 %2330  ;;  %v3588_v15 = vpop.eup %3587 }
0x3209   :  { %3589 = vlog2.f32 %v2331_v31  ;;  %v2603_v11 = vsel %vm680_vm8, %v3588_v15, 0.0 }
0x320a   :  { %v1512_v4 = vadd.f32 %v1511_v49, %v4639_v54 }
0x320c   :  { %v1513_v48 = vsub.f32 %v4628_v7, %v1512_v4 }
0x320d   :  { %2604 = vadd.xlane.f32.xlu2 %v2603_v11 }
0x320e   :  { %1515 = vst.msk [vmem:[#allocation25 + $0x6] sm:$0x3] %vm680_vm8, %v1513_v48 }
0x320f   :  { %v3590_v3 = vpop.eup %3589 }
0x3210   :  { %v2333_v24 = vmul.f32 0.6931472, %v3590_v3 }
0x3212   :  { %v2334_v61 = vadd.f32 %v2333_v24, %v4910_v34 }
0x3214   :  { %v2335_v53 = vsub.f32 %v4902_v45, %v2334_v61 }
0x3216   :  { %2337 = vst.msk [vmem:[#allocation25 + $0xc] sm:$0x3] %vm680_vm8, %v2335_v53 }
0x3225   :  { %3167 = vrot.lane.b32.xlu2 %v3124_v56, %s4047_s28  ;;  %v2875_v56 = vmul.f32 1.442695, %v2874_v58 }
0x322e   :  { %v3128_v0 = vpop.permute.xlu2 %3127 }
0x322f   :  { %3364 = vmatmul.msk.bf16.vlgmr.msrb.gmra.mxu0 %vm284_vm0, %v3128_v0 }
0x3270   :  { %v961_v54 = vpop.xlane.xlu2 %960 }
0x3271   :  { %3591 = vlog2.f32 %v961_v54 }
0x3277   :  { %v3592_v7 = vpop.eup %3591 }
0x3278   :  { %v963_v33 = vmul.f32 0.6931472, %v3592_v7  ;;  %v1783_v8 = vpop.xlane.xlu2 %1782 }
0x3279   :  { %3593 = vlog2.f32 %v1783_v8 }
0x327a   :  { %v964_v10 = vadd.f32 %v963_v33, %v4454_v5 }
0x327c   :  { %v965_v51 = vsub.f32 %v4443_v23, %v964_v10 }
0x327e   :  { %967 = vst.msk [vmem:[#allocation25 + $0x2] sm:$0x3] %vm680_vm8, %v965_v51 }
0x327f   :  { %v3594_v45 = vpop.eup %3593 }
0x3280   :  { %v1785_v34 = vmul.f32 0.6931472, %v3594_v45  ;;  %v2605_v14 = vpop.xlane.xlu2 %2604 }
0x3281   :  { %3595 = vlog2.f32 %v2605_v14 }
0x3282   :  { %v1786_v32 = vadd.f32 %v1785_v34, %v4725_v6  ;;  %3597 = vpow2.f32 %v1231_v38 }
0x3284   :  { %v1787_v37 = vsub.f32 %v4717_v12, %v1786_v32  ;;  %v3651_v12 = vld [vmem:[%s5195_s16] ss:$0 sm:$0xff]  ;;  %s4049_s16 = smov [#allocation26]  }
0x3285   :  { %s3191_s28 = sshll.u32 %s4049_s16, 4  ;;  %s3192_s28 = int_to_ptr.vmem [resolvable:$true] %s3191_s28 }
0x3286   :  { %1789 = vst.msk [vmem:[#allocation25 + $0x8] sm:$0x3] %vm680_vm8, %v1787_v37 }
0x3287   :  { %v3596_v13 = vpop.eup %3595 }
0x3288   :  { %v2607_v55 = vmul.f32 0.6931472, %v3596_v13  ;;  %v3168_v18 = vpop.permute.xlu2 %3167  ;;  %v3598_v36 = vpop.eup %3597 }
0x3289   :  { %3170 = vst.msk [vmem:[#allocation26] sm:$0x3] %vm680_vm8, %v3168_v18  ;;  %v1233_v59 = vsel %vm680_vm8, %v3598_v36, 0.0 }
0x328a   :  { %v2608_v5 = vadd.f32 %v2607_v55, %v4996_v17  ;;  %v2053_v17 = vmul.f32 1.442695, %v2052_v29  ;;  %3196 = dma.vmem_to_hbm [thread:$0]  %s3192_s28, 32, %s3194_s25, [#allocation27]  }
0x328c   :  { %v2609_v23 = vsub.f32 %v4985_v50, %v2608_v5  ;;  %3599 = vpow2.f32 %v2053_v17 }
0x328d   :  { %3601 = vpow2.f32 %v2875_v56 }
0x328e   :  { %2611 = vst.msk [vmem:[#allocation25 + $0xe] sm:$0x3] %vm680_vm8, %v2609_v23 }
0x3292   :  { %v3600_v63 = vpop.eup %3599 }
0x3293   :  { %v2055_v30 = vsel %vm680_vm8, %v3600_v63, 0.0  ;;  %v3602_v57 = vpop.eup %3601 }
0x3294   :  { %v2877_v9 = vsel %vm680_vm8, %v3602_v57, 0.0 }
0x32ac   :  { %v3141_v6 = vpop.f32.mrf.mxu0 }
0x32ad   :  { %v5147_v52 = vadd.f32 %v3651_v12, %v3141_v6 }
0x32af   :  { %v3145_v50 = vsel %vm680_vm8, %v5147_v52, -inf }
0x32b0   :  { %3146 = vmax.xlane.f32.xlu0 %v3145_v50 }
0x32b4   :  { %v3143_v41 = vpop.f32.mrf.mxu0 }
0x32b8   :  { %1234 = vadd.xlane.f32.xlu0 %v1233_v59 }
0x32c0   :  { %2056 = vadd.xlane.f32.xlu0 %v2055_v30 }
0x32c8   :  { %2878 = vadd.xlane.f32.xlu0 %v2877_v9 }
0x3323   :  { %v3147_v27 = vpop.xlane.xlu0 %3146 }
0x3324   :  { %v3148_v28 = vsub.f32 %v5147_v52, %v3147_v27 }
0x3326   :  { %v3149_v16 = vmul.f32 1.442695, %v3148_v28 }
0x3328   :  { %3603 = vpow2.f32 %v3149_v16 }
0x332b   :  { %v1235_v2 = vpop.xlane.xlu0 %1234 }
0x332c   :  { %3605 = vlog2.f32 %v1235_v2 }
0x332e   :  { %v3604_v21 = vpop.eup %3603 }
0x332f   :  { %v3151_v1 = vsel %vm680_vm8, %v3604_v21, 0.0 }
0x3330   :  { %3152 = vadd.xlane.f32.xlu1 %v3151_v1 }
0x3332   :  { %v3606_v25 = vpop.eup %3605 }
0x3333   :  { %v1237_v62 = vmul.f32 0.6931472, %v3606_v25  ;;  %v2057_v60 = vpop.xlane.xlu0 %2056 }
0x3334   :  { %3607 = vlog2.f32 %v2057_v60 }
0x3335   :  { %v1238_v19 = vadd.f32 %v1237_v62, %v4538_v43 }
0x3337   :  { %v1239_v22 = vsub.f32 %v4528_v20, %v1238_v19 }
0x3339   :  { %1241 = vst.msk [vmem:[#allocation25 + $0x4] sm:$0x3] %vm680_vm8, %v1239_v22 }
0x333a   :  { %v3608_v26 = vpop.eup %3607 }
0x333b   :  { %v2059_v47 = vmul.f32 0.6931472, %v3608_v26  ;;  %v2879_v44 = vpop.xlane.xlu0 %2878 }
0x333c   :  { %3609 = vlog2.f32 %v2879_v44 }
0x333d   :  { %v2060_v49 = vadd.f32 %v2059_v47, %v4809_v35 }
0x333f   :  { %v2061_v31 = vsub.f32 %v4794_v46, %v2060_v49 }
0x3341   :  { %2063 = vst.msk [vmem:[#allocation25 + $0xa] sm:$0x3] %vm680_vm8, %v2061_v31 }
0x3342   :  { %v3610_v15 = vpop.eup %3609 }
0x3343   :  { %v2881_v4 = vmul.f32 0.6931472, %v3610_v15 }
0x3345   :  { %v2882_v43 = vadd.f32 %v2881_v4, %v5063_v40 }
0x3347   :  { %v2883_v48 = vsub.f32 %v5057_v39, %v2882_v43 }
0x3349   :  { %2885 = vst.msk [vmem:[#allocation25 + $0x10] sm:$0x3] %vm680_vm8, %v2883_v48 }
0x33a3   :  { %v3153_v20 = vpop.xlane.xlu1 %3152 }
0x33a4   :  { %3611 = vlog2.f32 %v3153_v20 }
0x33aa   :  { %v3612_v11 = vpop.eup %3611 }
0x33ab   :  { %v3155_v3 = vmul.f32 0.6931472, %v3612_v11 }
0x33ad   :  { %v3156_v46 = vadd.f32 %v3155_v3, %v3147_v27 }
0x33af   :  { %v3157_v35 = vsub.f32 %v5147_v52, %v3156_v46 }
0x33b1   :  { %3159 = vst.msk [vmem:[#allocation25 + $0x12] sm:$0x3] %vm680_vm8, %v3157_v35 }
0x33b2   :  { %3183 = dma.vmem_to_hbm [thread:$0]  %s3176_s10, 320, %s3178_s14, [#allocation6], %s4048_s29, %s4048_s29, %s4051_s30  }
0x33b3   :  { %4026 = dma.done.wait [#allocation6], 320  }
0x33b4   :  { %4027 = vsyncadd [#allocation6], 4294966976 }
0x33b5   :  { %4028 = dma.done.wait [#allocation27], 32  }
0x33b6   :  { %4029 = vsyncadd [#allocation27], 4294967264 }
0x33b7   :  { %3207 = vsyncpa [#allocation5], 1 }
0x33b8   :  { %3208 = vsyncpa [#allocation8], 1 }
0x33b9   :  { %3209 = vsyncpa [#allocation11], 1 }
0x33ba   :  { %3210 = vsyncpa [#allocation14], 1 }
0x33bb   :  { %3211 = vsyncpa [#allocation17], 1 }
0x33bc   :  { %3212 = vsyncpa [#allocation20], 1 }
0x33bd   :  { %3213 = vsyncpa [#allocation23], 1 }
0x33be   :  { %3214 = vsyncpa [#allocation6], 1 }
0x33bf   :  { %3215 = vsyncpa [#allocation27], 1 }

</bundles_post_ra>
